<compile_context>
chip_gen: v5e
topology: v5e:2x2
jax: 0.10.0
libtpu: 0.0.40
codegen_flags: <defaults>
</compile_context>

<pallas_src>
import functools
import math

import jax
import jax.numpy as jnp
from jax import lax
from jax.experimental import pallas as pl
from jax.experimental.pallas import tpu as pltpu


_NEG_INF = -1e30  # finite "minus infinity": keeps exp()/max() NaN-free in masked blocks


def _pick_tile(dim, candidates):
    """Largest candidate that divides dim; otherwise the full extent (always legal)."""
    for c in candidates:
        if c <= dim and dim % c == 0:
            return c
    # TODO(synk): pad M / S to a tile multiple instead of falling back to the full
    # extent for very large non-divisible dims (never fall back to tiny tiles).
    return dim


# --------------------- tiled projection kernels: y = x @ w.T ---------------------

def _proj_kernel_f32out(x_ref, w_ref, o_ref):
    # bf16 MXU operands, f32 accumulation directly into the resident output block
    # (output index_map is independent of the K grid axis).
    acc = lax.dot_general(
        x_ref[...].astype(jnp.bfloat16), w_ref[...].astype(jnp.bfloat16),
        dimension_numbers=(((1,), (1,)), ((), ())),
        preferred_element_type=jnp.float32)

    @pl.when(pl.program_id(2) == 0)
    def _first():
        o_ref[...] = acc

    @pl.when(pl.program_id(2) > 0)
    def _accum():
        o_ref[...] += acc


def _proj_kernel_scratch(x_ref, w_ref, o_ref, acc_ref):
    # Variant for non-f32 outputs: keep an f32 VMEM accumulator, cast at finalize.
    @pl.when(pl.program_id(2) == 0)
    def _init():
        acc_ref[...] = jnp.zeros_like(acc_ref)

    acc_ref[...] += lax.dot_general(
        x_ref[...].astype(jnp.bfloat16), w_ref[...].astype(jnp.bfloat16),
        dimension_numbers=(((1,), (1,)), ((), ())),
        preferred_element_type=jnp.float32)

    @pl.when(pl.program_id(2) == pl.num_programs(2) - 1)
    def _finalize():
        o_ref[...] = acc_ref[...].astype(o_ref.dtype)


def pallas_linear(x, w, *, out_dtype=None, tm=None, tn=None, tk=None):
    """y = x @ w.T with w stored (out_features, in_features) — cs336 Linear, no bias."""
    M, K = x.shape
    N, K2 = w.shape
    assert K == K2, (x.shape, w.shape)
    out_dtype = out_dtype or x.dtype
    tm = tm or _pick_tile(M, (512, 256, 128))
    tn = tn or _pick_tile(N, (512, 256, 128))
    tk = tk or _pick_tile(K, (512, 256, 128))
    grid = (M // tm, N // tn, K // tk)
    cost = pl.CostEstimate(
        flops=2 * M * N * K,
        transcendentals=0,
        bytes_accessed=(M * K * x.dtype.itemsize + N * K * w.dtype.itemsize
                        + M * N * jnp.dtype(out_dtype).itemsize))
    f32_out = jnp.dtype(out_dtype) == jnp.dtype(jnp.float32)
    kernel = _proj_kernel_f32out if f32_out else _proj_kernel_scratch
    scratch = [] if f32_out else [pltpu.VMEM((tm, tn), jnp.float32)]
    return pl.pallas_call(
        kernel,
        out_shape=jax.ShapeDtypeStruct((M, N), out_dtype),
        grid_spec=pltpu.PrefetchScalarGridSpec(
            num_scalar_prefetch=0,
            grid=grid,
            in_specs=[
                pl.BlockSpec((tm, tk), lambda i, j, k: (i, k)),
                pl.BlockSpec((tn, tk), lambda i, j, k: (j, k)),
            ],
            out_specs=pl.BlockSpec((tm, tn), lambda i, j, k: (i, j)),
            scratch_shapes=scratch,
        ),
        compiler_params=pltpu.CompilerParams(
            dimension_semantics=("parallel", "parallel", "arbitrary")),
        cost_estimate=cost,
    )(x, w)


# --------------------- K prep kernel: head slice + RoPE + bf16 cast ---------------------

def _prep_k_kernel(k_ref, cos_ref, sin_ref, o_ref, *, half, use_rope):
    k = k_ref[0].astype(jnp.float32)
    if use_rope:
        # Half-split RoPE: rotate_half == roll by d_head//2; sin carries [-sin | +sin].
        k = k * cos_ref[...] + pltpu.roll(k, half, 1) * sin_ref[...]
    o_ref[0] = k.astype(o_ref.dtype)


def pallas_prep_k(qkv, cos_tab, sin_tab, *, num_heads, use_rope, ts=None):
    """Slice K heads out of the (B, S, 3D) QKV slab, apply RoPE ONCE (instead of once
    per q tile inside attention), and emit a bf16 (B, S, D) K array."""
    B, S, D3 = qkv.shape
    H = num_heads
    D = D3 // 3
    Dh = D // H
    ts = ts or _pick_tile(S, (512, 256, 128))
    kernel = functools.partial(_prep_k_kernel, half=Dh // 2, use_rope=use_rope)
    return pl.pallas_call(
        kernel,
        out_shape=jax.ShapeDtypeStruct((B, S, D), jnp.bfloat16),
        grid_spec=pltpu.PrefetchScalarGridSpec(
            num_scalar_prefetch=0,
            grid=(B, H, S // ts),
            in_specs=[
                pl.BlockSpec((1, ts, Dh), lambda b, h, s: (b, s, H + h)),  # K head slice
                pl.BlockSpec((ts, Dh), lambda b, h, s: (s, 0)),
                pl.BlockSpec((ts, Dh), lambda b, h, s: (s, 0)),
            ],
            out_specs=pl.BlockSpec((1, ts, Dh), lambda b, h, s: (b, s, h)),
        ),
        compiler_params=pltpu.CompilerParams(
            dimension_semantics=("parallel", "parallel", "parallel")),
    )(qkv, cos_tab, sin_tab)


# --------------------- flash attention kernel (causal, fused Q-RoPE) ---------------------

def _flash_mha_kernel(q_ref, k_ref, v_ref, cos_ref, sin_ref, o_ref,
                      m_sc, l_sc, acc_sc, q_sc, *, scale, use_rope, tq, tkv):
    qi = pl.program_id(2)
    ki = pl.program_id(3)
    dh = q_ref.shape[2]

    @pl.when(ki == 0)
    def _init():
        m_sc[...] = jnp.full_like(m_sc, _NEG_INF)
        l_sc[...] = jnp.zeros_like(l_sc)
        acc_sc[...] = jnp.zeros_like(acc_sc)
        # Q-side RoPE + softmax scale hoisted out of the kv loop: once per q tile.
        q = q_ref[0].astype(jnp.float32)
        if use_rope:
            q_start = pl.multiple_of(qi * tq, tq)
            cs = cos_ref[pl.ds(q_start, tq), :]
            sn = sin_ref[pl.ds(q_start, tq), :]
            q = q * cs + pltpu.roll(q, dh // 2, 1) * sn
        q_sc[...] = (q * scale).astype(q_sc.dtype)

    def _attn_step(apply_mask):
        k = k_ref[0].astype(jnp.bfloat16)   # no-op when K came from the bf16 prep pass
        s = lax.dot_general(q_sc[...], k,
                            dimension_numbers=(((1,), (1,)), ((), ())),
                            preferred_element_type=jnp.float32)
        if apply_mask:
            row = qi * tq + lax.broadcasted_iota(jnp.int32, (tq, tkv), 0)
            col = ki * tkv + lax.broadcasted_iota(jnp.int32, (tq, tkv), 1)
            s = jnp.where(col <= row, s, _NEG_INF)
        m_prev = m_sc[...]
        m_new = jnp.maximum(m_prev, jnp.max(s, axis=-1, keepdims=True))
        alpha = jnp.exp(m_prev - m_new)
        # TODO(synk): on v6e/v7x a bf16 exp for p roughly doubles EUP throughput
        # (keep m/l in f32); do NOT do this on v5e (no bf16 EUP).
        p = jnp.exp(s - m_new)
        l_sc[...] = alpha * l_sc[...] + jnp.sum(p, axis=-1, keepdims=True)
        acc_sc[...] = alpha * acc_sc[...] + lax.dot_general(
            p.astype(jnp.bfloat16), v_ref[0].astype(jnp.bfloat16),
            dimension_numbers=(((1,), (0,)), ((), ())),
            preferred_element_type=jnp.float32)
        m_sc[...] = m_new

    # Diagonal-straddling block: causal mask required.
    on_diag = (ki * tkv < (qi + 1) * tq) & ((ki + 1) * tkv > qi * tq)
    # Fully below the diagonal: every (row, col) pair is valid, skip the mask entirely.
    below_diag = (ki + 1) * tkv <= qi * tq

    @pl.when(on_diag)
    def _masked_step():
        _attn_step(apply_mask=True)

    @pl.when(below_diag)
    def _unmasked_step():
        _attn_step(apply_mask=False)

    @pl.when(ki == pl.num_programs(3) - 1)
    def _finalize():
        o_ref[0] = (acc_sc[...] *
                    pl.reciprocal(l_sc[...], approx=True)).astype(o_ref.dtype)


def pallas_flash_mha(qkv, k, cos_tab, sin_tab, *, num_heads, use_rope=True,
                     tq=None, tkv=None):
    """Causal flash attention.  Q/V head tiles are sliced straight out of the (B,S,3D)
    QKV slab by the BlockSpec index_maps; k is the pre-rotated bf16 (B,S,D) array."""
    B, S, D3 = qkv.shape
    H = num_heads
    D = D3 // 3
    assert D % H == 0
    Dh = D // H
    # TODO(synk): pack multiple heads per program when d_head < 128 (lane-dense tiles).
    assert Dh % 128 == 0 or H == 1, (
        "BlockSpec head slicing needs d_head to be a multiple of 128 (or a single head)")
    tq = tq or _pick_tile(S, (256, 128))
    tkv = tkv or _pick_tile(S, (256, 128))
    nq, nkv = S // tq, S // tkv
    scale = 1.0 / math.sqrt(Dh)

    kernel = functools.partial(_flash_mha_kernel, scale=scale, use_rope=use_rope,
                               tq=tq, tkv=tkv)

    def kv_block(i, j):
        # Clamp above-diagonal kv steps to the last causally-valid block: the block
        # index repeats, so the pipeline elides the K/V DMA for skipped steps.
        return jnp.minimum(j, ((i + 1) * tq - 1) // tkv)

    q_spec = pl.BlockSpec((1, tq, Dh), lambda b, h, i, j: (b, i, h))
    k_spec = pl.BlockSpec((1, tkv, Dh), lambda b, h, i, j: (b, kv_block(i, j), h))
    v_spec = pl.BlockSpec((1, tkv, Dh), lambda b, h, i, j: (b, kv_block(i, j), 2 * H + h))
    # Full cos/sin tables resident in VMEM (constant block index -> fetched once).
    tab_spec = pl.BlockSpec((S, Dh), lambda b, h, i, j: (0, 0))
    out_spec = pl.BlockSpec((1, tq, Dh), lambda b, h, i, j: (b, i, h))

    cost = pl.CostEstimate(
        flops=2 * B * H * S * S * Dh,          # QK^T + PV under causal masking
        transcendentals=B * H * S * S // 2,    # exp
        bytes_accessed=(qkv.size * qkv.dtype.itemsize
                        + (k.size * k.dtype.itemsize * max(nq, 1)) // 2
                        + B * S * D * qkv.dtype.itemsize))

    return pl.pallas_call(
        kernel,
        out_shape=jax.ShapeDtypeStruct((B, S, D), qkv.dtype),
        grid_spec=pltpu.PrefetchScalarGridSpec(
            num_scalar_prefetch=0,
            grid=(B, H, nq, nkv),
            in_specs=[q_spec, k_spec, v_spec, tab_spec, tab_spec],
            out_specs=out_spec,
            scratch_shapes=[
                pltpu.VMEM((tq, 1), jnp.float32),      # running max
                pltpu.VMEM((tq, 1), jnp.float32),      # running sum
                pltpu.VMEM((tq, Dh), jnp.float32),     # output accumulator
                pltpu.VMEM((tq, Dh), jnp.bfloat16),    # rotated + scaled q (per q tile)
            ],
        ),
        compiler_params=pltpu.CompilerParams(
            dimension_semantics=("parallel", "parallel", "parallel", "arbitrary")),
        cost_estimate=cost,
    )(qkv, k, qkv, cos_tab, sin_tab)


# ------------------------------ wrapper / init-time prep ------------------------------

def rope_tables_halfsplit(positions, d_head, theta):
    """cos / signed-sin tables, shape (S, d_head), for the half-split RoPE layout."""
    half = d_head // 2
    inv_freq = 1.0 / (theta ** (jnp.arange(half, dtype=jnp.float32) * 2.0 / d_head))
    ang = positions.astype(jnp.float32)[:, None] * inv_freq[None, :]   # (S, half)
    cos, sin = jnp.cos(ang), jnp.sin(ang)
    cos_h = jnp.concatenate([cos, cos], axis=-1)
    sin_h = jnp.concatenate([-sin, sin], axis=-1)
    return cos_h, sin_h


def prepare_mhsa_params(params, num_heads, mxu_dtype=jnp.bfloat16):
    """One-time weight prep (init time, NOT per forward).

    * Permutes Q/K projection rows within each head from the interleaved RoPE pair
      layout (2i, 2i+1) to half-split ([all even | all odd]).  QK^T is invariant to a
      shared permutation and the in-kernel rotation becomes one pltpu.roll(d_head//2).
    * Stacks Wq/Wk/Wv into a single (3D, D) weight so QKV is one fused projection.
    * Casts weights to bf16 once (MXU-native operands, halved weight HBM traffic).
    """
    wq, wk, wv, wo = params["wq"], params["wk"], params["wv"], params["wo"]
    D = wq.shape[0]
    Dh = D // num_heads
    half = Dh // 2
    within = jnp.concatenate([2 * jnp.arange(half, dtype=jnp.int32),
                              2 * jnp.arange(half, dtype=jnp.int32) + 1])
    perm = (jnp.arange(num_heads, dtype=jnp.int32)[:, None] * Dh
            + within[None, :]).reshape(-1)
    w_qkv = jnp.concatenate([wq[perm, :], wk[perm, :], wv], axis=0).astype(mxu_dtype)
    return {"w_qkv": w_qkv, "wo": wo.astype(mxu_dtype)}


def multi_head_self_attention(x, prepared_params, num_heads, theta=10000.0,
                              use_rope=True, token_positions=None):
    """Forward pass of MultiHeadSelfAttention (params from prepare_mhsa_params)."""
    B, S, D = x.shape
    H = num_heads
    Dh = D // H

    x2d = x.reshape(B * S, D)                                # free reshape, no transpose
    qkv = pallas_linear(x2d, prepared_params["w_qkv"])       # fused QKV: (B*S, 3D) f32
    qkv = qkv.reshape(B, S, 3 * D)

    if token_positions is None:
        token_positions = jnp.arange(S, dtype=jnp.int32)
    # TODO(synk): per-batch token_positions (shape (B, S)) would need batched tables.
    cos_h, sin_h = rope_tables_halfsplit(token_positions, Dh, theta)

    # K prep: slice K heads from the slab, RoPE once (not once per q tile), emit bf16.
    k_rot = pallas_prep_k(qkv, cos_h, sin_h, num_heads=H, use_rope=use_rope)

    attn = pallas_flash_mha(qkv, k_rot, cos_h, sin_h,
                            num_heads=H, use_rope=use_rope)   # (B, S, D) lane-dense

    out = pallas_linear(attn.reshape(B * S, D), prepared_params["wo"])
    return out.reshape(B, S, D)


# --------------------------------- JAX reference ---------------------------------

def _apply_rope_interleaved(x, positions, theta):
    Dh = x.shape[-1]
    half = Dh // 2
    inv_freq = 1.0 / (theta ** (jnp.arange(half, dtype=jnp.float32) * 2.0 / Dh))
    ang = positions.astype(jnp.float32)[:, None] * inv_freq[None, :]
    cos, sin = jnp.cos(ang), jnp.sin(ang)
    x1, x2 = x[..., 0::2], x[..., 1::2]
    o1 = x1 * cos - x2 * sin
    o2 = x1 * sin + x2 * cos
    return jnp.stack([o1, o2], axis=-1).reshape(x.shape)


def reference_mhsa(x, params, num_heads, theta=10000.0, use_rope=True):
    B, S, D = x.shape
    H, Dh = num_heads, D // num_heads

    def proj(w):
        return (x @ w.T).reshape(B, S, H, Dh).transpose(0, 2, 1, 3)

    qx, kx, vx = proj(params["wq"]), proj(params["wk"]), proj(params["wv"])
    pos = jnp.arange(S, dtype=jnp.int32)
    if use_rope:
        qx = _apply_rope_interleaved(qx, pos, theta)
        kx = _apply_rope_interleaved(kx, pos, theta)
    scores = jnp.einsum("bhqd,bhkd->bhqk", qx, kx) / math.sqrt(Dh)
    mask = jnp.tril(jnp.ones((S, S), dtype=bool))
    scores = jnp.where(mask, scores, -jnp.inf)
    probs = jax.nn.softmax(scores, axis=-1)
    attn = jnp.einsum("bhqk,bhkd->bhqd", probs, vx)
    attn = attn.transpose(0, 2, 1, 3).reshape(B, S, D)
    return attn @ params["wo"].T


# ------------------------------------- main -------------------------------------

if __name__ == "__main__":
    # Smallest shapes that keep d_head lane-dense (=128), exercise the tiled K-reduction,
    # the fused-QKV slab slicing, and a multi-step causal kv loop (diag + below-diag).
    B, S, D, H = 2, 512, 512, 4
    key = jax.random.PRNGKey(0)
    kx_, kq, kk, kv, ko = jax.random.split(key, 5)

    x = jax.random.normal(kx_, (B, S, D), dtype=jnp.float32)
    params = {
        "wq": jax.random.normal(kq, (D, D), dtype=jnp.float32) * 0.02,
        "wk": jax.random.normal(kk, (D, D), dtype=jnp.float32) * 0.02,
        "wv": jax.random.normal(kv, (D, D), dtype=jnp.float32) * 0.02,
        "wo": jax.random.normal(ko, (D, D), dtype=jnp.float32) * 0.02,
    }

    prepared = prepare_mhsa_params(params, num_heads=H)   # one-time, init-style prep
    out = multi_head_self_attention(x, prepared, num_heads=H)
    out = jax.block_until_ready(out)

    ref = jax.block_until_ready(reference_mhsa(x, params, num_heads=H))
    assert out.shape == (B, S, D)
    max_err = float(jnp.max(jnp.abs(out - ref)))
    # bf16 MXU operands (f32 accumulation) vs the f32 reference -> loosened tolerance.
    assert jnp.allclose(out, ref, atol=2e-2, rtol=2e-2), f"mismatch vs reference: {max_err}"

    print("KERNEL_OK")
</pallas_src>

<mosaic_0001>
module attributes {stable_mosaic.version = 11 : i64} {
  func.func @_proj_kernel_f32out(%arg0: i32, %arg1: i32, %arg2: i32, %arg3: memref<512x512xf32, #tpu.memory_space<vmem>>, %arg4: memref<512x512xbf16, #tpu.memory_space<vmem>>, %arg5: memref<512x512xf32, #tpu.memory_space<vmem>>) attributes {dimension_semantics = [#tpu.dimension_semantics<parallel>, #tpu.dimension_semantics<parallel>, #tpu.dimension_semantics<arbitrary>], iteration_bounds = array<i64: 2, 3, 1>, scalar_prefetch = 0 : i64, scratch_operands = 0 : i64, tpu.core_type = #tpu.core_type<tc>, window_params = [{transform_indices = @transform_0, window_bounds = array<i64: 512, 512>}, {transform_indices = @transform_1, window_bounds = array<i64: 512, 512>}, {transform_indices = @transform_2, window_bounds = array<i64: 512, 512>}]} {
    %c0 = arith.constant 0 : index
    %c0_0 = arith.constant 0 : index
    %0 = vector.load %arg3[%c0, %c0_0] : memref<512x512xf32, #tpu.memory_space<vmem>>, vector<512x512xf32>
    %1 = arith.truncf %0 : vector<512x512xf32> to vector<512x512xbf16>
    %c0_1 = arith.constant 0 : index
    %c0_2 = arith.constant 0 : index
    %2 = vector.load %arg4[%c0_1, %c0_2] : memref<512x512xbf16, #tpu.memory_space<vmem>>, vector<512x512xbf16>
    %cst = arith.constant dense<0.000000e+00> : vector<512x512xf32>
    %3 = tpu.matmul %1, %2, %cst {dimension_numbers = #tpu.dot_dimension_numbers<[1], [1], [0], [0], [0, 0, 1, 0], [], []>} : vector<512x512xbf16>, vector<512x512xbf16>, vector<512x512xf32> -> vector<512x512xf32>
    %c0_i32 = arith.constant 0 : i32
    %4 = arith.cmpi eq, %arg2, %c0_i32 : i32
    %5 = arith.extui %4 : i1 to i32
    %c0_i32_3 = arith.constant 0 : i32
    %6 = arith.cmpi ne, %5, %c0_i32_3 : i32
    scf.if %6 {
      %c0_6 = arith.constant 0 : index
      %c0_7 = arith.constant 0 : index
      %10 = vector.load %arg5[%c0_6, %c0_7] : memref<512x512xf32, #tpu.memory_space<vmem>>, vector<512x512xf32>
      tpu.vector_store %arg5[%c0_6, %c0_7], %3 {strides = array<i32>} : memref<512x512xf32, #tpu.memory_space<vmem>>, vector<512x512xf32>,
    } else {
    }
    %c0_i32_4 = arith.constant 0 : i32
    %7 = arith.cmpi sgt, %arg2, %c0_i32_4 : i32
    %8 = arith.extui %7 : i1 to i32
    %c0_i32_5 = arith.constant 0 : i32
    %9 = arith.cmpi ne, %8, %c0_i32_5 : i32
    scf.if %9 {
      %c0_6 = arith.constant 0 : index
      %c0_7 = arith.constant 0 : index
      %10 = vector.load %arg5[%c0_6, %c0_7] : memref<512x512xf32, #tpu.memory_space<vmem>>, vector<512x512xf32>
      %11 = arith.addf %10, %3 : vector<512x512xf32>
      %c0_8 = arith.constant 0 : index
      %c0_9 = arith.constant 0 : index
      %12 = vector.load %arg5[%c0_8, %c0_9] : memref<512x512xf32, #tpu.memory_space<vmem>>, vector<512x512xf32>
      tpu.vector_store %arg5[%c0_8, %c0_9], %11 {strides = array<i32>} : memref<512x512xf32, #tpu.memory_space<vmem>>, vector<512x512xf32>,
    } else {
    }
    return
  }
  func.func @transform_0(%arg0: i32, %arg1: i32, %arg2: i32) -> (i32, i32) {
    %c0_i32 = arith.constant 0 : i32
    return %arg0, %arg2 : i32, i32
  }
  func.func @transform_1(%arg0: i32, %arg1: i32, %arg2: i32) -> (i32, i32) {
    %c0_i32 = arith.constant 0 : i32
    return %arg1, %arg2 : i32, i32
  }
  func.func @transform_2(%arg0: i32, %arg1: i32, %arg2: i32) -> (i32, i32) {
    %c0_i32 = arith.constant 0 : i32
    return %arg0, %arg1 : i32, i32
  }
}

</mosaic_0001>

<bundles_post_ra>
// kernel: tpu_custom_call.1
= control target key start
LH: loop header
LB: loop body
LE: loop exit
PB: predicated region body
PF: predicated region fallthrough
CT: control target
= control target key end

     0   :  { %s8106_s0 = inlined_call_operand.hbm [shape: f32[1024,512], index: 0, kind: input, shape index: {}]   ;;  %s8107_s1 = inlined_call_operand.hbm [shape: bf16[1536,512], index: 1, kind: input, shape index: {}]   ;;  %s8108_s2 = inlined_call_operand.hbm [shape: f32[1024,1536], index: 2, kind: output, shape index: {}]  }
   0x1   :  { %8283 = sst [smem:[#allocation101_spill]] %s8106_s0 }
   0x2   :  { %8284 = sst [smem:[#allocation102_spill]] %s8108_s2 }
   0x3   :  { %7 = vsyncpa [#allocation3], 0 }
   0x4   :  { %9 = vsyncpa [#allocation3 + $0x1], 0 }
   0x5   :  { %10 = vsyncpa [#allocation6], 0 }
   0x6   :  { %12 = vsyncpa [#allocation6 + $0x1], 0 }
   0x7   :  { %13 = vsyncpa [#allocation4], 0 }
   0x8   :  { %15 = vsyncpa [#allocation4 + $0x1], 0  ;;  %s6309_s9 = smov 0   ;;  %s6311_s10 = smov 0  }
   0x9   :  { %s6313_s11 = smov 0   ;;  %s6315_s12 = smov 0  }
   0xa   :  { %s6317_s13 = smov 0   ;;  %s6319_s14 = smov 0  }
   0xb   :  { %s6321_s15 = smov 0   ;;  %s6323_s16 = smov 0  }
   0xc   :  { %s6325_s17 = smov 0   ;;  %s6327_s18 = smov 0  }
   0xd   :  { %s6329_s19 = smov 0   ;;  %s6331_s20 = smov 0  }
   0xe   :  { %s6333_s21 = smov 0   ;;  %s6335_s22 = smov 0  }
   0xf LB: > { %8285 = sst [smem:[#allocation11_spill]] %s6269_s18  ;;  %s5269_s23 = sadd.s32 4294967295, %s6285_s22   ;;  %s6285_s22 = sphi %s6335_s22, %s21_s22   ;;  %s6281_s21 = sphi %s6333_s21, %s8638_s21   ;;  %s6277_s20 = sphi %s6331_s20, %s8650_s20   ;;  %s6273_s19 = sphi %s6329_s19, %s8649_s19   ;;  %s6269_s18 = sphi %s6327_s18, %s8648_s18   ;;  %s6265_s17 = sphi %s6325_s17, %s8647_s17   ;;  %s6261_s16 = sphi %s6323_s16, %s8646_s16   ;;  %s6257_s15 = sphi %s6321_s15, %s8645_s15   ;;  %s6253_s14 = sphi %s6319_s14, %s8644_s14   ;;  %s6249_s13 = sphi %s6317_s13, %s8643_s13   ;;  %s6245_s12 = sphi %s6315_s12, %s8642_s12   ;;  %s6241_s11 = sphi %s6313_s11, %s8641_s11   ;;  %s6237_s10 = sphi %s6311_s10, %s8640_s10   ;;  %s6233_s9 = sphi %s6309_s9, %s8639_s9  }
  0x10   : > { %8286 = sst [smem:[#allocation12_spill]] %s6281_s21  ;;  %s40_s24 = sadd.s32 1, %s6281_s21 }
  0x11   : > { %s49_s25 = sadd.s32 1, %s6265_s17  ;;  %p56_p0 = scmp.ne.s32.totalorder %s6265_s17, %s6261_s16 }
  0x12   : > { %p57_p1 = scmp.eq.s32.totalorder %s6285_s22, 0  ;;  %p62_p2 = scmp.ne.s32.totalorder %s6261_s16, %s6257_s15 }
  0x13   : > { %p6384_p3 = scmp.eq.s32.totalorder %s5269_s23, 0  ;;  %p6388_p4 = scmp.eq.s32.totalorder %s5269_s23, 5 }
  0x14   : > { %p58_p5 = por %p57_p1, %p56_p0  ;;  %p5954_p7 = scmp.lt.s32.totalorder %s6285_s22, 6 }
  0x15   : > { %p6396_p6 = por %p6384_p3, %p62_p2  ;;  %s142_s29 = sand.u32 1, %s6265_s17  }
  0x16   : > { %s5805_s30 = sshll.u32 %s6281_s21, 11  ;;  %s5273_s3 = sshll.u32 %s142_s29, 11 }
  0x17   : > { %s8290_s0 = sld [smem:[#allocation101_spill]]  ;;  %s146_s8 = scalar_lea.vmem [#allocation2], %s5273_s3 }
  0x18   : > { %s157_s15 = sshll.u32 %s146_s8, 4  ;;  %p5944_p8 = pnand %p5954_p7, %p58_p5  ;;  %s158_s15 = int_to_ptr.vmem [resolvable:$true] %s157_s15 }
  0x19   : > { %p5281_p9 = scmp.ge.s32.totalorder %s6285_s22, 1  ;;  %p190_p10 = scmp.lt.s32.totalorder %s6285_s22, 7 }
  0x1a   : > { %s143_s23 = scalar_lea.sflag [#allocation3], %s142_s29  ;;  %s6288_s4 = smov 32  }
  0x1b   : > { %p6410_p11 = pnand %p5281_p9, %p190_p10  ;;  %s5270_s5 = sadd.s32 4294967294, %s6285_s22  }
  0x1c   : > { %s77_s8 = sadd.s32 1, %s6253_s14  ;;  %p84_p13 = scmp.ne.s32.totalorder %s6253_s14, %s6249_s13 }
  0x1d   : > { %s154_s6 = scalar_lea.hbm %s8290_s0, %s5805_s30  ;;  %s6287_s30 = smov 512  }
  0x1e   : > { %s155_s7 = sshll.u32 %s154_s6, 4  ;;  %s36_s6 = sadd.s32 1, %s6277_s20  ;;  %s156_s7 = int_to_ptr.hbm [resolvable:$true] %s155_s7 }
  0x1f   : > { %5946 = dma.hbm_to_vmem [thread:$0]  (!%p5944_p8), %s156_s7, 32768, %s158_s15, %s143_s23, %s6287_s30, %s6287_s30, %s6288_s4  }
  0x20   : > { %p38_p12 = scmp.ge.s32.totalorder %s36_s6, 3  ;;  %p90_p0 = scmp.ne.s32.totalorder %s6249_s13, %s6245_s12 }
  0x21   : > { %s105_s29 = sadd.s32 1, %s6241_s11  ;;  %p6431_p2 = por %p84_p13, %p57_p1 }
  0x22   : > { %s8652_s6 = smov (%p38_p12, %s36_s6), 0  ;;  %s8654_s24 = smov (!%p38_p12, %s40_s24), %s6281_s21 }
  0x23   : > { %8292 = sst [smem:[#allocation13_spill]] %s8652_s6  ;;  %s72_s7 = ssub.s32 %s6277_s20, %s8652_s6 }
  0x24   : > { %p42_p5 = scmp.ge.s32.totalorder %s8654_s24, 2  ;;  %p75_p8 = scmp.eq.s32.totalorder %s72_s7, 0 }
  0x25   : > { %p6437_p9 = por %p90_p0, %p6384_p3  ;;  %p115_p10 = scmp.ne.s32.totalorder %s6241_s11, %s6237_s10 }
  0x26   : > { %s8656_s24 = smov (%p42_p5, %s8654_s24), 0  ;;  %p121_p13 = scmp.ne.s32.totalorder %s6237_s10, %s6233_s9 }
  0x27   : > { %8295 = sst [smem:[#allocation14_spill]] %s8656_s24  ;;  %s44_s30 = ssub.s32 %s6281_s21, %s8656_s24 }
  0x28   : > { %s6446_s23 = scalar_select %p75_p8, %s6253_s14, %s77_s8  }
  0x29   : > { %p6452_p1 = por %p6388_p4, %p115_p10  ;;  %p47_p12 = scmp.eq.s32.totalorder %s44_s30, 0 }
  0x2a   : > { %8296 = sst [smem:[#allocation15_spill]] %s6446_s23  ;;  %s102_s26 = sor.u32 %s72_s7, %s44_s30 }
  0x2b   : > { %s8297_s4 = scalar_select %p6452_p1, 1, 0 }
  0x2c   : > { %p103_p3 = scmp.eq.s32.totalorder %s102_s26, 0  ;;  %p122_p0 = scmp.eq.s32.totalorder %s5270_s5, 5 }
  0x2d   : > { %8298 = sst [smem:[#allocation16_spill]] %s8297_s4  ;;  %s167_s8 = sand.u32 1, %s6253_s14  }
  0x2e   : > { %s6461_s0 = scalar_select %p47_p12, %s6265_s17, %s49_s25  }
  0x2f   : > { %s6464_s6 = scalar_select %p103_p3, %s6241_s11, %s105_s29  }
  0x30   : > { %s5277_s23 = sshll.u32 %s167_s8, 10  ;;  %p6467_p5 = por %p122_p0, %p121_p13 }
  0x31   : > { %s5807_s24 = sshll.u32 %s6277_s20, 10  ;;  %s171_s21 = scalar_lea.vmem [#allocation5], %s5277_s23 }
  0x32   : > { %s182_s4 = sshll.u32 %s171_s21, 4  ;;  %s179_s7 = scalar_lea.hbm %s8107_s1, %s5807_s24  ;;  %s183_s4 = int_to_ptr.vmem [resolvable:$true] %s182_s4 }
  0x33   : > { %s180_s30 = sshll.u32 %s179_s7, 4  ;;  %p5947_p4 = pnand %p5954_p7, %p6431_p2  ;;  %s181_s30 = int_to_ptr.hbm [resolvable:$true] %s180_s30 }
  0x34   : > { %s168_s25 = scalar_lea.sflag [#allocation6], %s167_s8  ;;  %s6289_s5 = smov 256  }
  0x35   : > { %s6290_s29 = smov 16   ;;  %194 = sbr.rel (%p6410_p11) target bundleno = 2315 (0x90b), region = 28 }
  0x36   : > { %5949 = dma.hbm_to_vmem [thread:$0]  (!%p5947_p4), %s181_s30, 16384, %s183_s4, %s168_s25, %s6289_s5, %s6289_s5, %s6290_s29  }
  0x3a   : > { %s196_s21 = sand.u32 1, %s6261_s16  }
  0x3b   : > { %s5282_s23 = sshll.u32 %s196_s21, 11  ;;  %s197_s26 = scalar_lea.sflag [#allocation3], %s196_s21 }
  0x3c   : > { %s6482_s2 = scalar_lea.vmem [#allocation2], %s5282_s23 }
  0x3d   : > { %6220 = dma.done.wait (%p6396_p6), %s197_s26, 32768  }
  0x3e   : > { %6222 = vsyncadd (%p6396_p6), %s197_s26, 4294934528  ;;  %s206_s18 = sand.u32 1, %s6249_s13  }
  0x3f   : > { %s5283_s24 = sshll.u32 %s206_s18, 10  ;;  %s207_s15 = scalar_lea.sflag [#allocation6], %s206_s18 }
  0x40   : > { %s6489_s4 = scalar_lea.vmem [#allocation5], %s5283_s24 }
  0x41   : > { %6224 = dma.done.wait (%p6437_p9), %s207_s15, 16384  }
  0x42   : > { %6226 = vsyncadd (%p6437_p9), %s207_s15, 4294950912  ;;  %v5399_v0 = vld [vmem:[%s6489_s4 + $0xe0] sm:$0xf]  ;;  %v5838_v1 = vld [vmem:[%s6489_s4 + $0xec] sm:$0xf0]  ;;  %s234_s28 = sand.u32 1, %s6237_s10  }
  0x43   : > { %v5836_v2 = vld [vmem:[%s6489_s4 + $0xe4] sm:$0xf]  ;;  %v5400_v3 = vor.u32 %v5838_v1, %v5399_v0  ;;  %v5401_v4 = vld [vmem:[%s6489_s4 + $0xf0] sm:$0xf0]  ;;  %v5407_v5 = vld [vmem:[%s6489_s4 + $0xe8] sm:$0xf] }
  0x44   : > { %v5839_v6 = vld [vmem:[%s6489_s4 + $0xf4] sm:$0xf0]  ;;  %v5404_v7 = vor.u32 %v5836_v2, %v5401_v4  ;;  %v5837_v9 = vld [vmem:[%s6489_s4 + $0xec] sm:$0xf]  ;;  %v5409_v10 = vld [vmem:[%s6489_s4 + $0xf8] sm:$0xf0] }
  0x45   : > { %v5408_v8 = vor.u32 %v5839_v6, %v5407_v5  ;;  %1395 = vmatpush.bf16.xpose.msra.mxu0 %v5400_v3  ;;  %v5412_v11 = vor.u32 %v5837_v9, %v5409_v10  ;;  %v5383_v12 = vld [vmem:[%s6489_s4 + $0xc0] sm:$0xf]  ;;  %v5834_v13 = vld [vmem:[%s6489_s4 + $0xcc] sm:$0xf0]  ;;  %v5832_v14 = vld [vmem:[%s6489_s4 + $0xc4] sm:$0xf] }
  0x46   : > { %1564 = vmatpush.bf16.xpose.msra.mxu1 %v5404_v7  ;;  %v5385_v15 = vld [vmem:[%s6489_s4 + $0xd0] sm:$0xf0]  ;;  %v5391_v16 = vld [vmem:[%s6489_s4 + $0xc8] sm:$0xf]  ;;  %v5835_v17 = vld [vmem:[%s6489_s4 + $0xd4] sm:$0xf0]  ;;  %v5384_v20 = vor.u32 %v5834_v13, %v5383_v12 }
  0x47   : > { %1733 = vmatpush.bf16.xpose.msra.mxu2 %v5408_v8  ;;  %1902 = vmatpush.bf16.xpose.msra.mxu3 %v5412_v11  ;;  %v5833_v18 = vld [vmem:[%s6489_s4 + $0xcc] sm:$0xf]  ;;  %v5393_v19 = vld [vmem:[%s6489_s4 + $0xd8] sm:$0xf0]  ;;  %v5388_v21 = vor.u32 %v5832_v14, %v5385_v15  ;;  %v5392_v22 = vor.u32 %v5835_v17, %v5391_v16  ;;  %v5367_v24 = vld [vmem:[%s6489_s4 + $0xa0] sm:$0xf] }
  0x48   : > { %v5396_v23 = vor.u32 %v5833_v18, %v5393_v19  ;;  %v5830_v25 = vld [vmem:[%s6489_s4 + $0xac] sm:$0xf0]  ;;  %v5828_v26 = vld [vmem:[%s6489_s4 + $0xa4] sm:$0xf]  ;;  %v5369_v27 = vld [vmem:[%s6489_s4 + $0xb0] sm:$0xf0] }
  0x49   : > { %v5375_v28 = vld [vmem:[%s6489_s4 + $0xa8] sm:$0xf]  ;;  %v5831_v29 = vld [vmem:[%s6489_s4 + $0xb4] sm:$0xf0]  ;;  %v5829_v30 = vld [vmem:[%s6489_s4 + $0xac] sm:$0xf]  ;;  %v5368_v32 = vor.u32 %v5830_v25, %v5367_v24  ;;  %v5372_v33 = vor.u32 %v5828_v26, %v5369_v27 }
  0x4a   : > { %v5377_v31 = vld [vmem:[%s6489_s4 + $0xb8] sm:$0xf0]  ;;  %v5376_v34 = vor.u32 %v5831_v29, %v5375_v28  ;;  %v5351_v36 = vld [vmem:[%s6489_s4 + $0x80] sm:$0xf]  ;;  %v5826_v37 = vld [vmem:[%s6489_s4 + $0x8c] sm:$0xf0] }
  0x4b   : > { %v5380_v35 = vor.u32 %v5829_v30, %v5377_v31  ;;  %v5824_v38 = vld [vmem:[%s6489_s4 + $0x84] sm:$0xf]  ;;  %v5353_v39 = vld [vmem:[%s6489_s4 + $0x90] sm:$0xf0]  ;;  %v5359_v40 = vld [vmem:[%s6489_s4 + $0x88] sm:$0xf]  ;;  %v5352_v44 = vor.u32 %v5826_v37, %v5351_v36 }
  0x4c   : > { %v5827_v41 = vld [vmem:[%s6489_s4 + $0x94] sm:$0xf0]  ;;  %v5825_v42 = vld [vmem:[%s6489_s4 + $0x8c] sm:$0xf]  ;;  %v5361_v43 = vld [vmem:[%s6489_s4 + $0x98] sm:$0xf0]  ;;  %v5356_v45 = vor.u32 %v5824_v38, %v5353_v39 }
  0x4d   : > { %1396 = vmatpush.bf16.xpose.msra.mxu0 %v5384_v20  ;;  %v5360_v46 = vor.u32 %v5827_v41, %v5359_v40  ;;  %v5364_v47 = vor.u32 %v5825_v42, %v5361_v43  ;;  %v5335_v48 = vld [vmem:[%s6489_s4 + $0x60] sm:$0xf]  ;;  %v5822_v49 = vld [vmem:[%s6489_s4 + $0x6c] sm:$0xf0]  ;;  %v5820_v50 = vld [vmem:[%s6489_s4 + $0x64] sm:$0xf] }
  0x4e   : > { %1565 = vmatpush.bf16.xpose.msra.mxu1 %v5388_v21  ;;  %v5337_v51 = vld [vmem:[%s6489_s4 + $0x70] sm:$0xf0]  ;;  %v5343_v52 = vld [vmem:[%s6489_s4 + $0x68] sm:$0xf]  ;;  %v5823_v53 = vld [vmem:[%s6489_s4 + $0x74] sm:$0xf0]  ;;  %v5336_v56 = vor.u32 %v5822_v49, %v5335_v48 }
  0x4f   : > { %1734 = vmatpush.bf16.xpose.msra.mxu2 %v5392_v22  ;;  %1903 = vmatpush.bf16.xpose.msra.mxu3 %v5396_v23  ;;  %v5821_v54 = vld [vmem:[%s6489_s4 + $0x6c] sm:$0xf]  ;;  %v5345_v55 = vld [vmem:[%s6489_s4 + $0x78] sm:$0xf0]  ;;  %v5340_v57 = vor.u32 %v5820_v50, %v5337_v51  ;;  %v5344_v58 = vor.u32 %v5823_v53, %v5343_v52  ;;  %v5319_v60 = vld [vmem:[%s6489_s4 + $0x40] sm:$0xf] }
  0x50   : > { %v5348_v59 = vor.u32 %v5821_v54, %v5345_v55  ;;  %v5818_v61 = vld [vmem:[%s6489_s4 + $0x4c] sm:$0xf0]  ;;  %v5816_v62 = vld [vmem:[%s6489_s4 + $0x44] sm:$0xf]  ;;  %v5321_v63 = vld [vmem:[%s6489_s4 + $0x50] sm:$0xf0] }
  0x51   : > { %v5327_v0 = vld [vmem:[%s6489_s4 + $0x48] sm:$0xf]  ;;  %v5819_v1 = vld [vmem:[%s6489_s4 + $0x54] sm:$0xf0]  ;;  %v5817_v2 = vld [vmem:[%s6489_s4 + $0x4c] sm:$0xf]  ;;  %v5320_v4 = vor.u32 %v5818_v61, %v5319_v60  ;;  %v5324_v5 = vor.u32 %v5816_v62, %v5321_v63 }
  0x52   : > { %v5329_v3 = vld [vmem:[%s6489_s4 + $0x58] sm:$0xf0]  ;;  %v5328_v6 = vor.u32 %v5819_v1, %v5327_v0  ;;  %v5303_v8 = vld [vmem:[%s6489_s4 + $0x20] sm:$0xf]  ;;  %v5814_v9 = vld [vmem:[%s6489_s4 + $0x2c] sm:$0xf0] }
  0x53   : > { %v5332_v7 = vor.u32 %v5817_v2, %v5329_v3  ;;  %v5812_v10 = vld [vmem:[%s6489_s4 + $0x24] sm:$0xf]  ;;  %v5305_v11 = vld [vmem:[%s6489_s4 + $0x30] sm:$0xf0]  ;;  %v5311_v12 = vld [vmem:[%s6489_s4 + $0x28] sm:$0xf]  ;;  %v5304_v16 = vor.u32 %v5814_v9, %v5303_v8 }
  0x54   : > { %v5815_v13 = vld [vmem:[%s6489_s4 + $0x34] sm:$0xf0]  ;;  %v5813_v14 = vld [vmem:[%s6489_s4 + $0x2c] sm:$0xf]  ;;  %v5313_v15 = vld [vmem:[%s6489_s4 + $0x38] sm:$0xf0]  ;;  %v5308_v17 = vor.u32 %v5812_v10, %v5305_v11 }
  0x55   : > { %1397 = vmatpush.bf16.xpose.msra.mxu0 %v5368_v32  ;;  %v5312_v18 = vor.u32 %v5815_v13, %v5311_v12  ;;  %v5316_v19 = vor.u32 %v5813_v14, %v5313_v15  ;;  %v5287_v20 = vld [vmem:[%s6489_s4] sm:$0xf]  ;;  %v5810_v21 = vld [vmem:[%s6489_s4 + $0xc] sm:$0xf0]  ;;  %v5808_v22 = vld [vmem:[%s6489_s4 + $0x4] sm:$0xf] }
  0x56   : > { %1566 = vmatpush.bf16.xpose.msra.mxu1 %v5372_v33  ;;  %v5289_v23 = vld [vmem:[%s6489_s4 + $0x10] sm:$0xf0]  ;;  %v5295_v24 = vld [vmem:[%s6489_s4 + $0x8] sm:$0xf]  ;;  %v5811_v25 = vld [vmem:[%s6489_s4 + $0x14] sm:$0xf0]  ;;  %v5288_v31 = vor.u32 %v5810_v21, %v5287_v20 }
  0x57   : > { %1735 = vmatpush.bf16.xpose.msra.mxu2 %v5376_v34  ;;  %1904 = vmatpush.bf16.xpose.msra.mxu3 %v5380_v35  ;;  %v5809_v26 = vld [vmem:[%s6489_s4 + $0xc] sm:$0xf]  ;;  %v5297_v27 = vld [vmem:[%s6489_s4 + $0x18] sm:$0xf0]  ;;  %v5535_v28 = vld [vmem:[%s6489_s4 + $0x1e8] sm:$0xf]  ;;  %v5292_v35 = vor.u32 %v5808_v22, %v5289_v23  ;;  %v5296_v36 = vor.u32 %v5811_v25, %v5295_v24 }
  0x58   : > { %v5871_v29 = vld [vmem:[%s6489_s4 + $0x1f4] sm:$0xf0]  ;;  %v5869_v30 = vld [vmem:[%s6489_s4 + $0x1ec] sm:$0xf]  ;;  %v5537_v32 = vld [vmem:[%s6489_s4 + $0x1f8] sm:$0xf0]  ;;  %v5300_v39 = vor.u32 %v5809_v26, %v5297_v27 }
  0x59   : > { %v5527_v33 = vld [vmem:[%s6489_s4 + $0x1e0] sm:$0xf]  ;;  %v5870_v34 = vld [vmem:[%s6489_s4 + $0x1ec] sm:$0xf0]  ;;  %v5868_v37 = vld [vmem:[%s6489_s4 + $0x1e4] sm:$0xf]  ;;  %v5536_v40 = vor.u32 %v5871_v29, %v5535_v28  ;;  %v5540_v41 = vor.u32 %v5869_v30, %v5537_v32 }
  0x5a   : > { %v5529_v38 = vld [vmem:[%s6489_s4 + $0x1f0] sm:$0xf0]  ;;  %v5528_v42 = vor.u32 %v5870_v34, %v5527_v33  ;;  %v243_v43 = vld [vmem:[%s6482_s2] sm:$0xff]  ;;  %v246_v50 = vld [vmem:[%s6482_s2 + $0x18] sm:$0xff]  ;;  %s5284_s3 = sshll.u32 %s234_s28, 11  ;;  %s8631_s8 = sld [smem:[#allocation11_spill]] }
  0x5b   : > { %v245_v48 = vld [vmem:[%s6482_s2 + $0x10] sm:$0xff]  ;;  %v250_v51 = vld [vmem:[%s6482_s2 + $0x38] sm:$0xff]  ;;  %v5511_v21 = vld [vmem:[%s6489_s4 + $0x1c0] sm:$0xf]  ;;  %s6766_s12 = scalar_lea.vmem [#allocation7], %s5284_s3  ;;  %s5936_s7 = smul.u32 768, %s6273_s19 }
  0x5c   : > { %v249_v49 = vld [vmem:[%s6482_s2 + $0x30] sm:$0xff]  ;;  %v6581_v55 = vpack.c.bf16 %v250_v51, %v246_v50  ;;  %v254_v62 = vld [vmem:[%s6482_s2 + $0x58] sm:$0xff]  ;;  %v5864_v25 = vld [vmem:[%s6489_s4 + $0x1c4] sm:$0xf]  ;;  %s8632_s23 = sld [smem:[#allocation102_spill]]  ;;  %s5132_s24 = scalar_lea.sflag [#allocation4], %s234_s28 }
  0x5d   : > { %1398 = vmatpush.bf16.xpose.msra.mxu0 %v5352_v44  ;;  %v247_v44 = vld [vmem:[%s6482_s2 + $0x20] sm:$0xff]  ;;  %v6579_v54 = vpack.c.bf16 %v249_v49, %v245_v48  ;;  %v253_v60 = vld [vmem:[%s6482_s2 + $0x50] sm:$0xff]  ;;  %v258_v63 = vld [vmem:[%s6482_s2 + $0x78] sm:$0xff] }
  0x5e   : > { %1567 = vmatpush.bf16.xpose.msra.mxu1 %v5356_v45  ;;  %v244_v45 = vld [vmem:[%s6482_s2 + $0x8] sm:$0xff]  ;;  %v6575_v52 = vpack.c.bf16 %v247_v44, %v243_v43  ;;  %v257_v61 = vld [vmem:[%s6482_s2 + $0x70] sm:$0xff]  ;;  %v6601_v3 = vpack.c.bf16 %v258_v63, %v254_v62  ;;  %v262_v10 = vld [vmem:[%s6482_s2 + $0x98] sm:$0xff] }
  0x5f   : > { %1736 = vmatpush.bf16.xpose.msra.mxu2 %v5360_v46  ;;  %1905 = vmatpush.bf16.xpose.msra.mxu3 %v5364_v47  ;;  %v5532_v46 = vor.u32 %v5868_v37, %v5529_v38  ;;  %v248_v47 = vld [vmem:[%s6482_s2 + $0x28] sm:$0xff]  ;;  %v6599_v2 = vpack.c.bf16 %v257_v61, %v253_v60  ;;  %v261_v8 = vld [vmem:[%s6482_s2 + $0x90] sm:$0xff]  ;;  %v266_v11 = vld [vmem:[%s6482_s2 + $0xb8] sm:$0xff] }
  0x60   : > { %v6577_v53 = vpack.c.bf16 %v248_v47, %v244_v45  ;;  %v265_v9 = vld [vmem:[%s6482_s2 + $0xb0] sm:$0xff]  ;;  %v6621_v15 = vpack.c.bf16 %v266_v11, %v262_v10  ;;  %v5521_v20 = vld [vmem:[%s6489_s4 + $0x1d8] sm:$0xf0]  ;;  %v267_v28 = vld [vmem:[%s6482_s2 + $0xc0] sm:$0xff]  ;;  %s5799_s30 = sshll.u32 %s8631_s8, 2 }
  0x61   : > { %v6619_v14 = vpack.c.bf16 %v265_v9, %v261_v8  ;;  %v5866_v22 = vld [vmem:[%s6489_s4 + $0x1cc] sm:$0xf0]  ;;  %v5513_v26 = vld [vmem:[%s6489_s4 + $0x1d0] sm:$0xf0]  ;;  %v271_v29 = vld [vmem:[%s6482_s2 + $0xe0] sm:$0xff]  ;;  %s5144_s25 = sadd.s32 %s5936_s7, %s5799_s30 }
  0x62   : > { %v5512_v24 = vor.u32 %v5866_v22, %v5511_v21  ;;  %v5516_v27 = vor.u32 %v5864_v25, %v5513_v26  ;;  %v268_v30 = vld [vmem:[%s6482_s2 + $0xc8] sm:$0xff]  ;;  %v269_v32 = vld [vmem:[%s6482_s2 + $0xd0] sm:$0xff]  ;;  %v270_v34 = vld [vmem:[%s6482_s2 + $0xd8] sm:$0xff]  ;;  %s5801_s5 = sshll.u32 %s5144_s25, 3  ;;  %s6155_s7 = scalar_lea.hbm %s8632_s23, 12288 }
  0x63   : > { %v273_v33 = vld [vmem:[%s6482_s2 + $0xf0] sm:$0xff]  ;;  %v280_v43 = vld [vmem:[%s6482_s2 + $0x128] sm:$0xff]  ;;  %v282_v47 = vld [vmem:[%s6482_s2 + $0x138] sm:$0xff]  ;;  %s5146_s26 = scalar_lea.hbm %s8632_s23, %s5801_s5 }
  0x64   : > { %v6647_v38 = vpack.c.bf16 %v273_v33, %v269_v32  ;;  %v277_v44 = vld [vmem:[%s6482_s2 + $0x110] sm:$0xff]  ;;  %v286_v62 = vld [vmem:[%s6482_s2 + $0x158] sm:$0xff]  ;;  %v291_v8 = vld [vmem:[%s6482_s2 + $0x180] sm:$0xff]  ;;  %s5149_s18 = sshll.u32 %s5146_s26, 4  ;;  %s5150_s18 = int_to_ptr.hbm [resolvable:$true] %s5149_s18 }
  0x65   : > { %1399 = vmatpush.bf16.xpose.msra.mxu0 %v5336_v56  ;;  %v251_v56 = vld [vmem:[%s6482_s2 + $0x40] sm:$0xff]  ;;  %v281_v45 = vld [vmem:[%s6482_s2 + $0x130] sm:$0xff]  ;;  %v290_v63 = vld [vmem:[%s6482_s2 + $0x178] sm:$0xff]  ;;  %s6149_s15 = sshra.s32 %s5150_s18, 4  ;;  %s6150_s15 = int_to_ptr.hbm [resolvable:$true] %s6149_s15 }
  0x66   : > { %1568 = vmatpush.bf16.xpose.msra.mxu1 %v5340_v57  ;;  %v255_v57 = vld [vmem:[%s6482_s2 + $0x60] sm:$0xff]  ;;  %v6667_v50 = vpack.c.bf16 %v281_v45, %v277_v44  ;;  %v285_v60 = vld [vmem:[%s6482_s2 + $0x150] sm:$0xff]  ;;  %v292_v10 = vld [vmem:[%s6482_s2 + $0x188] sm:$0xff]  ;;  %p6156_p2 = scmp.lt.s32.totalorder %s6150_s15, %s8632_s23 }
  0x67   : > { %1737 = vmatpush.bf16.xpose.msra.mxu2 %v5344_v58  ;;  %1906 = vmatpush.bf16.xpose.msra.mxu3 %v5348_v59  ;;  %v252_v58 = vld [vmem:[%s6482_s2 + $0x48] sm:$0xff]  ;;  %v6595_v0 = vpack.c.bf16 %v255_v57, %v251_v56  ;;  %v283_v56 = vld [vmem:[%s6482_s2 + $0x140] sm:$0xff]  ;;  %v289_v61 = vld [vmem:[%s6482_s2 + $0x170] sm:$0xff] }
  0x68   : > { %v256_v59 = vld [vmem:[%s6482_s2 + $0x68] sm:$0xff]  ;;  %v287_v57 = vld [vmem:[%s6482_s2 + $0x160] sm:$0xff]  ;;  %v5863_v25 = vld [vmem:[%s6489_s4 + $0x1b4] sm:$0xf0] }
  0x69   : > { %v6597_v1 = vpack.c.bf16 %v256_v59, %v252_v58  ;;  %v284_v58 = vld [vmem:[%s6482_s2 + $0x148] sm:$0xff]  ;;  %v295_v9 = vld [vmem:[%s6482_s2 + $0x1a0] sm:$0xff]  ;;  %v5497_v44 = vld [vmem:[%s6489_s4 + $0x1b0] sm:$0xf0] }
  0x6a   : > { %v288_v59 = vld [vmem:[%s6482_s2 + $0x168] sm:$0xff]  ;;  %v302_v45 = vld [vmem:[%s6482_s2 + $0x1d8] sm:$0xff] }
  0x6b   : > { %v296_v11 = vld [vmem:[%s6482_s2 + $0x1a8] sm:$0xff] }
  0x6c   : > { %v6705_v21 = vpack.c.bf16 %v296_v11, %v292_v10  ;;  %v5861_v26 = vld [vmem:[%s6489_s4 + $0x1ac] sm:$0xf]  ;;  %v310_v10 = vld [vmem:[%s6482_s2 + $0x218] sm:$0xff] }
  0x6d   : > { %1400 = vmatpush.bf16.xpose.msra.mxu0 %v5320_v4  ;;  %v259_v4 = vld [vmem:[%s6482_s2 + $0x80] sm:$0xff]  ;;  %v300_v32 = vld [vmem:[%s6482_s2 + $0x1c8] sm:$0xff]  ;;  %v314_v11 = vld [vmem:[%s6482_s2 + $0x238] sm:$0xff] }
  0x6e   : > { %1569 = vmatpush.bf16.xpose.msra.mxu1 %v5324_v5  ;;  %v263_v5 = vld [vmem:[%s6482_s2 + $0xa0] sm:$0xff]  ;;  %v304_v33 = vld [vmem:[%s6482_s2 + $0x1e8] sm:$0xff] }
  0x6f   : > { %1738 = vmatpush.bf16.xpose.msra.mxu2 %v5328_v6  ;;  %1907 = vmatpush.bf16.xpose.msra.mxu3 %v5332_v7  ;;  %v260_v6 = vld [vmem:[%s6482_s2 + $0x88] sm:$0xff]  ;;  %v6615_v12 = vpack.c.bf16 %v263_v5, %v259_v4  ;;  %v6683_v4 = vpack.c.bf16 %v287_v57, %v283_v56  ;;  %v6685_v5 = vpack.c.bf16 %v288_v59, %v284_v58 }
  0x70   : > { %v264_v7 = vld [vmem:[%s6482_s2 + $0xa8] sm:$0xff]  ;;  %v6733_v57 = vpack.c.bf16 %v304_v33, %v300_v32  ;;  %v315_v33 = vld [vmem:[%s6482_s2 + $0x240] sm:$0xff] }
  0x71   : > { %v6617_v13 = vpack.c.bf16 %v264_v7, %v260_v6  ;;  %v6687_v6 = vpack.c.bf16 %v289_v61, %v285_v60  ;;  %v6689_v7 = vpack.c.bf16 %v290_v63, %v286_v62  ;;  %v307_v60 = vld [vmem:[%s6482_s2 + $0x200] sm:$0xff]  ;;  %v308_v62 = vld [vmem:[%s6482_s2 + $0x208] sm:$0xff] }
  0x72   : > { %v311_v61 = vld [vmem:[%s6482_s2 + $0x220] sm:$0xff]  ;;  %v312_v63 = vld [vmem:[%s6482_s2 + $0x228] sm:$0xff] }
  0x75   : > { %1401 = vmatpush.bf16.xpose.msra.mxu0 %v5304_v16  ;;  %v5519_v16 = vld [vmem:[%s6489_s4 + $0x1c8] sm:$0xf] }
  0x76   : > { %1570 = vmatpush.bf16.xpose.msra.mxu1 %v5308_v17  ;;  %v5867_v17 = vld [vmem:[%s6489_s4 + $0x1d4] sm:$0xf0] }
  0x77   : > { %1739 = vmatpush.bf16.xpose.msra.mxu2 %v5312_v18  ;;  %1908 = vmatpush.bf16.xpose.msra.mxu3 %v5316_v19  ;;  %v5865_v18 = vld [vmem:[%s6489_s4 + $0x1cc] sm:$0xf]  ;;  %v5520_v19 = vor.u32 %v5867_v17, %v5519_v16  ;;  %v293_v16 = vld [vmem:[%s6482_s2 + $0x190] sm:$0xff] }
  0x78   : > { %v5524_v23 = vor.u32 %v5865_v18, %v5521_v20  ;;  %v297_v17 = vld [vmem:[%s6482_s2 + $0x1b0] sm:$0xff]  ;;  %v294_v18 = vld [vmem:[%s6482_s2 + $0x198] sm:$0xff]  ;;  %v6703_v20 = vpack.c.bf16 %v295_v9, %v291_v8 }
  0x79   : > { %v6707_v22 = vpack.c.bf16 %v297_v17, %v293_v16  ;;  %v309_v8 = vld [vmem:[%s6482_s2 + $0x210] sm:$0xff]  ;;  %v6751_v16 = vpack.c.bf16 %v311_v61, %v307_v60 }
  0x7a   : > { %v313_v9 = vld [vmem:[%s6482_s2 + $0x230] sm:$0xff] }
  0x7d   : > { %1402 = vmatpush.bf16.xpose.msra.mxu0 %v5288_v31  ;;  %v272_v31 = vld [vmem:[%s6482_s2 + $0xe8] sm:$0xff] }
  0x7e   : > { %1571 = vmatpush.bf16.xpose.msra.mxu1 %v5292_v35  ;;  %v274_v35 = vld [vmem:[%s6482_s2 + $0xf8] sm:$0xff]  ;;  %v6645_v37 = vpack.c.bf16 %v272_v31, %v268_v30  ;;  %v299_v30 = vld [vmem:[%s6482_s2 + $0x1c0] sm:$0xff] }
  0x7f   : > { %1740 = vmatpush.bf16.xpose.msra.mxu2 %v5296_v36  ;;  %1909 = vmatpush.bf16.xpose.msra.mxu3 %v5300_v39  ;;  %v6643_v36 = vpack.c.bf16 %v271_v29, %v267_v28  ;;  %v6649_v39 = vpack.c.bf16 %v274_v35, %v270_v34  ;;  %v5505_v28 = vld [vmem:[%s6489_s4 + $0x1b8] sm:$0xf0]  ;;  %v303_v31 = vld [vmem:[%s6482_s2 + $0x1e0] sm:$0xff]  ;;  %v5862_v35 = vld [vmem:[%s6489_s4 + $0x1ac] sm:$0xf0] }
  0x80   : > { %v5508_v29 = vor.u32 %v5861_v26, %v5505_v28  ;;  %v5495_v34 = vld [vmem:[%s6489_s4 + $0x1a0] sm:$0xf]  ;;  %v6731_v56 = vpack.c.bf16 %v303_v31, %v299_v30 }
  0x84   : > { %1403 = vmatmul.bf16.vlgmr.msra.gmra.mxu0 %v6575_v52 }
  0x85   : > { %2071 = vmatpush.bf16.xpose.msrb.mxu0 %v5528_v42  ;;  %1572 = vmatmul.bf16.vlgmr.msra.gmra.mxu1 %v6577_v53  ;;  %v276_v42 = vld [vmem:[%s6482_s2 + $0x108] sm:$0xff] }
  0x86   : > { %2240 = vmatpush.bf16.xpose.msrb.mxu1 %v5532_v46  ;;  %1741 = vmatmul.bf16.vlgmr.msra.gmra.mxu2 %v6579_v54  ;;  %v278_v46 = vld [vmem:[%s6482_s2 + $0x118] sm:$0xff]  ;;  %v6665_v49 = vpack.c.bf16 %v280_v43, %v276_v42  ;;  %v305_v42 = vld [vmem:[%s6482_s2 + $0x1f0] sm:$0xff]  ;;  %v5496_v43 = vor.u32 %v5862_v35, %v5495_v34  ;;  %v319_v34 = vld [vmem:[%s6482_s2 + $0x260] sm:$0xff] }
  0x87   : > { %2409 = vmatpush.bf16.xpose.msrb.mxu2 %v5536_v40  ;;  %2578 = vmatpush.bf16.xpose.msrb.mxu3 %v5540_v41  ;;  %v275_v40 = vld [vmem:[%s6482_s2 + $0x100] sm:$0xff]  ;;  %v6669_v51 = vpack.c.bf16 %v282_v47, %v278_v46  ;;  %v306_v46 = vld [vmem:[%s6482_s2 + $0x1f8] sm:$0xff]  ;;  %v316_v35 = vld [vmem:[%s6482_s2 + $0x248] sm:$0xff] }
  0x88   : > { %1910 = vmatmul.bf16.vlgmr.msra.gmra.mxu3 %v6581_v55  ;;  %v279_v41 = vld [vmem:[%s6482_s2 + $0x120] sm:$0xff]  ;;  %v6737_v59 = vpack.c.bf16 %v306_v46, %v302_v45  ;;  %v322_v45 = vld [vmem:[%s6482_s2 + $0x278] sm:$0xff] }
  0x89   : > { %v6663_v48 = vpack.c.bf16 %v279_v41, %v275_v40  ;;  %v5860_v40 = vld [vmem:[%s6489_s4 + $0x1a4] sm:$0xf]  ;;  %v301_v41 = vld [vmem:[%s6482_s2 + $0x1d0] sm:$0xff] }
  0x8a   : > { %v5500_v47 = vor.u32 %v5860_v40, %v5497_v44  ;;  %v6735_v58 = vpack.c.bf16 %v305_v42, %v301_v41  ;;  %v320_v40 = vld [vmem:[%s6482_s2 + $0x268] sm:$0xff]  ;;  %v317_v41 = vld [vmem:[%s6482_s2 + $0x250] sm:$0xff]  ;;  %v318_v44 = vld [vmem:[%s6482_s2 + $0x258] sm:$0xff] }
  0x8b   : > { %v321_v42 = vld [vmem:[%s6482_s2 + $0x270] sm:$0xff] }
  0x8d   : > { %2072 = vmatpush.bf16.xpose.msrb.mxu0 %v5512_v24  ;;  %v5503_v24 = vld [vmem:[%s6489_s4 + $0x1a8] sm:$0xf] }
  0x8e   : > { %2241 = vmatpush.bf16.xpose.msrb.mxu1 %v5516_v27  ;;  %v5504_v27 = vor.u32 %v5863_v25, %v5503_v24  ;;  %v6757_v25 = vpack.c.bf16 %v314_v11, %v310_v10  ;;  %v6783_v10 = vpack.c.bf16 %v322_v45, %v318_v44 }
  0x8f   : > { %2410 = vmatpush.bf16.xpose.msrb.mxu2 %v5520_v19  ;;  %2579 = vmatpush.bf16.xpose.msrb.mxu3 %v5524_v23  ;;  %v298_v19 = vld [vmem:[%s6482_s2 + $0x1b8] sm:$0xff] }
  0x90   : > { %v6709_v23 = vpack.c.bf16 %v298_v19, %v294_v18  ;;  %v6753_v18 = vpack.c.bf16 %v312_v63, %v308_v62  ;;  %v6755_v19 = vpack.c.bf16 %v313_v9, %v309_v8  ;;  %v6779_v63 = vpack.c.bf16 %v320_v40, %v316_v35  ;;  %v325_v35 = vld [vmem:[%s6482_s2 + $0x290] sm:$0xff] }
  0x91   : > { %v6781_v8 = vpack.c.bf16 %v321_v42, %v317_v41  ;;  %v329_v40 = vld [vmem:[%s6482_s2 + $0x2b0] sm:$0xff]  ;;  %v326_v42 = vld [vmem:[%s6482_s2 + $0x298] sm:$0xff] }
  0x94   : > { %1408 = vmatmul.bf16.gmra.mxu0 %v6595_v0 }
  0x95   : > { %1577 = vmatmul.bf16.gmra.mxu1 %v6597_v1  ;;  %2073 = vmatpush.bf16.xpose.msrb.mxu0 %v5496_v43 }
  0x96   : > { %1746 = vmatmul.bf16.gmra.mxu2 %v6599_v2  ;;  %2242 = vmatpush.bf16.xpose.msrb.mxu1 %v5500_v47  ;;  %v6777_v47 = vpack.c.bf16 %v319_v34, %v315_v33  ;;  %v324_v33 = vld [vmem:[%s6482_s2 + $0x288] sm:$0xff] }
  0x97   : > { %2411 = vmatpush.bf16.xpose.msrb.mxu2 %v5504_v27  ;;  %2580 = vmatpush.bf16.xpose.msrb.mxu3 %v5508_v29  ;;  %v328_v34 = vld [vmem:[%s6482_s2 + $0x2a8] sm:$0xff] }
  0x98   : > { %1915 = vmatmul.bf16.gmra.mxu3 %v6601_v3 }
  0xa4   : > { %1413 = vmatmul.bf16.gmra.mxu0 %v6615_v12 }
  0xa5   : > { %1582 = vmatmul.bf16.gmra.mxu1 %v6617_v13 }
  0xa6   : > { %1751 = vmatmul.bf16.gmra.mxu2 %v6619_v14 }
  0xa8   : > { %1920 = vmatmul.bf16.gmra.mxu3 %v6621_v15 }
  0xb4   : > { %1418 = vmatmul.bf16.gmra.mxu0 %v6643_v36 }
  0xb5   : > { %1587 = vmatmul.bf16.gmra.mxu1 %v6645_v37 }
  0xb6   : > { %1756 = vmatmul.bf16.gmra.mxu2 %v6647_v38 }
  0xb8   : > { %1925 = vmatmul.bf16.gmra.mxu3 %v6649_v39 }
  0xc4   : > { %1423 = vmatmul.bf16.gmra.mxu0 %v6663_v48 }
  0xc5   : > { %1592 = vmatmul.bf16.gmra.mxu1 %v6665_v49 }
  0xc6   : > { %1761 = vmatmul.bf16.gmra.mxu2 %v6667_v50 }
  0xc8   : > { %1930 = vmatmul.bf16.gmra.mxu3 %v6669_v51 }
  0xd4   : > { %1428 = vmatmul.bf16.gmra.mxu0 %v6683_v4 }
  0xd5   : > { %1597 = vmatmul.bf16.gmra.mxu1 %v6685_v5 }
  0xd6   : > { %1766 = vmatmul.bf16.gmra.mxu2 %v6687_v6 }
  0xd8   : > { %1935 = vmatmul.bf16.gmra.mxu3 %v6689_v7 }
  0xe4   : > { %1433 = vmatmul.bf16.gmra.mxu0 %v6703_v20 }
  0xe5   : > { %1602 = vmatmul.bf16.gmra.mxu1 %v6705_v21 }
  0xe6   : > { %1771 = vmatmul.bf16.gmra.mxu2 %v6707_v22 }
  0xe8   : > { %1940 = vmatmul.bf16.gmra.mxu3 %v6709_v23 }
  0xf4   : > { %1438 = vmatmul.bf16.gmra.mxu0 %v6731_v56 }
  0xf5   : > { %1607 = vmatmul.bf16.gmra.mxu1 %v6733_v57 }
  0xf6   : > { %1776 = vmatmul.bf16.gmra.mxu2 %v6735_v58 }
  0xf8   : > { %1945 = vmatmul.bf16.gmra.mxu3 %v6737_v59 }
 0x101   : > { %v1404_v17 = vpop.f32.mrf.mxu0 }
 0x102   : > { %v1573_v24 = vpop.f32.mrf.mxu1 }
 0x103   : > { %v1574_v26 = vadd.f32 %v1573_v24, %v1404_v17 }
 0x104   : > { %1443 = vmatmul.bf16.gmra.mxu0 %v6751_v16 }
 0x105   : > { %1612 = vmatmul.bf16.gmra.mxu1 %v6753_v18 }
 0x106   : > { %1781 = vmatmul.bf16.gmra.mxu2 %v6755_v19 }
 0x108   : > { %1950 = vmatmul.bf16.gmra.mxu3 %v6757_v25 }
 0x109   : > { %v1742_v27 = vpop.f32.mrf.mxu2  ;;  %v1406_v30 = vpop.f32.mrf.mxu0 }
 0x10a   : > { %v1743_v28 = vadd.f32 %v1742_v27, %v1574_v26  ;;  %v1575_v31 = vpop.f32.mrf.mxu1 }
 0x10b   : > { %v1911_v29 = vpop.f32.mrf.mxu3  ;;  %v1576_v43 = vadd.f32 %v1575_v31, %v1406_v30  ;;  %v323_v31 = vld [vmem:[%s6482_s2 + $0x280] sm:$0xff] }
 0x10c   : > { %v1912_v32 = vadd.f32 %v1911_v29, %v1743_v28 }
 0x10e   : > { %4103 = vst [vmem:[%s6766_s12] sm:$0xff] %v1912_v32  ;;  %v327_v32 = vld [vmem:[%s6482_s2 + $0x2a0] sm:$0xff] }
 0x10f   : > { %v6799_v45 = vpack.c.bf16 %v327_v32, %v323_v31  ;;  %v5489_v31 = vld [vmem:[%s6489_s4 + $0x198] sm:$0xf0] }
 0x111   : > { %v1744_v46 = vpop.f32.mrf.mxu2  ;;  %v1409_v62 = vpop.f32.mrf.mxu0  ;;  %8300 = vst [vmem:[#allocation17_spill] sm:$0xff] %v6799_v45 }
 0x112   : > { %v1745_v60 = vadd.f32 %v1744_v46, %v1576_v43  ;;  %v1578_v9 = vpop.f32.mrf.mxu1  ;;  %v330_v43 = vld [vmem:[%s6482_s2 + $0x2b8] sm:$0xff] }
 0x113   : > { %v1913_v61 = vpop.f32.mrf.mxu3  ;;  %v1579_v17 = vadd.f32 %v1578_v9, %v1409_v62  ;;  %v6801_v62 = vpack.c.bf16 %v328_v34, %v324_v33  ;;  %v6803_v9 = vpack.c.bf16 %v329_v40, %v325_v35 }
 0x114   : > { %v1914_v11 = vadd.f32 %v1913_v61, %v1745_v60  ;;  %1448 = vmatmul.bf16.gmra.mxu0 %v6777_v47 }
 0x115   : > { %1617 = vmatmul.bf16.gmra.mxu1 %v6779_v63  ;;  %8301 = vst [vmem:[#allocation18_spill] sm:$0xff] %v6801_v62 }
 0x116   : > { %4107 = vst [vmem:[%s6766_s12 + $0x20] sm:$0xff] %v1914_v11  ;;  %1786 = vmatmul.bf16.gmra.mxu2 %v6781_v8 }
 0x117   : > { %8302 = vst [vmem:[#allocation19_spill] sm:$0xff] %v6803_v9 }
 0x118   : > { %1955 = vmatmul.bf16.gmra.mxu3 %v6783_v10 }
 0x119   : > { %v1747_v24 = vpop.f32.mrf.mxu2  ;;  %v1411_v28 = vpop.f32.mrf.mxu0 }
 0x11a   : > { %v1748_v26 = vadd.f32 %v1747_v24, %v1579_v17  ;;  %v1580_v29 = vpop.f32.mrf.mxu1  ;;  %v6805_v17 = vpack.c.bf16 %v330_v43, %v326_v42  ;;  %v331_v43 = vld [vmem:[%s6482_s2 + $0x2c0] sm:$0xff] }
 0x11b   : > { %v1916_v27 = vpop.f32.mrf.mxu3  ;;  %v1581_v41 = vadd.f32 %v1580_v29, %v1411_v28  ;;  %v5859_v28 = vld [vmem:[%s6489_s4 + $0x194] sm:$0xf0]  ;;  %v5857_v29 = vld [vmem:[%s6489_s4 + $0x18c] sm:$0xf] }
 0x11c   : > { %v1917_v30 = vadd.f32 %v1916_v27, %v1748_v26  ;;  %8303 = vst [vmem:[#allocation20_spill] sm:$0xff] %v6805_v17  ;;  %v5487_v27 = vld [vmem:[%s6489_s4 + $0x188] sm:$0xf]  ;;  %v5492_v33 = vor.u32 %v5857_v29, %v5489_v31  ;;  %v5481_v29 = vld [vmem:[%s6489_s4 + $0x190] sm:$0xf0] }
 0x11e   : > { %4111 = vst [vmem:[%s6766_s12 + $0x40] sm:$0xff] %v1917_v30  ;;  %v5488_v30 = vor.u32 %v5859_v28, %v5487_v27  ;;  %2581 = vmatpush.bf16.xpose.msrb.mxu3 %v5492_v33  ;;  %v337_v27 = vld [vmem:[%s6482_s2 + $0x2f0] sm:$0xff]  ;;  %v5856_v28 = vld [vmem:[%s6489_s4 + $0x184] sm:$0xf] }
 0x120   : > { %2412 = vmatpush.bf16.xpose.msrb.mxu2 %v5488_v30  ;;  %v338_v30 = vld [vmem:[%s6482_s2 + $0x2f8] sm:$0xff] }
 0x121   : > { %v1749_v44 = vpop.f32.mrf.mxu2  ;;  %v1414_v61 = vpop.f32.mrf.mxu0 }
 0x122   : > { %v1750_v46 = vadd.f32 %v1749_v44, %v1581_v41  ;;  %v1583_v11 = vpop.f32.mrf.mxu1  ;;  %v335_v44 = vld [vmem:[%s6482_s2 + $0x2e0] sm:$0xff] }
 0x123   : > { %v1918_v60 = vpop.f32.mrf.mxu3  ;;  %v1584_v26 = vadd.f32 %v1583_v11, %v1414_v61  ;;  %v333_v61 = vld [vmem:[%s6482_s2 + $0x2d0] sm:$0xff]  ;;  %v5479_v11 = vld [vmem:[%s6489_s4 + $0x180] sm:$0xf] }
 0x124   : > { %v1919_v24 = vadd.f32 %v1918_v60, %v1750_v46  ;;  %1453 = vmatmul.bf16.gmra.mxu0 %v6799_v45  ;;  %v332_v46 = vld [vmem:[%s6482_s2 + $0x2c8] sm:$0xff]  ;;  %v6833_v45 = vpack.c.bf16 %v337_v27, %v333_v61  ;;  %v339_v27 = vld [vmem:[%s6482_s2 + $0x300] sm:$0xff] }
 0x125   : > { %1622 = vmatmul.bf16.gmra.mxu1 %v6801_v62  ;;  %v336_v60 = vld [vmem:[%s6482_s2 + $0x2e8] sm:$0xff] }
 0x126   : > { %4115 = vst [vmem:[%s6766_s12 + $0x60] sm:$0xff] %v1919_v24  ;;  %1791 = vmatmul.bf16.gmra.mxu2 %v6803_v9  ;;  %v5858_v24 = vld [vmem:[%s6489_s4 + $0x18c] sm:$0xf0]  ;;  %v6829_v9 = vpack.c.bf16 %v335_v44, %v331_v43 }
 0x127   : > { %8306 = vst [vmem:[#allocation23_spill] sm:$0xff] %v6833_v45 }
 0x128   : > { %1960 = vmatmul.bf16.gmra.mxu3 %v6805_v17  ;;  %v5484_v17 = vor.u32 %v5856_v28, %v5481_v29  ;;  %8304 = vst [vmem:[#allocation21_spill] sm:$0xff] %v6829_v9  ;;  %v340_v28 = vld [vmem:[%s6482_s2 + $0x308] sm:$0xff]  ;;  %v341_v29 = vld [vmem:[%s6482_s2 + $0x310] sm:$0xff] }
 0x129   : > { %v1752_v32 = vpop.f32.mrf.mxu2  ;;  %v1416_v40 = vpop.f32.mrf.mxu0 }
 0x12a   : > { %v1753_v34 = vadd.f32 %v1752_v32, %v1584_v26  ;;  %v1585_v41 = vpop.f32.mrf.mxu1  ;;  %v5480_v26 = vor.u32 %v5858_v24, %v5479_v11  ;;  %v334_v32 = vld [vmem:[%s6482_s2 + $0x2d8] sm:$0xff]  ;;  %2243 = vmatpush.bf16.xpose.msrb.mxu1 %v5484_v17 }
 0x12b   : > { %v1921_v35 = vpop.f32.mrf.mxu3  ;;  %v1586_v31 = vadd.f32 %v1585_v41, %v1416_v40  ;;  %v6835_v40 = vpack.c.bf16 %v338_v30, %v334_v32  ;;  %v342_v30 = vld [vmem:[%s6482_s2 + $0x318] sm:$0xff] }
 0x12c   : > { %v1922_v42 = vadd.f32 %v1921_v35, %v1753_v34  ;;  %2074 = vmatpush.bf16.xpose.msrb.mxu0 %v5480_v26  ;;  %v343_v26 = vld [vmem:[%s6482_s2 + $0x320] sm:$0xff] }
 0x12d   : > { %8307 = vst [vmem:[#allocation24_spill] sm:$0xff] %v6835_v40 }
 0x12e   : > { %4119 = vst [vmem:[%s6766_s12 + $0x80] sm:$0xff] %v1922_v42  ;;  %v6831_v42 = vpack.c.bf16 %v336_v60, %v332_v46 }
 0x130   : > { %8305 = vst [vmem:[#allocation22_spill] sm:$0xff] %v6831_v42 }
 0x131   : > { %v1754_v33 = vpop.f32.mrf.mxu2  ;;  %v1419_v62 = vpop.f32.mrf.mxu0 }
 0x132   : > { %v1755_v34 = vadd.f32 %v1754_v33, %v1586_v31  ;;  %v1588_v11 = vpop.f32.mrf.mxu1  ;;  %v345_v31 = vld [vmem:[%s6482_s2 + $0x330] sm:$0xff]  ;;  %v346_v33 = vld [vmem:[%s6482_s2 + $0x338] sm:$0xff] }
 0x133   : > { %v1923_v35 = vpop.f32.mrf.mxu3  ;;  %v1589_v43 = vadd.f32 %v1588_v11, %v1419_v62  ;;  %v344_v62 = vld [vmem:[%s6482_s2 + $0x328] sm:$0xff] }
 0x134   : > { %v1924_v41 = vadd.f32 %v1923_v35, %v1755_v34  ;;  %1458 = vmatmul.bf16.gmra.mxu0 %v6829_v9  ;;  %v6851_v35 = vpack.c.bf16 %v343_v26, %v339_v27 }
 0x135   : > { %1627 = vmatmul.bf16.gmra.mxu1 %v6831_v42 }
 0x136   : > { %4123 = vst [vmem:[%s6766_s12 + $0xa0] sm:$0xff] %v1924_v41  ;;  %1796 = vmatmul.bf16.gmra.mxu2 %v6833_v45 }
 0x137   : > { %8308 = vst [vmem:[#allocation25_spill] sm:$0xff] %v6851_v35 }
 0x138   : > { %1965 = vmatmul.bf16.gmra.mxu3 %v6835_v40 }
 0x139   : > { %v1757_v17 = vpop.f32.mrf.mxu2  ;;  %v1421_v60 = vpop.f32.mrf.mxu0 }
 0x13a   : > { %v1758_v44 = vadd.f32 %v1757_v17, %v1589_v43  ;;  %v1590_v61 = vpop.f32.mrf.mxu1  ;;  %v6853_v17 = vpack.c.bf16 %v344_v62, %v340_v28 }
 0x13b   : > { %v1926_v46 = vpop.f32.mrf.mxu3  ;;  %v1591_v32 = vadd.f32 %v1590_v61, %v1421_v60 }
 0x13c   : > { %v1927_v24 = vadd.f32 %v1926_v46, %v1758_v44  ;;  %8309 = vst [vmem:[#allocation26_spill] sm:$0xff] %v6853_v17  ;;  %v6855_v44 = vpack.c.bf16 %v345_v31, %v341_v29  ;;  %v347_v31 = vld [vmem:[%s6482_s2 + $0x340] sm:$0xff] }
 0x13e   : > { %4127 = vst [vmem:[%s6766_s12 + $0xc0] sm:$0xff] %v1927_v24  ;;  %v6857_v24 = vpack.c.bf16 %v346_v33, %v342_v30  ;;  %v352_v30 = vld [vmem:[%s6482_s2 + $0x368] sm:$0xff]  ;;  %v349_v33 = vld [vmem:[%s6482_s2 + $0x350] sm:$0xff] }
 0x13f   : > { %8310 = vst [vmem:[#allocation27_spill] sm:$0xff] %v6855_v44 }
 0x140   : > { %8311 = vst [vmem:[#allocation28_spill] sm:$0xff] %v6857_v24 }
 0x141   : > { %v1759_v34 = vpop.f32.mrf.mxu2  ;;  %v1424_v43 = vpop.f32.mrf.mxu0 }
 0x142   : > { %v1760_v11 = vadd.f32 %v1759_v34, %v1591_v32  ;;  %v1593_v46 = vpop.f32.mrf.mxu1  ;;  %v348_v32 = vld [vmem:[%s6482_s2 + $0x348] sm:$0xff]  ;;  %v353_v34 = vld [vmem:[%s6482_s2 + $0x370] sm:$0xff] }
 0x143   : > { %v1928_v41 = vpop.f32.mrf.mxu3  ;;  %v1594_v60 = vadd.f32 %v1593_v46, %v1424_v43  ;;  %v354_v43 = vld [vmem:[%s6482_s2 + $0x378] sm:$0xff] }
 0x144   : > { %v1929_v40 = vadd.f32 %v1928_v41, %v1760_v11  ;;  %1463 = vmatmul.bf16.gmra.mxu0 %v6851_v35  ;;  %v350_v41 = vld [vmem:[%s6482_s2 + $0x358] sm:$0xff] }
 0x145   : > { %1632 = vmatmul.bf16.gmra.mxu1 %v6853_v17  ;;  %v6875_v17 = vpack.c.bf16 %v352_v30, %v348_v32 }
 0x146   : > { %4131 = vst [vmem:[%s6766_s12 + $0xe0] sm:$0xff] %v1929_v40  ;;  %1801 = vmatmul.bf16.gmra.mxu2 %v6855_v44  ;;  %v351_v40 = vld [vmem:[%s6482_s2 + $0x360] sm:$0xff] }
 0x147   : > { %8313 = vst [vmem:[#allocation30_spill] sm:$0xff] %v6875_v17 }
 0x148   : > { %1970 = vmatmul.bf16.gmra.mxu3 %v6857_v24  ;;  %v6873_v24 = vpack.c.bf16 %v351_v40, %v347_v31 }
 0x149   : > { %v1762_v61 = vpop.f32.mrf.mxu2  ;;  %v1426_v28 = vpop.f32.mrf.mxu0 }
 0x14a   : > { %v1763_v27 = vadd.f32 %v1762_v61, %v1594_v60  ;;  %v1595_v62 = vpop.f32.mrf.mxu1  ;;  %8312 = vst [vmem:[#allocation29_spill] sm:$0xff] %v6873_v24 }
 0x14b   : > { %v1931_v26 = vpop.f32.mrf.mxu3  ;;  %v1596_v11 = vadd.f32 %v1595_v62, %v1426_v28 }
 0x14c   : > { %v1932_v29 = vadd.f32 %v1931_v26, %v1763_v27  ;;  %v6877_v27 = vpack.c.bf16 %v353_v34, %v349_v33  ;;  %v355_v33 = vld [vmem:[%s6482_s2 + $0x380] sm:$0xff]  ;;  %v356_v34 = vld [vmem:[%s6482_s2 + $0x388] sm:$0xff] }
 0x14e   : > { %4135 = vst [vmem:[%s6766_s12 + $0x100] sm:$0xff] %v1932_v29  ;;  %v6879_v29 = vpack.c.bf16 %v354_v43, %v350_v41  ;;  %v357_v41 = vld [vmem:[%s6482_s2 + $0x390] sm:$0xff] }
 0x14f   : > { %8314 = vst [vmem:[#allocation31_spill] sm:$0xff] %v6877_v27  ;;  %v361_v43 = vld [vmem:[%s6482_s2 + $0x3b0] sm:$0xff] }
 0x150   : > { %8315 = vst [vmem:[#allocation32_spill] sm:$0xff] %v6879_v29 }
 0x151   : > { %v1764_v46 = vpop.f32.mrf.mxu2  ;;  %v1429_v61 = vpop.f32.mrf.mxu0 }
 0x152   : > { %v1765_v44 = vadd.f32 %v1764_v46, %v1596_v11  ;;  %v1598_v26 = vpop.f32.mrf.mxu1  ;;  %v360_v11 = vld [vmem:[%s6482_s2 + $0x3a8] sm:$0xff] }
 0x153   : > { %v1933_v60 = vpop.f32.mrf.mxu3  ;;  %v1599_v28 = vadd.f32 %v1598_v26, %v1429_v61  ;;  %v362_v61 = vld [vmem:[%s6482_s2 + $0x3b8] sm:$0xff] }
 0x154   : > { %v1934_v35 = vadd.f32 %v1933_v60, %v1765_v44  ;;  %1468 = vmatmul.bf16.gmra.mxu0 %v6873_v24  ;;  %v358_v60 = vld [vmem:[%s6482_s2 + $0x398] sm:$0xff] }
 0x155   : > { %1637 = vmatmul.bf16.gmra.mxu1 %v6875_v17  ;;  %v6901_v17 = vpack.c.bf16 %v362_v61, %v358_v60 }
 0x156   : > { %4139 = vst [vmem:[%s6766_s12 + $0x120] sm:$0xff] %v1934_v35  ;;  %1806 = vmatmul.bf16.gmra.mxu2 %v6877_v27  ;;  %v359_v35 = vld [vmem:[%s6482_s2 + $0x3a0] sm:$0xff] }
 0x157   : > { %8319 = vst [vmem:[#allocation36_spill] sm:$0xff] %v6901_v17 }
 0x158   : > { %1975 = vmatmul.bf16.gmra.mxu3 %v6879_v29  ;;  %v6895_v29 = vpack.c.bf16 %v359_v35, %v355_v33  ;;  %v5471_v33 = vld [vmem:[%s6489_s4 + $0x168] sm:$0xf]  ;;  %v5855_v35 = vld [vmem:[%s6489_s4 + $0x174] sm:$0xf0] }
 0x159   : > { %v1767_v62 = vpop.f32.mrf.mxu2  ;;  %v1431_v44 = vpop.f32.mrf.mxu0 }
 0x15a   : > { %v1768_v31 = vadd.f32 %v1767_v62, %v1599_v28  ;;  %v1600_v32 = vpop.f32.mrf.mxu1  ;;  %8316 = vst [vmem:[#allocation33_spill] sm:$0xff] %v6895_v29 }
 0x15b   : > { %v1936_v40 = vpop.f32.mrf.mxu3  ;;  %v1601_v46 = vadd.f32 %v1600_v32, %v1431_v44 }
 0x15c   : > { %v1937_v30 = vadd.f32 %v1936_v40, %v1768_v31  ;;  %v6897_v40 = vpack.c.bf16 %v360_v11, %v356_v34  ;;  %v5853_v34 = vld [vmem:[%s6489_s4 + $0x16c] sm:$0xf]  ;;  %v5472_v11 = vor.u32 %v5855_v35, %v5471_v33  ;;  %v365_v35 = vld [vmem:[%s6482_s2 + $0x3d0] sm:$0xff] }
 0x15d   : > { %v368_v33 = vld [vmem:[%s6482_s2 + $0x3e8] sm:$0xff] }
 0x15e   : > { %4143 = vst [vmem:[%s6766_s12 + $0x140] sm:$0xff] %v1937_v30  ;;  %v6899_v30 = vpack.c.bf16 %v361_v43, %v357_v41  ;;  %v5473_v41 = vld [vmem:[%s6489_s4 + $0x178] sm:$0xf0]  ;;  %2413 = vmatpush.bf16.xpose.msrb.mxu2 %v5472_v11 }
 0x15f   : > { %8317 = vst [vmem:[#allocation34_spill] sm:$0xff] %v6897_v40  ;;  %v370_v11 = vld [vmem:[%s6482_s2 + $0x3f8] sm:$0xff] }
 0x160   : > { %8318 = vst [vmem:[#allocation35_spill] sm:$0xff] %v6899_v30 }
 0x161   : > { %v1769_v26 = vpop.f32.mrf.mxu2  ;;  %v1434_v31 = vpop.f32.mrf.mxu0 }
 0x162   : > { %v1770_v28 = vadd.f32 %v1769_v26, %v1601_v46  ;;  %v1603_v27 = vpop.f32.mrf.mxu1 }
 0x163   : > { %v1938_v62 = vpop.f32.mrf.mxu3  ;;  %v1604_v32 = vadd.f32 %v1603_v27, %v1434_v31  ;;  %v5476_v27 = vor.u32 %v5853_v34, %v5473_v41  ;;  %v367_v31 = vld [vmem:[%s6482_s2 + $0x3e0] sm:$0xff]  ;;  %v5854_v34 = vld [vmem:[%s6489_s4 + $0x16c] sm:$0xf0] }
 0x164   : > { %v1939_v44 = vadd.f32 %v1938_v62, %v1770_v28  ;;  %1473 = vmatmul.bf16.gmra.mxu0 %v6895_v29  ;;  %v363_v62 = vld [vmem:[%s6482_s2 + $0x3c0] sm:$0xff]  ;;  %v369_v41 = vld [vmem:[%s6482_s2 + $0x3f0] sm:$0xff]  ;;  %v366_v29 = vld [vmem:[%s6482_s2 + $0x3d8] sm:$0xff] }
 0x165   : > { %1642 = vmatmul.bf16.gmra.mxu1 %v6897_v40  ;;  %2582 = vmatpush.bf16.xpose.msrb.mxu3 %v5476_v27  ;;  %v6925_v45 = vpack.c.bf16 %v367_v31, %v363_v62  ;;  %v6929_v9 = vpack.c.bf16 %v369_v41, %v365_v35  ;;  %v375_v35 = vld [vmem:[%s6482_s2 + $0x420] sm:$0xff]  ;;  %v373_v41 = vld [vmem:[%s6482_s2 + $0x410] sm:$0xff] }
 0x166   : > { %4147 = vst [vmem:[%s6766_s12 + $0x160] sm:$0xff] %v1939_v44  ;;  %1811 = vmatmul.bf16.gmra.mxu2 %v6899_v30  ;;  %v364_v44 = vld [vmem:[%s6482_s2 + $0x3c8] sm:$0xff]  ;;  %v5465_v30 = vld [vmem:[%s6489_s4 + $0x170] sm:$0xf0] }
 0x167   : > { %8320 = vst [vmem:[#allocation37_spill] sm:$0xff] %v6925_v45 }
 0x168   : > { %1980 = vmatmul.bf16.gmra.mxu3 %v6901_v17  ;;  %v5463_v17 = vld [vmem:[%s6489_s4 + $0x160] sm:$0xf]  ;;  %8322 = vst [vmem:[#allocation39_spill] sm:$0xff] %v6929_v9 }
 0x169   : > { %v1772_v43 = vpop.f32.mrf.mxu2  ;;  %v1436_v61 = vpop.f32.mrf.mxu0 }
 0x16a   : > { %v1773_v46 = vadd.f32 %v1772_v43, %v1604_v32  ;;  %v1605_v26 = vpop.f32.mrf.mxu1  ;;  %v5464_v32 = vor.u32 %v5854_v34, %v5463_v17  ;;  %v5852_v43 = vld [vmem:[%s6489_s4 + $0x164] sm:$0xf]  ;;  %v372_v34 = vld [vmem:[%s6482_s2 + $0x408] sm:$0xff] }
 0x16b   : > { %v1941_v60 = vpop.f32.mrf.mxu3  ;;  %v1606_v40 = vadd.f32 %v1605_v26, %v1436_v61  ;;  %v5468_v24 = vor.u32 %v5852_v43, %v5465_v30  ;;  %v6931_v61 = vpack.c.bf16 %v370_v11, %v366_v29  ;;  %v374_v11 = vld [vmem:[%s6482_s2 + $0x418] sm:$0xff] }
 0x16c   : > { %v1942_v28 = vadd.f32 %v1941_v60, %v1773_v46  ;;  %2075 = vmatpush.bf16.xpose.msrb.mxu0 %v5464_v32  ;;  %v377_v32 = vld [vmem:[%s6482_s2 + $0x430] sm:$0xff] }
 0x16d   : > { %2244 = vmatpush.bf16.xpose.msrb.mxu1 %v5468_v24  ;;  %8323 = vst [vmem:[#allocation40_spill] sm:$0xff] %v6931_v61 }
 0x16e   : > { %4151 = vst [vmem:[%s6766_s12 + $0x180] sm:$0xff] %v1942_v28  ;;  %v6927_v28 = vpack.c.bf16 %v368_v33, %v364_v44  ;;  %v371_v33 = vld [vmem:[%s6482_s2 + $0x400] sm:$0xff] }
 0x170   : > { %8321 = vst [vmem:[#allocation38_spill] sm:$0xff] %v6927_v28 }
 0x171   : > { %v1774_v27 = vpop.f32.mrf.mxu2  ;;  %v1439_v42 = vpop.f32.mrf.mxu0 }
 0x172   : > { %v1775_v46 = vadd.f32 %v1774_v27, %v1606_v40  ;;  %v1608_v17 = vpop.f32.mrf.mxu1  ;;  %v378_v27 = vld [vmem:[%s6482_s2 + $0x438] sm:$0xff] }
 0x173   : > { %v1943_v60 = vpop.f32.mrf.mxu3  ;;  %v1609_v40 = vadd.f32 %v1608_v17, %v1439_v42  ;;  %v376_v42 = vld [vmem:[%s6482_s2 + $0x428] sm:$0xff] }
 0x174   : > { %v1944_v26 = vadd.f32 %v1943_v60, %v1775_v46  ;;  %1478 = vmatmul.bf16.gmra.mxu0 %v6925_v45  ;;  %v6947_v60 = vpack.c.bf16 %v375_v35, %v371_v33 }
 0x175   : > { %1647 = vmatmul.bf16.gmra.mxu1 %v6927_v28 }
 0x176   : > { %4155 = vst [vmem:[%s6766_s12 + $0x1a0] sm:$0xff] %v1944_v26  ;;  %1816 = vmatmul.bf16.gmra.mxu2 %v6929_v9 }
 0x177   : > { %8324 = vst [vmem:[#allocation41_spill] sm:$0xff] %v6947_v60 }
 0x178   : > { %1985 = vmatmul.bf16.gmra.mxu3 %v6931_v61 }
 0x179   : > { %v1777_v24 = vpop.f32.mrf.mxu2  ;;  %v1441_v62 = vpop.f32.mrf.mxu0 }
 0x17a   : > { %v1778_v29 = vadd.f32 %v1777_v24, %v1609_v40  ;;  %v1610_v31 = vpop.f32.mrf.mxu1  ;;  %v6949_v24 = vpack.c.bf16 %v376_v42, %v372_v34 }
 0x17b   : > { %v1946_v30 = vpop.f32.mrf.mxu3  ;;  %v1611_v43 = vadd.f32 %v1610_v31, %v1441_v62 }
 0x17c   : > { %v1947_v44 = vadd.f32 %v1946_v30, %v1778_v29  ;;  %8325 = vst [vmem:[#allocation42_spill] sm:$0xff] %v6949_v24  ;;  %v6951_v29 = vpack.c.bf16 %v377_v32, %v373_v41  ;;  %v379_v32 = vld [vmem:[%s6482_s2 + $0x440] sm:$0xff] }
 0x17e   : > { %4159 = vst [vmem:[%s6766_s12 + $0x1c0] sm:$0xff] %v1947_v44  ;;  %v6953_v44 = vpack.c.bf16 %v378_v27, %v374_v11  ;;  %v384_v11 = vld [vmem:[%s6482_s2 + $0x468] sm:$0xff]  ;;  %v381_v27 = vld [vmem:[%s6482_s2 + $0x450] sm:$0xff] }
 0x17f   : > { %8326 = vst [vmem:[#allocation43_spill] sm:$0xff] %v6951_v29 }
 0x180   : > { %8327 = vst [vmem:[#allocation44_spill] sm:$0xff] %v6953_v44 }
 0x181   : > { %v1779_v46 = vpop.f32.mrf.mxu2  ;;  %v1444_v40 = vpop.f32.mrf.mxu0 }
 0x182   : > { %v1780_v17 = vadd.f32 %v1779_v46, %v1611_v43  ;;  %v1613_v30 = vpop.f32.mrf.mxu1  ;;  %v380_v43 = vld [vmem:[%s6482_s2 + $0x448] sm:$0xff]  ;;  %v385_v46 = vld [vmem:[%s6482_s2 + $0x470] sm:$0xff] }
 0x183   : > { %v1948_v26 = vpop.f32.mrf.mxu3  ;;  %v1614_v62 = vadd.f32 %v1613_v30, %v1444_v40  ;;  %v386_v40 = vld [vmem:[%s6482_s2 + $0x478] sm:$0xff] }
 0x184   : > { %v1949_v61 = vadd.f32 %v1948_v26, %v1780_v17  ;;  %1483 = vmatmul.bf16.gmra.mxu0 %v6947_v60  ;;  %v382_v26 = vld [vmem:[%s6482_s2 + $0x458] sm:$0xff] }
 0x185   : > { %1652 = vmatmul.bf16.gmra.mxu1 %v6949_v24  ;;  %v6971_v24 = vpack.c.bf16 %v384_v11, %v380_v43 }
 0x186   : > { %4163 = vst [vmem:[%s6766_s12 + $0x1e0] sm:$0xff] %v1949_v61  ;;  %1821 = vmatmul.bf16.gmra.mxu2 %v6951_v29  ;;  %v383_v61 = vld [vmem:[%s6482_s2 + $0x460] sm:$0xff] }
 0x187   : > { %8329 = vst [vmem:[#allocation46_spill] sm:$0xff] %v6971_v24 }
 0x188   : > { %1990 = vmatmul.bf16.gmra.mxu3 %v6953_v44  ;;  %v6969_v44 = vpack.c.bf16 %v383_v61, %v379_v32 }
 0x189   : > { %v1782_v31 = vpop.f32.mrf.mxu2  ;;  %v1446_v34 = vpop.f32.mrf.mxu0 }
 0x18a   : > { %v1783_v33 = vadd.f32 %v1782_v31, %v1614_v62  ;;  %v1615_v42 = vpop.f32.mrf.mxu1  ;;  %8328 = vst [vmem:[#allocation45_spill] sm:$0xff] %v6969_v44 }
 0x18b   : > { %v1951_v35 = vpop.f32.mrf.mxu3  ;;  %v1616_v17 = vadd.f32 %v1615_v42, %v1446_v34 }
 0x18c   : > { %v1952_v41 = vadd.f32 %v1951_v35, %v1783_v33  ;;  %v6973_v33 = vpack.c.bf16 %v385_v46, %v381_v27  ;;  %v387_v27 = vld [vmem:[%s6482_s2 + $0x480] sm:$0xff]  ;;  %v388_v46 = vld [vmem:[%s6482_s2 + $0x488] sm:$0xff] }
 0x18e   : > { %4167 = vst [vmem:[%s6766_s12 + $0x200] sm:$0xff] %v1952_v41  ;;  %v6975_v41 = vpack.c.bf16 %v386_v40, %v382_v26  ;;  %v389_v26 = vld [vmem:[%s6482_s2 + $0x490] sm:$0xff] }
 0x18f   : > { %8330 = vst [vmem:[#allocation47_spill] sm:$0xff] %v6973_v33  ;;  %v393_v40 = vld [vmem:[%s6482_s2 + $0x4b0] sm:$0xff] }
 0x190   : > { %8331 = vst [vmem:[#allocation48_spill] sm:$0xff] %v6975_v41 }
 0x191   : > { %v1784_v30 = vpop.f32.mrf.mxu2  ;;  %v1449_v31 = vpop.f32.mrf.mxu0 }
 0x192   : > { %v1785_v29 = vadd.f32 %v1784_v30, %v1616_v17  ;;  %v1618_v35 = vpop.f32.mrf.mxu1  ;;  %v392_v17 = vld [vmem:[%s6482_s2 + $0x4a8] sm:$0xff] }
 0x193   : > { %v1953_v62 = vpop.f32.mrf.mxu3  ;;  %v1619_v34 = vadd.f32 %v1618_v35, %v1449_v31  ;;  %v394_v31 = vld [vmem:[%s6482_s2 + $0x4b8] sm:$0xff] }
 0x194   : > { %v1954_v60 = vadd.f32 %v1953_v62, %v1785_v29  ;;  %1488 = vmatmul.bf16.gmra.mxu0 %v6969_v44  ;;  %v390_v62 = vld [vmem:[%s6482_s2 + $0x498] sm:$0xff] }
 0x195   : > { %1657 = vmatmul.bf16.gmra.mxu1 %v6971_v24  ;;  %v6997_v24 = vpack.c.bf16 %v394_v31, %v390_v62 }
 0x196   : > { %4171 = vst [vmem:[%s6766_s12 + $0x220] sm:$0xff] %v1954_v60  ;;  %1826 = vmatmul.bf16.gmra.mxu2 %v6973_v33  ;;  %v391_v60 = vld [vmem:[%s6482_s2 + $0x4a0] sm:$0xff] }
 0x197   : > { %8335 = vst [vmem:[#allocation52_spill] sm:$0xff] %v6997_v24 }
 0x198   : > { %1995 = vmatmul.bf16.gmra.mxu3 %v6975_v41  ;;  %v6991_v41 = vpack.c.bf16 %v391_v60, %v387_v27  ;;  %v5455_v27 = vld [vmem:[%s6489_s4 + $0x148] sm:$0xf]  ;;  %v5851_v60 = vld [vmem:[%s6489_s4 + $0x154] sm:$0xf0] }
 0x199   : > { %v1787_v42 = vpop.f32.mrf.mxu2  ;;  %v1451_v29 = vpop.f32.mrf.mxu0 }
 0x19a   : > { %v1788_v32 = vadd.f32 %v1787_v42, %v1619_v34  ;;  %v1620_v43 = vpop.f32.mrf.mxu1  ;;  %8332 = vst [vmem:[#allocation49_spill] sm:$0xff] %v6991_v41 }
 0x19b   : > { %v1956_v61 = vpop.f32.mrf.mxu3  ;;  %v1621_v30 = vadd.f32 %v1620_v43, %v1451_v29 }
 0x19c   : > { %v1957_v11 = vadd.f32 %v1956_v61, %v1788_v32  ;;  %v6993_v61 = vpack.c.bf16 %v392_v17, %v388_v46  ;;  %v5849_v46 = vld [vmem:[%s6489_s4 + $0x14c] sm:$0xf]  ;;  %v5456_v17 = vor.u32 %v5851_v60, %v5455_v27  ;;  %v397_v60 = vld [vmem:[%s6482_s2 + $0x4d0] sm:$0xff] }
 0x19d   : > { %v400_v27 = vld [vmem:[%s6482_s2 + $0x4e8] sm:$0xff] }
 0x19e   : > { %4175 = vst [vmem:[%s6766_s12 + $0x240] sm:$0xff] %v1957_v11  ;;  %v6995_v11 = vpack.c.bf16 %v393_v40, %v389_v26  ;;  %v5457_v26 = vld [vmem:[%s6489_s4 + $0x158] sm:$0xf0]  ;;  %2414 = vmatpush.bf16.xpose.msrb.mxu2 %v5456_v17 }
 0x19f   : > { %8333 = vst [vmem:[#allocation50_spill] sm:$0xff] %v6993_v61  ;;  %v402_v17 = vld [vmem:[%s6482_s2 + $0x4f8] sm:$0xff] }
 0x1a0   : > { %8334 = vst [vmem:[#allocation51_spill] sm:$0xff] %v6995_v11 }
 0x1a1   : > { %v1789_v35 = vpop.f32.mrf.mxu2  ;;  %v1454_v32 = vpop.f32.mrf.mxu0 }
 0x1a2   : > { %v1790_v34 = vadd.f32 %v1789_v35, %v1621_v30  ;;  %v1623_v33 = vpop.f32.mrf.mxu1 }
 0x1a3   : > { %v1958_v42 = vpop.f32.mrf.mxu3  ;;  %v1624_v43 = vadd.f32 %v1623_v33, %v1454_v32  ;;  %v5460_v33 = vor.u32 %v5849_v46, %v5457_v26  ;;  %v399_v32 = vld [vmem:[%s6482_s2 + $0x4e0] sm:$0xff]  ;;  %v5850_v46 = vld [vmem:[%s6489_s4 + $0x14c] sm:$0xf0] }
 0x1a4   : > { %v1959_v29 = vadd.f32 %v1958_v42, %v1790_v34  ;;  %1493 = vmatmul.bf16.gmra.mxu0 %v6991_v41  ;;  %v395_v42 = vld [vmem:[%s6482_s2 + $0x4c0] sm:$0xff]  ;;  %v401_v26 = vld [vmem:[%s6482_s2 + $0x4f0] sm:$0xff]  ;;  %v398_v41 = vld [vmem:[%s6482_s2 + $0x4d8] sm:$0xff] }
 0x1a5   : > { %1662 = vmatmul.bf16.gmra.mxu1 %v6993_v61  ;;  %2583 = vmatpush.bf16.xpose.msrb.mxu3 %v5460_v33  ;;  %v7021_v9 = vpack.c.bf16 %v399_v32, %v395_v42  ;;  %v7025_v45 = vpack.c.bf16 %v401_v26, %v397_v60  ;;  %v407_v60 = vld [vmem:[%s6482_s2 + $0x520] sm:$0xff]  ;;  %v405_v26 = vld [vmem:[%s6482_s2 + $0x510] sm:$0xff] }
 0x1a6   : > { %4179 = vst [vmem:[%s6766_s12 + $0x260] sm:$0xff] %v1959_v29  ;;  %1831 = vmatmul.bf16.gmra.mxu2 %v6995_v11  ;;  %v396_v29 = vld [vmem:[%s6482_s2 + $0x4c8] sm:$0xff]  ;;  %v5449_v11 = vld [vmem:[%s6489_s4 + $0x150] sm:$0xf0] }
 0x1a7   : > { %8336 = vst [vmem:[#allocation53_spill] sm:$0xff] %v7021_v9 }
 0x1a8   : > { %2000 = vmatmul.bf16.gmra.mxu3 %v6997_v24  ;;  %v5447_v24 = vld [vmem:[%s6489_s4 + $0x140] sm:$0xf]  ;;  %8338 = vst [vmem:[#allocation55_spill] sm:$0xff] %v7025_v45 }
 0x1a9   : > { %v1792_v40 = vpop.f32.mrf.mxu2  ;;  %v1456_v31 = vpop.f32.mrf.mxu0 }
 0x1aa   : > { %v1793_v30 = vadd.f32 %v1792_v40, %v1624_v43  ;;  %v1625_v35 = vpop.f32.mrf.mxu1  ;;  %v5448_v43 = vor.u32 %v5850_v46, %v5447_v24  ;;  %v5848_v40 = vld [vmem:[%s6489_s4 + $0x144] sm:$0xf]  ;;  %v404_v46 = vld [vmem:[%s6482_s2 + $0x508] sm:$0xff] }
 0x1ab   : > { %v1961_v62 = vpop.f32.mrf.mxu3  ;;  %v1626_v61 = vadd.f32 %v1625_v35, %v1456_v31  ;;  %v5452_v44 = vor.u32 %v5848_v40, %v5449_v11  ;;  %v7027_v31 = vpack.c.bf16 %v402_v17, %v398_v41  ;;  %v406_v17 = vld [vmem:[%s6482_s2 + $0x518] sm:$0xff] }
 0x1ac   : > { %v1962_v34 = vadd.f32 %v1961_v62, %v1793_v30  ;;  %2076 = vmatpush.bf16.xpose.msrb.mxu0 %v5448_v43  ;;  %v409_v43 = vld [vmem:[%s6482_s2 + $0x530] sm:$0xff] }
 0x1ad   : > { %2245 = vmatpush.bf16.xpose.msrb.mxu1 %v5452_v44  ;;  %8339 = vst [vmem:[#allocation56_spill] sm:$0xff] %v7027_v31 }
 0x1ae   : > { %4183 = vst [vmem:[%s6766_s12 + $0x280] sm:$0xff] %v1962_v34  ;;  %v7023_v34 = vpack.c.bf16 %v400_v27, %v396_v29  ;;  %v403_v27 = vld [vmem:[%s6482_s2 + $0x500] sm:$0xff] }
 0x1b0   : > { %8337 = vst [vmem:[#allocation54_spill] sm:$0xff] %v7023_v34 }
 0x1b1   : > { %v1794_v33 = vpop.f32.mrf.mxu2  ;;  %v1459_v28 = vpop.f32.mrf.mxu0 }
 0x1b2   : > { %v1795_v30 = vadd.f32 %v1794_v33, %v1626_v61  ;;  %v1628_v24 = vpop.f32.mrf.mxu1  ;;  %v410_v33 = vld [vmem:[%s6482_s2 + $0x538] sm:$0xff] }
 0x1b3   : > { %v1963_v62 = vpop.f32.mrf.mxu3  ;;  %v1629_v61 = vadd.f32 %v1628_v24, %v1459_v28  ;;  %v408_v28 = vld [vmem:[%s6482_s2 + $0x528] sm:$0xff] }
 0x1b4   : > { %v1964_v35 = vadd.f32 %v1963_v62, %v1795_v30  ;;  %1498 = vmatmul.bf16.gmra.mxu0 %v7021_v9  ;;  %v7043_v62 = vpack.c.bf16 %v407_v60, %v403_v27 }
 0x1b5   : > { %1667 = vmatmul.bf16.gmra.mxu1 %v7023_v34 }
 0x1b6   : > { %4187 = vst [vmem:[%s6766_s12 + $0x2a0] sm:$0xff] %v1964_v35  ;;  %1836 = vmatmul.bf16.gmra.mxu2 %v7025_v45 }
 0x1b7   : > { %8340 = vst [vmem:[#allocation57_spill] sm:$0xff] %v7043_v62 }
 0x1b8   : > { %2005 = vmatmul.bf16.gmra.mxu3 %v7027_v31 }
 0x1b9   : > { %v1797_v44 = vpop.f32.mrf.mxu2  ;;  %v1461_v42 = vpop.f32.mrf.mxu0 }
 0x1ba   : > { %v1798_v41 = vadd.f32 %v1797_v44, %v1629_v61  ;;  %v1630_v32 = vpop.f32.mrf.mxu1  ;;  %v7045_v44 = vpack.c.bf16 %v408_v28, %v404_v46 }
 0x1bb   : > { %v1966_v11 = vpop.f32.mrf.mxu3  ;;  %v1631_v40 = vadd.f32 %v1630_v32, %v1461_v42 }
 0x1bc   : > { %v1967_v29 = vadd.f32 %v1966_v11, %v1798_v41  ;;  %8341 = vst [vmem:[#allocation58_spill] sm:$0xff] %v7045_v44  ;;  %v7047_v41 = vpack.c.bf16 %v409_v43, %v405_v26  ;;  %v411_v43 = vld [vmem:[%s6482_s2 + $0x540] sm:$0xff] }
 0x1be   : > { %4191 = vst [vmem:[%s6766_s12 + $0x2c0] sm:$0xff] %v1967_v29  ;;  %v7049_v29 = vpack.c.bf16 %v410_v33, %v406_v17  ;;  %v416_v17 = vld [vmem:[%s6482_s2 + $0x568] sm:$0xff]  ;;  %v413_v33 = vld [vmem:[%s6482_s2 + $0x550] sm:$0xff] }
 0x1bf   : > { %8342 = vst [vmem:[#allocation59_spill] sm:$0xff] %v7047_v41 }
 0x1c0   : > { %8343 = vst [vmem:[#allocation60_spill] sm:$0xff] %v7049_v29 }
 0x1c1   : > { %v1799_v30 = vpop.f32.mrf.mxu2  ;;  %v1464_v61 = vpop.f32.mrf.mxu0 }
 0x1c2   : > { %v1800_v24 = vadd.f32 %v1799_v30, %v1631_v40  ;;  %v1633_v11 = vpop.f32.mrf.mxu1  ;;  %v412_v40 = vld [vmem:[%s6482_s2 + $0x548] sm:$0xff]  ;;  %v417_v30 = vld [vmem:[%s6482_s2 + $0x570] sm:$0xff] }
 0x1c3   : > { %v1968_v35 = vpop.f32.mrf.mxu3  ;;  %v1634_v42 = vadd.f32 %v1633_v11, %v1464_v61  ;;  %v418_v61 = vld [vmem:[%s6482_s2 + $0x578] sm:$0xff] }
 0x1c4   : > { %v1969_v31 = vadd.f32 %v1968_v35, %v1800_v24  ;;  %1503 = vmatmul.bf16.gmra.mxu0 %v7043_v62  ;;  %v414_v35 = vld [vmem:[%s6482_s2 + $0x558] sm:$0xff] }
 0x1c5   : > { %1672 = vmatmul.bf16.gmra.mxu1 %v7045_v44  ;;  %v7067_v44 = vpack.c.bf16 %v416_v17, %v412_v40 }
 0x1c6   : > { %4195 = vst [vmem:[%s6766_s12 + $0x2e0] sm:$0xff] %v1969_v31  ;;  %1841 = vmatmul.bf16.gmra.mxu2 %v7047_v41  ;;  %v415_v31 = vld [vmem:[%s6482_s2 + $0x560] sm:$0xff] }
 0x1c7   : > { %8345 = vst [vmem:[#allocation62_spill] sm:$0xff] %v7067_v44 }
 0x1c8   : > { %2010 = vmatmul.bf16.gmra.mxu3 %v7049_v29  ;;  %v7065_v29 = vpack.c.bf16 %v415_v31, %v411_v43 }
 0x1c9   : > { %v1802_v32 = vpop.f32.mrf.mxu2  ;;  %v1466_v46 = vpop.f32.mrf.mxu0 }
 0x1ca   : > { %v1803_v27 = vadd.f32 %v1802_v32, %v1634_v42  ;;  %v1635_v28 = vpop.f32.mrf.mxu1  ;;  %8344 = vst [vmem:[#allocation61_spill] sm:$0xff] %v7065_v29 }
 0x1cb   : > { %v1971_v60 = vpop.f32.mrf.mxu3  ;;  %v1636_v24 = vadd.f32 %v1635_v28, %v1466_v46 }
 0x1cc   : > { %v1972_v26 = vadd.f32 %v1971_v60, %v1803_v27  ;;  %v7069_v27 = vpack.c.bf16 %v417_v30, %v413_v33  ;;  %v419_v33 = vld [vmem:[%s6482_s2 + $0x580] sm:$0xff]  ;;  %v420_v30 = vld [vmem:[%s6482_s2 + $0x588] sm:$0xff] }
 0x1ce   : > { %4199 = vst [vmem:[%s6766_s12 + $0x300] sm:$0xff] %v1972_v26  ;;  %v7071_v26 = vpack.c.bf16 %v418_v61, %v414_v35  ;;  %v421_v35 = vld [vmem:[%s6482_s2 + $0x590] sm:$0xff] }
 0x1cf   : > { %8346 = vst [vmem:[#allocation63_spill] sm:$0xff] %v7069_v27  ;;  %v425_v61 = vld [vmem:[%s6482_s2 + $0x5b0] sm:$0xff] }
 0x1d0   : > { %8347 = vst [vmem:[#allocation64_spill] sm:$0xff] %v7071_v26 }
 0x1d1   : > { %v1804_v11 = vpop.f32.mrf.mxu2  ;;  %v1469_v32 = vpop.f32.mrf.mxu0 }
 0x1d2   : > { %v1805_v41 = vadd.f32 %v1804_v11, %v1636_v24  ;;  %v1638_v60 = vpop.f32.mrf.mxu1  ;;  %v424_v24 = vld [vmem:[%s6482_s2 + $0x5a8] sm:$0xff] }
 0x1d3   : > { %v1973_v42 = vpop.f32.mrf.mxu3  ;;  %v1639_v46 = vadd.f32 %v1638_v60, %v1469_v32  ;;  %v426_v32 = vld [vmem:[%s6482_s2 + $0x5b8] sm:$0xff] }
 0x1d4   : > { %v1974_v62 = vadd.f32 %v1973_v42, %v1805_v41  ;;  %1508 = vmatmul.bf16.gmra.mxu0 %v7065_v29  ;;  %v422_v42 = vld [vmem:[%s6482_s2 + $0x598] sm:$0xff] }
 0x1d5   : > { %1677 = vmatmul.bf16.gmra.mxu1 %v7067_v44  ;;  %v7093_v44 = vpack.c.bf16 %v426_v32, %v422_v42 }
 0x1d6   : > { %4203 = vst [vmem:[%s6766_s12 + $0x320] sm:$0xff] %v1974_v62  ;;  %1846 = vmatmul.bf16.gmra.mxu2 %v7069_v27  ;;  %v423_v62 = vld [vmem:[%s6482_s2 + $0x5a0] sm:$0xff] }
 0x1d7   : > { %8351 = vst [vmem:[#allocation68_spill] sm:$0xff] %v7093_v44 }
 0x1d8   : > { %2015 = vmatmul.bf16.gmra.mxu3 %v7071_v26  ;;  %v7087_v26 = vpack.c.bf16 %v423_v62, %v419_v33  ;;  %v5439_v33 = vld [vmem:[%s6489_s4 + $0x128] sm:$0xf]  ;;  %v5847_v62 = vld [vmem:[%s6489_s4 + $0x134] sm:$0xf0] }
 0x1d9   : > { %v1807_v28 = vpop.f32.mrf.mxu2  ;;  %v1471_v41 = vpop.f32.mrf.mxu0 }
 0x1da   : > { %v1808_v43 = vadd.f32 %v1807_v28, %v1639_v46  ;;  %v1640_v40 = vpop.f32.mrf.mxu1  ;;  %8348 = vst [vmem:[#allocation65_spill] sm:$0xff] %v7087_v26 }
 0x1db   : > { %v1976_v31 = vpop.f32.mrf.mxu3  ;;  %v1641_v11 = vadd.f32 %v1640_v40, %v1471_v41 }
 0x1dc   : > { %v1977_v17 = vadd.f32 %v1976_v31, %v1808_v43  ;;  %v7089_v31 = vpack.c.bf16 %v424_v24, %v420_v30  ;;  %v5845_v30 = vld [vmem:[%s6489_s4 + $0x12c] sm:$0xf]  ;;  %v5440_v24 = vor.u32 %v5847_v62, %v5439_v33  ;;  %v429_v62 = vld [vmem:[%s6482_s2 + $0x5d0] sm:$0xff] }
 0x1dd   : > { %v432_v33 = vld [vmem:[%s6482_s2 + $0x5e8] sm:$0xff] }
 0x1de   : > { %4207 = vst [vmem:[%s6766_s12 + $0x340] sm:$0xff] %v1977_v17  ;;  %v7091_v17 = vpack.c.bf16 %v425_v61, %v421_v35  ;;  %v5441_v35 = vld [vmem:[%s6489_s4 + $0x138] sm:$0xf0]  ;;  %2415 = vmatpush.bf16.xpose.msrb.mxu2 %v5440_v24 }
 0x1df   : > { %8349 = vst [vmem:[#allocation66_spill] sm:$0xff] %v7089_v31  ;;  %v434_v24 = vld [vmem:[%s6482_s2 + $0x5f8] sm:$0xff] }
 0x1e0   : > { %8350 = vst [vmem:[#allocation67_spill] sm:$0xff] %v7091_v17 }
 0x1e1   : > { %v1809_v60 = vpop.f32.mrf.mxu2  ;;  %v1474_v43 = vpop.f32.mrf.mxu0 }
 0x1e2   : > { %v1810_v46 = vadd.f32 %v1809_v60, %v1641_v11  ;;  %v1643_v27 = vpop.f32.mrf.mxu1 }
 0x1e3   : > { %v1978_v28 = vpop.f32.mrf.mxu3  ;;  %v1644_v40 = vadd.f32 %v1643_v27, %v1474_v43  ;;  %v5444_v27 = vor.u32 %v5845_v30, %v5441_v35  ;;  %v431_v43 = vld [vmem:[%s6482_s2 + $0x5e0] sm:$0xff]  ;;  %v5846_v30 = vld [vmem:[%s6489_s4 + $0x12c] sm:$0xf0] }
 0x1e4   : > { %v1979_v41 = vadd.f32 %v1978_v28, %v1810_v46  ;;  %1513 = vmatmul.bf16.gmra.mxu0 %v7087_v26  ;;  %v427_v28 = vld [vmem:[%s6482_s2 + $0x5c0] sm:$0xff]  ;;  %v433_v35 = vld [vmem:[%s6482_s2 + $0x5f0] sm:$0xff]  ;;  %v430_v26 = vld [vmem:[%s6482_s2 + $0x5d8] sm:$0xff] }
 0x1e5   : > { %1682 = vmatmul.bf16.gmra.mxu1 %v7089_v31  ;;  %2584 = vmatpush.bf16.xpose.msrb.mxu3 %v5444_v27  ;;  %v7117_v45 = vpack.c.bf16 %v431_v43, %v427_v28  ;;  %v7121_v9 = vpack.c.bf16 %v433_v35, %v429_v62  ;;  %v439_v62 = vld [vmem:[%s6482_s2 + $0x620] sm:$0xff]  ;;  %v437_v35 = vld [vmem:[%s6482_s2 + $0x610] sm:$0xff] }
 0x1e6   : > { %4211 = vst [vmem:[%s6766_s12 + $0x360] sm:$0xff] %v1979_v41  ;;  %1851 = vmatmul.bf16.gmra.mxu2 %v7091_v17  ;;  %v428_v41 = vld [vmem:[%s6482_s2 + $0x5c8] sm:$0xff]  ;;  %v5433_v17 = vld [vmem:[%s6489_s4 + $0x130] sm:$0xf0] }
 0x1e7   : > { %8352 = vst [vmem:[#allocation69_spill] sm:$0xff] %v7117_v45 }
 0x1e8   : > { %2020 = vmatmul.bf16.gmra.mxu3 %v7093_v44  ;;  %v5431_v44 = vld [vmem:[%s6489_s4 + $0x120] sm:$0xf]  ;;  %8354 = vst [vmem:[#allocation71_spill] sm:$0xff] %v7121_v9 }
 0x1e9   : > { %v1812_v61 = vpop.f32.mrf.mxu2  ;;  %v1476_v32 = vpop.f32.mrf.mxu0 }
 0x1ea   : > { %v1813_v11 = vadd.f32 %v1812_v61, %v1644_v40  ;;  %v1645_v60 = vpop.f32.mrf.mxu1  ;;  %v5432_v40 = vor.u32 %v5846_v30, %v5431_v44  ;;  %v5844_v61 = vld [vmem:[%s6489_s4 + $0x124] sm:$0xf]  ;;  %v436_v30 = vld [vmem:[%s6482_s2 + $0x608] sm:$0xff] }
 0x1eb   : > { %v1981_v42 = vpop.f32.mrf.mxu3  ;;  %v1646_v31 = vadd.f32 %v1645_v60, %v1476_v32  ;;  %v5436_v29 = vor.u32 %v5844_v61, %v5433_v17  ;;  %v7123_v32 = vpack.c.bf16 %v434_v24, %v430_v26  ;;  %v438_v24 = vld [vmem:[%s6482_s2 + $0x618] sm:$0xff] }
 0x1ec   : > { %v1982_v46 = vadd.f32 %v1981_v42, %v1813_v11  ;;  %2077 = vmatpush.bf16.xpose.msrb.mxu0 %v5432_v40  ;;  %v441_v40 = vld [vmem:[%s6482_s2 + $0x630] sm:$0xff] }
 0x1ed   : > { %2246 = vmatpush.bf16.xpose.msrb.mxu1 %v5436_v29  ;;  %8355 = vst [vmem:[#allocation72_spill] sm:$0xff] %v7123_v32 }
 0x1ee   : > { %4215 = vst [vmem:[%s6766_s12 + $0x380] sm:$0xff] %v1982_v46  ;;  %v7119_v46 = vpack.c.bf16 %v432_v33, %v428_v41  ;;  %v435_v33 = vld [vmem:[%s6482_s2 + $0x600] sm:$0xff] }
 0x1f0   : > { %8353 = vst [vmem:[#allocation70_spill] sm:$0xff] %v7119_v46 }
 0x1f1   : > { %v1814_v27 = vpop.f32.mrf.mxu2  ;;  %v1479_v34 = vpop.f32.mrf.mxu0 }
 0x1f2   : > { %v1815_v11 = vadd.f32 %v1814_v27, %v1646_v31  ;;  %v1648_v44 = vpop.f32.mrf.mxu1  ;;  %v442_v27 = vld [vmem:[%s6482_s2 + $0x638] sm:$0xff] }
 0x1f3   : > { %v1983_v42 = vpop.f32.mrf.mxu3  ;;  %v1649_v31 = vadd.f32 %v1648_v44, %v1479_v34  ;;  %v440_v34 = vld [vmem:[%s6482_s2 + $0x628] sm:$0xff] }
 0x1f4   : > { %v1984_v60 = vadd.f32 %v1983_v42, %v1815_v11  ;;  %1518 = vmatmul.bf16.gmra.mxu0 %v7117_v45  ;;  %v7139_v42 = vpack.c.bf16 %v439_v62, %v435_v33 }
 0x1f5   : > { %1687 = vmatmul.bf16.gmra.mxu1 %v7119_v46 }
 0x1f6   : > { %4219 = vst [vmem:[%s6766_s12 + $0x3a0] sm:$0xff] %v1984_v60  ;;  %1856 = vmatmul.bf16.gmra.mxu2 %v7121_v9 }
 0x1f7   : > { %8356 = vst [vmem:[#allocation73_spill] sm:$0xff] %v7139_v42 }
 0x1f8   : > { %2025 = vmatmul.bf16.gmra.mxu3 %v7123_v32 }
 0x1f9   : > { %v1817_v29 = vpop.f32.mrf.mxu2  ;;  %v1481_v28 = vpop.f32.mrf.mxu0 }
 0x1fa   : > { %v1818_v26 = vadd.f32 %v1817_v29, %v1649_v31  ;;  %v1650_v43 = vpop.f32.mrf.mxu1  ;;  %v7141_v29 = vpack.c.bf16 %v440_v34, %v436_v30 }
 0x1fb   : > { %v1986_v17 = vpop.f32.mrf.mxu3  ;;  %v1651_v61 = vadd.f32 %v1650_v43, %v1481_v28 }
 0x1fc   : > { %v1987_v41 = vadd.f32 %v1986_v17, %v1818_v26  ;;  %8357 = vst [vmem:[#allocation74_spill] sm:$0xff] %v7141_v29  ;;  %v7143_v26 = vpack.c.bf16 %v441_v40, %v437_v35  ;;  %v443_v40 = vld [vmem:[%s6482_s2 + $0x640] sm:$0xff] }
 0x1fe   : > { %4223 = vst [vmem:[%s6766_s12 + $0x3c0] sm:$0xff] %v1987_v41  ;;  %v7145_v41 = vpack.c.bf16 %v442_v27, %v438_v24  ;;  %v448_v24 = vld [vmem:[%s6482_s2 + $0x668] sm:$0xff]  ;;  %v445_v27 = vld [vmem:[%s6482_s2 + $0x650] sm:$0xff] }
 0x1ff   : > { %8358 = vst [vmem:[#allocation75_spill] sm:$0xff] %v7143_v26 }
 0x200   : > { %8359 = vst [vmem:[#allocation76_spill] sm:$0xff] %v7145_v41 }
 0x201   : > { %v1819_v11 = vpop.f32.mrf.mxu2  ;;  %v1484_v31 = vpop.f32.mrf.mxu0 }
 0x202   : > { %v1820_v44 = vadd.f32 %v1819_v11, %v1651_v61  ;;  %v1653_v17 = vpop.f32.mrf.mxu1  ;;  %v444_v61 = vld [vmem:[%s6482_s2 + $0x648] sm:$0xff]  ;;  %v449_v11 = vld [vmem:[%s6482_s2 + $0x670] sm:$0xff] }
 0x203   : > { %v1988_v60 = vpop.f32.mrf.mxu3  ;;  %v1654_v28 = vadd.f32 %v1653_v17, %v1484_v31  ;;  %v450_v31 = vld [vmem:[%s6482_s2 + $0x678] sm:$0xff] }
 0x204   : > { %v1989_v32 = vadd.f32 %v1988_v60, %v1820_v44  ;;  %1523 = vmatmul.bf16.gmra.mxu0 %v7139_v42  ;;  %v446_v60 = vld [vmem:[%s6482_s2 + $0x658] sm:$0xff] }
 0x205   : > { %1692 = vmatmul.bf16.gmra.mxu1 %v7141_v29  ;;  %v7163_v29 = vpack.c.bf16 %v448_v24, %v444_v61 }
 0x206   : > { %4227 = vst [vmem:[%s6766_s12 + $0x3e0] sm:$0xff] %v1989_v32  ;;  %1861 = vmatmul.bf16.gmra.mxu2 %v7143_v26  ;;  %v447_v32 = vld [vmem:[%s6482_s2 + $0x660] sm:$0xff] }
 0x207   : > { %8361 = vst [vmem:[#allocation78_spill] sm:$0xff] %v7163_v29 }
 0x208   : > { %2030 = vmatmul.bf16.gmra.mxu3 %v7145_v41  ;;  %v7161_v41 = vpack.c.bf16 %v447_v32, %v443_v40 }
 0x209   : > { %v1822_v43 = vpop.f32.mrf.mxu2  ;;  %v1486_v30 = vpop.f32.mrf.mxu0 }
 0x20a   : > { %v1823_v33 = vadd.f32 %v1822_v43, %v1654_v28  ;;  %v1655_v34 = vpop.f32.mrf.mxu1  ;;  %8360 = vst [vmem:[#allocation77_spill] sm:$0xff] %v7161_v41 }
 0x20b   : > { %v1991_v62 = vpop.f32.mrf.mxu3  ;;  %v1656_v44 = vadd.f32 %v1655_v34, %v1486_v30 }
 0x20c   : > { %v1992_v35 = vadd.f32 %v1991_v62, %v1823_v33  ;;  %v7165_v33 = vpack.c.bf16 %v449_v11, %v445_v27  ;;  %v451_v27 = vld [vmem:[%s6482_s2 + $0x680] sm:$0xff]  ;;  %v452_v11 = vld [vmem:[%s6482_s2 + $0x688] sm:$0xff] }
 0x20e   : > { %4231 = vst [vmem:[%s6766_s12 + $0x400] sm:$0xff] %v1992_v35  ;;  %v7167_v35 = vpack.c.bf16 %v450_v31, %v446_v60  ;;  %v453_v60 = vld [vmem:[%s6482_s2 + $0x690] sm:$0xff] }
 0x20f   : > { %8362 = vst [vmem:[#allocation79_spill] sm:$0xff] %v7165_v33  ;;  %v457_v31 = vld [vmem:[%s6482_s2 + $0x6b0] sm:$0xff] }
 0x210   : > { %8363 = vst [vmem:[#allocation80_spill] sm:$0xff] %v7167_v35 }
 0x211   : > { %v1824_v17 = vpop.f32.mrf.mxu2  ;;  %v1489_v43 = vpop.f32.mrf.mxu0 }
 0x212   : > { %v1825_v26 = vadd.f32 %v1824_v17, %v1656_v44  ;;  %v1658_v62 = vpop.f32.mrf.mxu1  ;;  %v456_v44 = vld [vmem:[%s6482_s2 + $0x6a8] sm:$0xff] }
 0x213   : > { %v1993_v28 = vpop.f32.mrf.mxu3  ;;  %v1659_v30 = vadd.f32 %v1658_v62, %v1489_v43  ;;  %v458_v43 = vld [vmem:[%s6482_s2 + $0x6b8] sm:$0xff] }
 0x214   : > { %v1994_v42 = vadd.f32 %v1993_v28, %v1825_v26  ;;  %1528 = vmatmul.bf16.gmra.mxu0 %v7161_v41  ;;  %v454_v28 = vld [vmem:[%s6482_s2 + $0x698] sm:$0xff] }
 0x215   : > { %1697 = vmatmul.bf16.gmra.mxu1 %v7163_v29  ;;  %v7189_v29 = vpack.c.bf16 %v458_v43, %v454_v28 }
 0x216   : > { %4235 = vst [vmem:[%s6766_s12 + $0x420] sm:$0xff] %v1994_v42  ;;  %1866 = vmatmul.bf16.gmra.mxu2 %v7165_v33  ;;  %v455_v42 = vld [vmem:[%s6482_s2 + $0x6a0] sm:$0xff] }
 0x217   : > { %8367 = vst [vmem:[#allocation84_spill] sm:$0xff] %v7189_v29 }
 0x218   : > { %2035 = vmatmul.bf16.gmra.mxu3 %v7167_v35  ;;  %v7183_v35 = vpack.c.bf16 %v455_v42, %v451_v27  ;;  %v5423_v27 = vld [vmem:[%s6489_s4 + $0x108] sm:$0xf]  ;;  %v5843_v42 = vld [vmem:[%s6489_s4 + $0x114] sm:$0xf0] }
 0x219   : > { %v1827_v34 = vpop.f32.mrf.mxu2  ;;  %v1491_v26 = vpop.f32.mrf.mxu0 }
 0x21a   : > { %v1828_v40 = vadd.f32 %v1827_v34, %v1659_v30  ;;  %v1660_v61 = vpop.f32.mrf.mxu1  ;;  %8364 = vst [vmem:[#allocation81_spill] sm:$0xff] %v7183_v35 }
 0x21b   : > { %v1996_v32 = vpop.f32.mrf.mxu3  ;;  %v1661_v17 = vadd.f32 %v1660_v61, %v1491_v26 }
 0x21c   : > { %v1997_v24 = vadd.f32 %v1996_v32, %v1828_v40  ;;  %v7185_v32 = vpack.c.bf16 %v456_v44, %v452_v11  ;;  %v5841_v11 = vld [vmem:[%s6489_s4 + $0x10c] sm:$0xf]  ;;  %v5424_v44 = vor.u32 %v5843_v42, %v5423_v27  ;;  %v461_v42 = vld [vmem:[%s6482_s2 + $0x6d0] sm:$0xff] }
 0x21d   : > { %v464_v27 = vld [vmem:[%s6482_s2 + $0x6e8] sm:$0xff] }
 0x21e   : > { %4239 = vst [vmem:[%s6766_s12 + $0x440] sm:$0xff] %v1997_v24  ;;  %v7187_v24 = vpack.c.bf16 %v457_v31, %v453_v60  ;;  %v5425_v60 = vld [vmem:[%s6489_s4 + $0x118] sm:$0xf0]  ;;  %2416 = vmatpush.bf16.xpose.msrb.mxu2 %v5424_v44 }
 0x21f   : > { %8365 = vst [vmem:[#allocation82_spill] sm:$0xff] %v7185_v32  ;;  %v466_v44 = vld [vmem:[%s6482_s2 + $0x6f8] sm:$0xff] }
 0x220   : > { %8366 = vst [vmem:[#allocation83_spill] sm:$0xff] %v7187_v24 }
 0x221   : > { %v1829_v62 = vpop.f32.mrf.mxu2  ;;  %v1494_v40 = vpop.f32.mrf.mxu0 }
 0x222   : > { %v1830_v30 = vadd.f32 %v1829_v62, %v1661_v17  ;;  %v1663_v33 = vpop.f32.mrf.mxu1 }
 0x223   : > { %v1998_v34 = vpop.f32.mrf.mxu3  ;;  %v1664_v61 = vadd.f32 %v1663_v33, %v1494_v40  ;;  %v5428_v33 = vor.u32 %v5841_v11, %v5425_v60  ;;  %v463_v40 = vld [vmem:[%s6482_s2 + $0x6e0] sm:$0xff]  ;;  %v5842_v11 = vld [vmem:[%s6489_s4 + $0x10c] sm:$0xf0] }
 0x224   : > { %v1999_v26 = vadd.f32 %v1998_v34, %v1830_v30  ;;  %1533 = vmatmul.bf16.gmra.mxu0 %v7183_v35  ;;  %v459_v34 = vld [vmem:[%s6482_s2 + $0x6c0] sm:$0xff]  ;;  %v465_v60 = vld [vmem:[%s6482_s2 + $0x6f0] sm:$0xff]  ;;  %v462_v35 = vld [vmem:[%s6482_s2 + $0x6d8] sm:$0xff] }
 0x225   : > { %1702 = vmatmul.bf16.gmra.mxu1 %v7185_v32  ;;  %2585 = vmatpush.bf16.xpose.msrb.mxu3 %v5428_v33  ;;  %v7213_v9 = vpack.c.bf16 %v463_v40, %v459_v34  ;;  %v7217_v45 = vpack.c.bf16 %v465_v60, %v461_v42  ;;  %v471_v42 = vld [vmem:[%s6482_s2 + $0x720] sm:$0xff]  ;;  %v469_v60 = vld [vmem:[%s6482_s2 + $0x710] sm:$0xff] }
 0x226   : > { %4243 = vst [vmem:[%s6766_s12 + $0x460] sm:$0xff] %v1999_v26  ;;  %1871 = vmatmul.bf16.gmra.mxu2 %v7187_v24  ;;  %v460_v26 = vld [vmem:[%s6482_s2 + $0x6c8] sm:$0xff]  ;;  %v5417_v24 = vld [vmem:[%s6489_s4 + $0x110] sm:$0xf0] }
 0x227   : > { %8368 = vst [vmem:[#allocation85_spill] sm:$0xff] %v7213_v9 }
 0x228   : > { %2040 = vmatmul.bf16.gmra.mxu3 %v7189_v29  ;;  %v5415_v29 = vld [vmem:[%s6489_s4 + $0x100] sm:$0xf]  ;;  %8370 = vst [vmem:[#allocation87_spill] sm:$0xff] %v7217_v45 }
 0x229   : > { %v1832_v31 = vpop.f32.mrf.mxu2  ;;  %v1496_v43 = vpop.f32.mrf.mxu0 }
 0x22a   : > { %v1833_v17 = vadd.f32 %v1832_v31, %v1664_v61  ;;  %v1665_v62 = vpop.f32.mrf.mxu1  ;;  %v5416_v61 = vor.u32 %v5842_v11, %v5415_v29  ;;  %v5840_v31 = vld [vmem:[%s6489_s4 + $0x104] sm:$0xf]  ;;  %v468_v11 = vld [vmem:[%s6482_s2 + $0x708] sm:$0xff] }
 0x22b   : > { %v2001_v28 = vpop.f32.mrf.mxu3  ;;  %v1666_v32 = vadd.f32 %v1665_v62, %v1496_v43  ;;  %v5420_v41 = vor.u32 %v5840_v31, %v5417_v24  ;;  %v7219_v43 = vpack.c.bf16 %v466_v44, %v462_v35  ;;  %v470_v44 = vld [vmem:[%s6482_s2 + $0x718] sm:$0xff] }
 0x22c   : > { %v2002_v30 = vadd.f32 %v2001_v28, %v1833_v17  ;;  %2078 = vmatpush.bf16.xpose.msrb.mxu0 %v5416_v61  ;;  %v473_v61 = vld [vmem:[%s6482_s2 + $0x730] sm:$0xff] }
 0x22d   : > { %2247 = vmatpush.bf16.xpose.msrb.mxu1 %v5420_v41  ;;  %8371 = vst [vmem:[#allocation88_spill] sm:$0xff] %v7219_v43 }
 0x22e   : > { %4247 = vst [vmem:[%s6766_s12 + $0x480] sm:$0xff] %v2002_v30  ;;  %v7215_v30 = vpack.c.bf16 %v464_v27, %v460_v26  ;;  %v467_v27 = vld [vmem:[%s6482_s2 + $0x700] sm:$0xff] }
 0x230   : > { %8369 = vst [vmem:[#allocation86_spill] sm:$0xff] %v7215_v30 }
 0x231   : > { %v1834_v33 = vpop.f32.mrf.mxu2  ;;  %v1499_v46 = vpop.f32.mrf.mxu0 }
 0x232   : > { %v1835_v17 = vadd.f32 %v1834_v33, %v1666_v32  ;;  %v1668_v29 = vpop.f32.mrf.mxu1  ;;  %v474_v33 = vld [vmem:[%s6482_s2 + $0x738] sm:$0xff] }
 0x233   : > { %v2003_v28 = vpop.f32.mrf.mxu3  ;;  %v1669_v32 = vadd.f32 %v1668_v29, %v1499_v46  ;;  %v472_v46 = vld [vmem:[%s6482_s2 + $0x728] sm:$0xff] }
 0x234   : > { %v2004_v62 = vadd.f32 %v2003_v28, %v1835_v17  ;;  %1538 = vmatmul.bf16.gmra.mxu0 %v7213_v9  ;;  %v7235_v28 = vpack.c.bf16 %v471_v42, %v467_v27 }
 0x235   : > { %1707 = vmatmul.bf16.gmra.mxu1 %v7215_v30 }
 0x236   : > { %4251 = vst [vmem:[%s6766_s12 + $0x4a0] sm:$0xff] %v2004_v62  ;;  %1876 = vmatmul.bf16.gmra.mxu2 %v7217_v45 }
 0x237   : > { %8372 = vst [vmem:[#allocation89_spill] sm:$0xff] %v7235_v28 }
 0x238   : > { %2045 = vmatmul.bf16.gmra.mxu3 %v7219_v43 }
 0x239   : > { %v1837_v41 = vpop.f32.mrf.mxu2  ;;  %v1501_v34 = vpop.f32.mrf.mxu0 }
 0x23a   : > { %v1838_v35 = vadd.f32 %v1837_v41, %v1669_v32  ;;  %v1670_v40 = vpop.f32.mrf.mxu1  ;;  %v7237_v41 = vpack.c.bf16 %v472_v46, %v468_v11 }
 0x23b   : > { %v2006_v24 = vpop.f32.mrf.mxu3  ;;  %v1671_v31 = vadd.f32 %v1670_v40, %v1501_v34 }
 0x23c   : > { %v2007_v26 = vadd.f32 %v2006_v24, %v1838_v35  ;;  %8373 = vst [vmem:[#allocation90_spill] sm:$0xff] %v7237_v41  ;;  %v7239_v35 = vpack.c.bf16 %v473_v61, %v469_v60  ;;  %v475_v61 = vld [vmem:[%s6482_s2 + $0x740] sm:$0xff] }
 0x23e   : > { %4255 = vst [vmem:[%s6766_s12 + $0x4c0] sm:$0xff] %v2007_v26  ;;  %v7241_v26 = vpack.c.bf16 %v474_v33, %v470_v44  ;;  %v480_v44 = vld [vmem:[%s6482_s2 + $0x768] sm:$0xff]  ;;  %v477_v33 = vld [vmem:[%s6482_s2 + $0x750] sm:$0xff] }
 0x23f   : > { %8374 = vst [vmem:[#allocation91_spill] sm:$0xff] %v7239_v35 }
 0x240   : > { %8375 = vst [vmem:[#allocation92_spill] sm:$0xff] %v7241_v26 }
 0x241   : > { %v1839_v17 = vpop.f32.mrf.mxu2  ;;  %v1504_v32 = vpop.f32.mrf.mxu0 }
 0x242   : > { %v1840_v29 = vadd.f32 %v1839_v17, %v1671_v31  ;;  %v1673_v24 = vpop.f32.mrf.mxu1  ;;  %v476_v31 = vld [vmem:[%s6482_s2 + $0x748] sm:$0xff]  ;;  %v481_v17 = vld [vmem:[%s6482_s2 + $0x770] sm:$0xff] }
 0x243   : > { %v2008_v62 = vpop.f32.mrf.mxu3  ;;  %v1674_v34 = vadd.f32 %v1673_v24, %v1504_v32  ;;  %v482_v32 = vld [vmem:[%s6482_s2 + $0x778] sm:$0xff] }
 0x244   : > { %v2009_v43 = vadd.f32 %v2008_v62, %v1840_v29  ;;  %1543 = vmatmul.bf16.gmra.mxu0 %v7235_v28  ;;  %v478_v62 = vld [vmem:[%s6482_s2 + $0x758] sm:$0xff] }
 0x245   : > { %1712 = vmatmul.bf16.gmra.mxu1 %v7237_v41  ;;  %v7259_v41 = vpack.c.bf16 %v480_v44, %v476_v31 }
 0x246   : > { %4259 = vst [vmem:[%s6766_s12 + $0x4e0] sm:$0xff] %v2009_v43  ;;  %1881 = vmatmul.bf16.gmra.mxu2 %v7239_v35  ;;  %v479_v43 = vld [vmem:[%s6482_s2 + $0x760] sm:$0xff] }
 0x247   : > { %8377 = vst [vmem:[#allocation94_spill] sm:$0xff] %v7259_v41 }
 0x248   : > { %2050 = vmatmul.bf16.gmra.mxu3 %v7241_v26  ;;  %v7257_v26 = vpack.c.bf16 %v479_v43, %v475_v61 }
 0x249   : > { %v1842_v40 = vpop.f32.mrf.mxu2  ;;  %v1506_v11 = vpop.f32.mrf.mxu0 }
 0x24a   : > { %v1843_v27 = vadd.f32 %v1842_v40, %v1674_v34  ;;  %v1675_v46 = vpop.f32.mrf.mxu1  ;;  %8376 = vst [vmem:[#allocation93_spill] sm:$0xff] %v7257_v26 }
 0x24b   : > { %v2011_v42 = vpop.f32.mrf.mxu3  ;;  %v1676_v29 = vadd.f32 %v1675_v46, %v1506_v11 }
 0x24c   : > { %v2012_v60 = vadd.f32 %v2011_v42, %v1843_v27  ;;  %v7261_v27 = vpack.c.bf16 %v481_v17, %v477_v33  ;;  %v483_v33 = vld [vmem:[%s6482_s2 + $0x780] sm:$0xff]  ;;  %v484_v17 = vld [vmem:[%s6482_s2 + $0x788] sm:$0xff] }
 0x24e   : > { %4263 = vst [vmem:[%s6766_s12 + $0x500] sm:$0xff] %v2012_v60  ;;  %v7263_v60 = vpack.c.bf16 %v482_v32, %v478_v62  ;;  %v485_v62 = vld [vmem:[%s6482_s2 + $0x790] sm:$0xff] }
 0x24f   : > { %8378 = vst [vmem:[#allocation95_spill] sm:$0xff] %v7261_v27  ;;  %v489_v32 = vld [vmem:[%s6482_s2 + $0x7b0] sm:$0xff] }
 0x250   : > { %8379 = vst [vmem:[#allocation96_spill] sm:$0xff] %v7263_v60 }
 0x251   : > { %v1844_v24 = vpop.f32.mrf.mxu2  ;;  %v1509_v40 = vpop.f32.mrf.mxu0 }
 0x252   : > { %v1845_v35 = vadd.f32 %v1844_v24, %v1676_v29  ;;  %v1678_v42 = vpop.f32.mrf.mxu1  ;;  %v488_v29 = vld [vmem:[%s6482_s2 + $0x7a8] sm:$0xff] }
 0x253   : > { %v2013_v34 = vpop.f32.mrf.mxu3  ;;  %v1679_v11 = vadd.f32 %v1678_v42, %v1509_v40  ;;  %v490_v40 = vld [vmem:[%s6482_s2 + $0x7b8] sm:$0xff] }
 0x254   : > { %v2014_v28 = vadd.f32 %v2013_v34, %v1845_v35  ;;  %1548 = vmatmul.bf16.gmra.mxu0 %v7257_v26  ;;  %v486_v34 = vld [vmem:[%s6482_s2 + $0x798] sm:$0xff] }
 0x255   : > { %1717 = vmatmul.bf16.gmra.mxu1 %v7259_v41  ;;  %v7285_v41 = vpack.c.bf16 %v490_v40, %v486_v34 }
 0x256   : > { %4267 = vst [vmem:[%s6766_s12 + $0x520] sm:$0xff] %v2014_v28  ;;  %1886 = vmatmul.bf16.gmra.mxu2 %v7261_v27  ;;  %v487_v28 = vld [vmem:[%s6482_s2 + $0x7a0] sm:$0xff] }
 0x257   : > { %8383 = vst [vmem:[#allocation100_spill] sm:$0xff] %v7285_v41 }
 0x258   : > { %2055 = vmatmul.bf16.gmra.mxu3 %v7263_v60  ;;  %v7279_v60 = vpack.c.bf16 %v487_v28, %v483_v33  ;;  %v5663_v33 = vld [vmem:[%s6489_s4 + $0x2e8] sm:$0xf]  ;;  %v5903_v28 = vld [vmem:[%s6489_s4 + $0x2f4] sm:$0xf0] }
 0x259   : > { %v1847_v46 = vpop.f32.mrf.mxu2  ;;  %v1511_v35 = vpop.f32.mrf.mxu0 }
 0x25a   : > { %v1848_v61 = vadd.f32 %v1847_v46, %v1679_v11  ;;  %v1680_v31 = vpop.f32.mrf.mxu1  ;;  %8380 = vst [vmem:[#allocation97_spill] sm:$0xff] %v7279_v60 }
 0x25b   : > { %v2016_v43 = vpop.f32.mrf.mxu3  ;;  %v1681_v24 = vadd.f32 %v1680_v31, %v1511_v35 }
 0x25c   : > { %v2017_v44 = vadd.f32 %v2016_v43, %v1848_v61  ;;  %v7281_v43 = vpack.c.bf16 %v488_v29, %v484_v17  ;;  %v5901_v17 = vld [vmem:[%s6489_s4 + $0x2ec] sm:$0xf]  ;;  %v5664_v29 = vor.u32 %v5903_v28, %v5663_v33  ;;  %v493_v28 = vld [vmem:[%s6482_s2 + $0x7d0] sm:$0xff] }
 0x25d   : > { %v496_v33 = vld [vmem:[%s6482_s2 + $0x7e8] sm:$0xff] }
 0x25e   : > { %4271 = vst [vmem:[%s6766_s12 + $0x540] sm:$0xff] %v2017_v44  ;;  %v7283_v44 = vpack.c.bf16 %v489_v32, %v485_v62  ;;  %v5665_v62 = vld [vmem:[%s6489_s4 + $0x2f8] sm:$0xf0]  ;;  %3085 = vmatpush.bf16.xpose.msra.mxu2 %v5664_v29 }
 0x25f   : > { %8381 = vst [vmem:[#allocation98_spill] sm:$0xff] %v7281_v43  ;;  %v498_v29 = vld [vmem:[%s6482_s2 + $0x7f8] sm:$0xff] }
 0x260   : > { %8382 = vst [vmem:[#allocation99_spill] sm:$0xff] %v7283_v44 }
 0x261   : > { %v1849_v42 = vpop.f32.mrf.mxu2  ;;  %v1514_v61 = vpop.f32.mrf.mxu0 }
 0x262   : > { %v1850_v11 = vadd.f32 %v1849_v42, %v1681_v24  ;;  %v1683_v27 = vpop.f32.mrf.mxu1 }
 0x263   : > { %v2018_v46 = vpop.f32.mrf.mxu3  ;;  %v1684_v31 = vadd.f32 %v1683_v27, %v1514_v61  ;;  %v5668_v27 = vor.u32 %v5901_v17, %v5665_v62  ;;  %v495_v61 = vld [vmem:[%s6482_s2 + $0x7e0] sm:$0xff]  ;;  %v5902_v17 = vld [vmem:[%s6489_s4 + $0x2ec] sm:$0xf0] }
 0x264   : > { %v2019_v35 = vadd.f32 %v2018_v46, %v1850_v11  ;;  %1553 = vmatmul.bf16.gmra.mxu0 %v7279_v60  ;;  %v491_v46 = vld [vmem:[%s6482_s2 + $0x7c0] sm:$0xff]  ;;  %v497_v62 = vld [vmem:[%s6482_s2 + $0x7f0] sm:$0xff]  ;;  %v494_v60 = vld [vmem:[%s6482_s2 + $0x7d8] sm:$0xff] }
 0x265   : > { %1722 = vmatmul.bf16.gmra.mxu1 %v7281_v43  ;;  %3254 = vmatpush.bf16.xpose.msra.mxu3 %v5668_v27  ;;  %v7309_v45 = vpack.c.bf16 %v495_v61, %v491_v46  ;;  %v7313_v9 = vpack.c.bf16 %v497_v62, %v493_v28 }
 0x266   : > { %4275 = vst [vmem:[%s6766_s12 + $0x560] sm:$0xff] %v2019_v35  ;;  %1891 = vmatmul.bf16.gmra.mxu2 %v7283_v44  ;;  %v492_v35 = vld [vmem:[%s6482_s2 + $0x7c8] sm:$0xff]  ;;  %v5657_v44 = vld [vmem:[%s6489_s4 + $0x2f0] sm:$0xf0]  ;;  %s5147_s2 = sshll.u32 %s6766_s12, 4  ;;  %s5148_s2 = int_to_ptr.vmem [resolvable:$true] %s5147_s2 }
 0x268   : > { %2060 = vmatmul.bf16.gmra.mxu3 %v7285_v41  ;;  %v5655_v41 = vld [vmem:[%s6489_s4 + $0x2e0] sm:$0xf] }
 0x269   : > { %v1852_v32 = vpop.f32.mrf.mxu2  ;;  %v1516_v40 = vpop.f32.mrf.mxu0 }
 0x26a   : > { %v1853_v24 = vadd.f32 %v1852_v32, %v1684_v31  ;;  %v1685_v42 = vpop.f32.mrf.mxu1  ;;  %v5656_v31 = vor.u32 %v5902_v17, %v5655_v41  ;;  %v5900_v32 = vld [vmem:[%s6489_s4 + $0x2e4] sm:$0xf]  ;;  %v7315_v17 = vpack.c.bf16 %v498_v29, %v494_v60 }
 0x26b   : > { %v2021_v34 = vpop.f32.mrf.mxu3  ;;  %v1686_v43 = vadd.f32 %v1685_v42, %v1516_v40  ;;  %v5660_v26 = vor.u32 %v5900_v32, %v5657_v44 }
 0x26c   : > { %v2022_v11 = vadd.f32 %v2021_v34, %v1853_v24  ;;  %2747 = vmatpush.bf16.xpose.msra.mxu0 %v5656_v31 }
 0x26d   : > { %2916 = vmatpush.bf16.xpose.msra.mxu1 %v5660_v26 }
 0x26e   : > { %4279 = vst [vmem:[%s6766_s12 + $0x580] sm:$0xff] %v2022_v11  ;;  %v7311_v11 = vpack.c.bf16 %v496_v33, %v492_v35 }
 0x271   : > { %v1854_v27 = vpop.f32.mrf.mxu2  ;;  %v1519_v30 = vpop.f32.mrf.mxu0 }
 0x272   : > { %v1855_v24 = vadd.f32 %v1854_v27, %v1686_v43  ;;  %v1688_v41 = vpop.f32.mrf.mxu1 }
 0x273   : > { %v2023_v34 = vpop.f32.mrf.mxu3  ;;  %v1689_v44 = vadd.f32 %v1688_v41, %v1519_v30 }
 0x274   : > { %v2024_v40 = vadd.f32 %v2023_v34, %v1855_v24  ;;  %1558 = vmatmul.bf16.gmra.mxu0 %v7309_v45 }
 0x275   : > { %1727 = vmatmul.bf16.gmra.mxu1 %v7311_v11 }
 0x276   : > { %4283 = vst [vmem:[%s6766_s12 + $0x5a0] sm:$0xff] %v2024_v40  ;;  %1896 = vmatmul.bf16.gmra.mxu2 %v7313_v9 }
 0x278   : > { %2065 = vmatmul.bf16.gmra.mxu3 %v7315_v17 }
 0x279   : > { %v1857_v43 = vpop.f32.mrf.mxu2  ;;  %v1521_v26 = vpop.f32.mrf.mxu0 }
 0x27a   : > { %v1858_v42 = vadd.f32 %v1857_v43, %v1689_v44  ;;  %v1690_v61 = vpop.f32.mrf.mxu1 }
 0x27b   : > { %v2026_v46 = vpop.f32.mrf.mxu3  ;;  %v1691_v60 = vadd.f32 %v1690_v61, %v1521_v26 }
 0x27c   : > { %v2027_v35 = vadd.f32 %v2026_v46, %v1858_v42 }
 0x27e   : > { %4287 = vst [vmem:[%s6766_s12 + $0x5c0] sm:$0xff] %v2027_v35 }
 0x281   : > { %v1859_v33 = vpop.f32.mrf.mxu2  ;;  %v1524_v30 = vpop.f32.mrf.mxu0 }
 0x282   : > { %v1860_v28 = vadd.f32 %v1859_v33, %v1691_v60  ;;  %v1693_v31 = vpop.f32.mrf.mxu1 }
 0x283   : > { %v2028_v62 = vpop.f32.mrf.mxu3  ;;  %v1694_v29 = vadd.f32 %v1693_v31, %v1524_v30 }
 0x284   : > { %v2029_v32 = vadd.f32 %v2028_v62, %v1860_v28  ;;  %2079 = vmatmul.bf16.vlgmr.msrb.gmra.mxu0 %v6575_v52 }
 0x285   : > { %2248 = vmatmul.bf16.vlgmr.msrb.gmra.mxu1 %v6577_v53 }
 0x286   : > { %4291 = vst [vmem:[%s6766_s12 + $0x5e0] sm:$0xff] %v2029_v32  ;;  %2417 = vmatmul.bf16.vlgmr.msrb.gmra.mxu2 %v6579_v54 }
 0x288   : > { %2586 = vmatmul.bf16.vlgmr.msrb.gmra.mxu3 %v6581_v55 }
 0x289   : > { %v1862_v27 = vpop.f32.mrf.mxu2  ;;  %v1526_v41 = vpop.f32.mrf.mxu0 }
 0x28a   : > { %v1863_v24 = vadd.f32 %v1862_v27, %v1694_v29  ;;  %v1695_v40 = vpop.f32.mrf.mxu1 }
 0x28b   : > { %v2031_v34 = vpop.f32.mrf.mxu3  ;;  %v1696_v43 = vadd.f32 %v1695_v40, %v1526_v41 }
 0x28c   : > { %v2032_v44 = vadd.f32 %v2031_v34, %v1863_v24 }
 0x28e   : > { %4295 = vst [vmem:[%s6766_s12 + $0x600] sm:$0xff] %v2032_v44 }
 0x291   : > { %v1864_v42 = vpop.f32.mrf.mxu2  ;;  %v1529_v61 = vpop.f32.mrf.mxu0 }
 0x292   : > { %v1865_v46 = vadd.f32 %v1864_v42, %v1696_v43  ;;  %v1698_v35 = vpop.f32.mrf.mxu1 }
 0x293   : > { %v2033_v26 = vpop.f32.mrf.mxu3  ;;  %v1699_v33 = vadd.f32 %v1698_v35, %v1529_v61  ;;  %v5897_v61 = vld [vmem:[%s6489_s4 + $0x2cc] sm:$0xf] }
 0x294   : > { %v2034_v60 = vadd.f32 %v2033_v26, %v1865_v46  ;;  %2084 = vmatmul.bf16.gmra.mxu0 %v6595_v0  ;;  %v5647_v46 = vld [vmem:[%s6489_s4 + $0x2c8] sm:$0xf]  ;;  %v5899_v26 = vld [vmem:[%s6489_s4 + $0x2d4] sm:$0xf0] }
 0x295   : > { %2253 = vmatmul.bf16.gmra.mxu1 %v6597_v1  ;;  %v5648_v35 = vor.u32 %v5899_v26, %v5647_v46 }
 0x296   : > { %4299 = vst [vmem:[%s6766_s12 + $0x620] sm:$0xff] %v2034_v60  ;;  %2422 = vmatmul.bf16.gmra.mxu2 %v6599_v2  ;;  %v5649_v60 = vld [vmem:[%s6489_s4 + $0x2d8] sm:$0xf0] }
 0x297   : > { %3086 = vmatpush.bf16.xpose.msra.mxu2 %v5648_v35 }
 0x298   : > { %2591 = vmatmul.bf16.gmra.mxu3 %v6601_v3 }
 0x299   : > { %v1867_v28 = vpop.f32.mrf.mxu2  ;;  %v1531_v31 = vpop.f32.mrf.mxu0 }
 0x29a   : > { %v1868_v62 = vadd.f32 %v1867_v28, %v1699_v33  ;;  %v1700_v32 = vpop.f32.mrf.mxu1  ;;  %v5652_v28 = vor.u32 %v5897_v61, %v5649_v60 }
 0x29b   : > { %v2036_v30 = vpop.f32.mrf.mxu3  ;;  %v1701_v27 = vadd.f32 %v1700_v32, %v1531_v31 }
 0x29c   : > { %v2037_v29 = vadd.f32 %v2036_v30, %v1868_v62  ;;  %3255 = vmatpush.bf16.xpose.msra.mxu3 %v5652_v28 }
 0x29e   : > { %4303 = vst [vmem:[%s6766_s12 + $0x640] sm:$0xff] %v2037_v29 }
 0x2a1   : > { %v1869_v24 = vpop.f32.mrf.mxu2  ;;  %v1534_v40 = vpop.f32.mrf.mxu0 }
 0x2a2   : > { %v1870_v34 = vadd.f32 %v1869_v24, %v1701_v27  ;;  %v1703_v44 = vpop.f32.mrf.mxu1  ;;  %v5639_v27 = vld [vmem:[%s6489_s4 + $0x2c0] sm:$0xf]  ;;  %v5898_v24 = vld [vmem:[%s6489_s4 + $0x2cc] sm:$0xf0] }
 0x2a3   : > { %v2038_v41 = vpop.f32.mrf.mxu3  ;;  %v1704_v42 = vadd.f32 %v1703_v44, %v1534_v40  ;;  %v5641_v40 = vld [vmem:[%s6489_s4 + $0x2d0] sm:$0xf0] }
 0x2a4   : > { %v2039_v43 = vadd.f32 %v2038_v41, %v1870_v34  ;;  %2089 = vmatmul.bf16.gmra.mxu0 %v6615_v12  ;;  %v5640_v34 = vor.u32 %v5898_v24, %v5639_v27  ;;  %v5896_v41 = vld [vmem:[%s6489_s4 + $0x2c4] sm:$0xf] }
 0x2a5   : > { %2258 = vmatmul.bf16.gmra.mxu1 %v6617_v13 }
 0x2a6   : > { %4307 = vst [vmem:[%s6766_s12 + $0x660] sm:$0xff] %v2039_v43  ;;  %2427 = vmatmul.bf16.gmra.mxu2 %v6619_v14  ;;  %v5644_v43 = vor.u32 %v5896_v41, %v5641_v40  ;;  %2748 = vmatpush.bf16.xpose.msra.mxu0 %v5640_v34 }
 0x2a8   : > { %2596 = vmatmul.bf16.gmra.mxu3 %v6621_v15  ;;  %2917 = vmatpush.bf16.xpose.msra.mxu1 %v5644_v43 }
 0x2a9   : > { %v1872_v33 = vpop.f32.mrf.mxu2  ;;  %v1536_v31 = vpop.f32.mrf.mxu0 }
 0x2aa   : > { %v1873_v62 = vadd.f32 %v1872_v33, %v1704_v42  ;;  %v1705_v32 = vpop.f32.mrf.mxu1 }
 0x2ab   : > { %v2041_v30 = vpop.f32.mrf.mxu3  ;;  %v1706_v44 = vadd.f32 %v1705_v32, %v1536_v31 }
 0x2ac   : > { %v2042_v29 = vadd.f32 %v2041_v30, %v1873_v62 }
 0x2ae   : > { %4311 = vst [vmem:[%s6766_s12 + $0x680] sm:$0xff] %v2042_v29 }
 0x2b1   : > { %v1874_v46 = vpop.f32.mrf.mxu2  ;;  %v1539_v42 = vpop.f32.mrf.mxu0 }
 0x2b2   : > { %v1875_v26 = vadd.f32 %v1874_v46, %v1706_v44  ;;  %v1708_v35 = vpop.f32.mrf.mxu1 }
 0x2b3   : > { %v2043_v61 = vpop.f32.mrf.mxu3  ;;  %v1709_v33 = vadd.f32 %v1708_v35, %v1539_v42 }
 0x2b4   : > { %v2044_v60 = vadd.f32 %v2043_v61, %v1875_v26  ;;  %2094 = vmatmul.bf16.gmra.mxu0 %v6643_v36 }
 0x2b5   : > { %2263 = vmatmul.bf16.gmra.mxu1 %v6645_v37 }
 0x2b6   : > { %4315 = vst [vmem:[%s6766_s12 + $0x6a0] sm:$0xff] %v2044_v60  ;;  %2432 = vmatmul.bf16.gmra.mxu2 %v6647_v38 }
 0x2b8   : > { %2601 = vmatmul.bf16.gmra.mxu3 %v6649_v39 }
 0x2b9   : > { %v1877_v28 = vpop.f32.mrf.mxu2  ;;  %v1541_v31 = vpop.f32.mrf.mxu0 }
 0x2ba   : > { %v1878_v62 = vadd.f32 %v1877_v28, %v1709_v33  ;;  %v1710_v32 = vpop.f32.mrf.mxu1 }
 0x2bb   : > { %v2046_v30 = vpop.f32.mrf.mxu3  ;;  %v1711_v27 = vadd.f32 %v1710_v32, %v1541_v31 }
 0x2bc   : > { %v2047_v29 = vadd.f32 %v2046_v30, %v1878_v62 }
 0x2be   : > { %4319 = vst [vmem:[%s6766_s12 + $0x6c0] sm:$0xff] %v2047_v29 }
 0x2c1   : > { %v1879_v24 = vpop.f32.mrf.mxu2  ;;  %v1544_v40 = vpop.f32.mrf.mxu0 }
 0x2c2   : > { %v1880_v34 = vadd.f32 %v1879_v24, %v1711_v27  ;;  %v1713_v44 = vpop.f32.mrf.mxu1 }
 0x2c3   : > { %v2048_v41 = vpop.f32.mrf.mxu3  ;;  %v1714_v46 = vadd.f32 %v1713_v44, %v1544_v40 }
 0x2c4   : > { %v2049_v43 = vadd.f32 %v2048_v41, %v1880_v34  ;;  %2099 = vmatmul.bf16.gmra.mxu0 %v6663_v48 }
 0x2c5   : > { %2268 = vmatmul.bf16.gmra.mxu1 %v6665_v49 }
 0x2c6   : > { %4323 = vst [vmem:[%s6766_s12 + $0x6e0] sm:$0xff] %v2049_v43  ;;  %2437 = vmatmul.bf16.gmra.mxu2 %v6667_v50 }
 0x2c8   : > { %2606 = vmatmul.bf16.gmra.mxu3 %v6669_v51 }
 0x2c9   : > { %v1882_v26 = vpop.f32.mrf.mxu2  ;;  %v1546_v35 = vpop.f32.mrf.mxu0 }
 0x2ca   : > { %v1883_v61 = vadd.f32 %v1882_v26, %v1714_v46  ;;  %v1715_v60 = vpop.f32.mrf.mxu1 }
 0x2cb   : > { %v2051_v42 = vpop.f32.mrf.mxu3  ;;  %v1716_v28 = vadd.f32 %v1715_v60, %v1546_v35 }
 0x2cc   : > { %v2052_v33 = vadd.f32 %v2051_v42, %v1883_v61 }
 0x2ce   : > { %4327 = vst [vmem:[%s6766_s12 + $0x700] sm:$0xff] %v2052_v33 }
 0x2d1   : > { %v1884_v62 = vpop.f32.mrf.mxu2  ;;  %v1549_v32 = vpop.f32.mrf.mxu0 }
 0x2d2   : > { %v1885_v30 = vadd.f32 %v1884_v62, %v1716_v28  ;;  %v1718_v29 = vpop.f32.mrf.mxu1 }
 0x2d3   : > { %v2053_v31 = vpop.f32.mrf.mxu3  ;;  %v1719_v24 = vadd.f32 %v1718_v29, %v1549_v32  ;;  %v5893_v32 = vld [vmem:[%s6489_s4 + $0x2ac] sm:$0xf] }
 0x2d4   : > { %v2054_v27 = vadd.f32 %v2053_v31, %v1885_v30  ;;  %2104 = vmatmul.bf16.gmra.mxu0 %v6683_v4  ;;  %v5631_v30 = vld [vmem:[%s6489_s4 + $0x2a8] sm:$0xf]  ;;  %v5895_v31 = vld [vmem:[%s6489_s4 + $0x2b4] sm:$0xf0] }
 0x2d5   : > { %2273 = vmatmul.bf16.gmra.mxu1 %v6685_v5  ;;  %v5632_v29 = vor.u32 %v5895_v31, %v5631_v30 }
 0x2d6   : > { %4331 = vst [vmem:[%s6766_s12 + $0x720] sm:$0xff] %v2054_v27  ;;  %2442 = vmatmul.bf16.gmra.mxu2 %v6687_v6  ;;  %v5633_v27 = vld [vmem:[%s6489_s4 + $0x2b8] sm:$0xf0] }
 0x2d7   : > { %3087 = vmatpush.bf16.xpose.msra.mxu2 %v5632_v29 }
 0x2d8   : > { %2611 = vmatmul.bf16.gmra.mxu3 %v6689_v7 }
 0x2d9   : > { %v1887_v34 = vpop.f32.mrf.mxu2  ;;  %v1551_v44 = vpop.f32.mrf.mxu0 }
 0x2da   : > { %v1888_v41 = vadd.f32 %v1887_v34, %v1719_v24  ;;  %v1720_v43 = vpop.f32.mrf.mxu1  ;;  %v5636_v34 = vor.u32 %v5893_v32, %v5633_v27 }
 0x2db   : > { %v2056_v40 = vpop.f32.mrf.mxu3  ;;  %v1721_v26 = vadd.f32 %v1720_v43, %v1551_v44 }
 0x2dc   : > { %v2057_v46 = vadd.f32 %v2056_v40, %v1888_v41  ;;  %3256 = vmatpush.bf16.xpose.msra.mxu3 %v5636_v34 }
 0x2de   : > { %4335 = vst [vmem:[%s6766_s12 + $0x740] sm:$0xff] %v2057_v46 }
 0x2e1   : > { %v1889_v61 = vpop.f32.mrf.mxu2  ;;  %v1554_v60 = vpop.f32.mrf.mxu0 }
 0x2e2   : > { %v1890_v42 = vadd.f32 %v1889_v61, %v1721_v26  ;;  %v1723_v33 = vpop.f32.mrf.mxu1  ;;  %v5623_v26 = vld [vmem:[%s6489_s4 + $0x2a0] sm:$0xf]  ;;  %v5894_v61 = vld [vmem:[%s6489_s4 + $0x2ac] sm:$0xf0] }
 0x2e3   : > { %v2058_v35 = vpop.f32.mrf.mxu3  ;;  %v1724_v62 = vadd.f32 %v1723_v33, %v1554_v60  ;;  %v5625_v60 = vld [vmem:[%s6489_s4 + $0x2b0] sm:$0xf0] }
 0x2e4   : > { %v2059_v28 = vadd.f32 %v2058_v35, %v1890_v42  ;;  %2109 = vmatmul.bf16.gmra.mxu0 %v6703_v20  ;;  %v5624_v42 = vor.u32 %v5894_v61, %v5623_v26  ;;  %v5892_v35 = vld [vmem:[%s6489_s4 + $0x2a4] sm:$0xf] }
 0x2e5   : > { %2278 = vmatmul.bf16.gmra.mxu1 %v6705_v21 }
 0x2e6   : > { %4339 = vst [vmem:[%s6766_s12 + $0x760] sm:$0xff] %v2059_v28  ;;  %2447 = vmatmul.bf16.gmra.mxu2 %v6707_v22  ;;  %v5628_v28 = vor.u32 %v5892_v35, %v5625_v60  ;;  %2749 = vmatpush.bf16.xpose.msra.mxu0 %v5624_v42 }
 0x2e8   : > { %2616 = vmatmul.bf16.gmra.mxu3 %v6709_v23  ;;  %2918 = vmatpush.bf16.xpose.msra.mxu1 %v5628_v28 }
 0x2e9   : > { %v1892_v24 = vpop.f32.mrf.mxu2  ;;  %v1556_v44 = vpop.f32.mrf.mxu0 }
 0x2ea   : > { %v1893_v41 = vadd.f32 %v1892_v24, %v1724_v62  ;;  %v1725_v43 = vpop.f32.mrf.mxu1 }
 0x2eb   : > { %v2061_v40 = vpop.f32.mrf.mxu3  ;;  %v1726_v33 = vadd.f32 %v1725_v43, %v1556_v44 }
 0x2ec   : > { %v2062_v46 = vadd.f32 %v2061_v40, %v1893_v41 }
 0x2ee   : > { %4343 = vst [vmem:[%s6766_s12 + $0x780] sm:$0xff] %v2062_v46 }
 0x2f1   : > { %v1894_v30 = vpop.f32.mrf.mxu2  ;;  %v1559_v62 = vpop.f32.mrf.mxu0 }
 0x2f2   : > { %v1895_v31 = vadd.f32 %v1894_v30, %v1726_v33  ;;  %v1728_v29 = vpop.f32.mrf.mxu1 }
 0x2f3   : > { %v2063_v32 = vpop.f32.mrf.mxu3  ;;  %v1729_v24 = vadd.f32 %v1728_v29, %v1559_v62 }
 0x2f4   : > { %v2064_v27 = vadd.f32 %v2063_v32, %v1895_v31  ;;  %2114 = vmatmul.bf16.gmra.mxu0 %v6731_v56 }
 0x2f5   : > { %2283 = vmatmul.bf16.gmra.mxu1 %v6733_v57 }
 0x2f6   : > { %4347 = vst [vmem:[%s6766_s12 + $0x7a0] sm:$0xff] %v2064_v27  ;;  %2452 = vmatmul.bf16.gmra.mxu2 %v6735_v58 }
 0x2f8   : > { %2621 = vmatmul.bf16.gmra.mxu3 %v6737_v59 }
 0x2f9   : > { %v1897_v34 = vpop.f32.mrf.mxu2  ;;  %v1561_v44 = vpop.f32.mrf.mxu0 }
 0x2fa   : > { %v1898_v41 = vadd.f32 %v1897_v34, %v1729_v24  ;;  %v1730_v43 = vpop.f32.mrf.mxu1 }
 0x2fb   : > { %v2066_v40 = vpop.f32.mrf.mxu3  ;;  %v1731_v26 = vadd.f32 %v1730_v43, %v1561_v44 }
 0x2fc   : > { %v2067_v46 = vadd.f32 %v2066_v40, %v1898_v41 }
 0x2fe   : > { %4351 = vst [vmem:[%s6766_s12 + $0x7c0] sm:$0xff] %v2067_v46 }
 0x301   : > { %v1899_v61 = vpop.f32.mrf.mxu2  ;;  %v2080_v60 = vpop.f32.mrf.mxu0 }
 0x302   : > { %v1900_v42 = vadd.f32 %v1899_v61, %v1731_v26  ;;  %v2249_v33 = vpop.f32.mrf.mxu1 }
 0x303   : > { %v2068_v35 = vpop.f32.mrf.mxu3  ;;  %v2250_v30 = vadd.f32 %v2249_v33, %v2080_v60 }
 0x304   : > { %v2069_v28 = vadd.f32 %v2068_v35, %v1900_v42  ;;  %2119 = vmatmul.bf16.gmra.mxu0 %v6751_v16 }
 0x305   : > { %2288 = vmatmul.bf16.gmra.mxu1 %v6753_v18 }
 0x306   : > { %4355 = vst [vmem:[%s6766_s12 + $0x7e0] sm:$0xff] %v2069_v28  ;;  %2457 = vmatmul.bf16.gmra.mxu2 %v6755_v19 }
 0x308   : > { %2626 = vmatmul.bf16.gmra.mxu3 %v6757_v25 }
 0x309   : > { %v2418_v31 = vpop.f32.mrf.mxu2  ;;  %v2082_v29 = vpop.f32.mrf.mxu0 }
 0x30a   : > { %v2419_v32 = vadd.f32 %v2418_v31, %v2250_v30  ;;  %v2251_v27 = vpop.f32.mrf.mxu1 }
 0x30b   : > { %v2587_v62 = vpop.f32.mrf.mxu3  ;;  %v2252_v34 = vadd.f32 %v2251_v27, %v2082_v29 }
 0x30c   : > { %v2588_v24 = vadd.f32 %v2587_v62, %v2419_v32 }
 0x30e   : > { %4104 = vst [vmem:[%s6766_s12 + $0x8] sm:$0xff] %v2588_v24 }
 0x311   : > { %v2420_v41 = vpop.f32.mrf.mxu2  ;;  %v2085_v43 = vpop.f32.mrf.mxu0 }
 0x312   : > { %v2421_v40 = vadd.f32 %v2420_v41, %v2252_v34  ;;  %v2254_v46 = vpop.f32.mrf.mxu1  ;;  %v8384_v41 = vld [vmem:[#allocation17_spill] sm:$0xff] }
 0x313   : > { %v2589_v44 = vpop.f32.mrf.mxu3  ;;  %v2255_v61 = vadd.f32 %v2254_v46, %v2085_v43  ;;  %v8386_v43 = vld [vmem:[#allocation19_spill] sm:$0xff]  ;;  %v8387_v46 = vld [vmem:[#allocation20_spill] sm:$0xff] }
 0x314   : > { %v2590_v26 = vadd.f32 %v2589_v44, %v2421_v40  ;;  %2124 = vmatmul.bf16.gmra.mxu0 %v6777_v47  ;;  %v8385_v44 = vld [vmem:[#allocation18_spill] sm:$0xff] }
 0x315   : > { %2293 = vmatmul.bf16.gmra.mxu1 %v6779_v63 }
 0x316   : > { %4108 = vst [vmem:[%s6766_s12 + $0x28] sm:$0xff] %v2590_v26  ;;  %2462 = vmatmul.bf16.gmra.mxu2 %v6781_v8  ;;  %v5615_v26 = vld [vmem:[%s6489_s4 + $0x288] sm:$0xf] }
 0x318   : > { %2631 = vmatmul.bf16.gmra.mxu3 %v6783_v10 }
 0x319   : > { %v2423_v42 = vpop.f32.mrf.mxu2  ;;  %v2087_v33 = vpop.f32.mrf.mxu0 }
 0x31a   : > { %v2424_v35 = vadd.f32 %v2423_v42, %v2255_v61  ;;  %v2256_v28 = vpop.f32.mrf.mxu1  ;;  %v5891_v61 = vld [vmem:[%s6489_s4 + $0x294] sm:$0xf0]  ;;  %v5889_v42 = vld [vmem:[%s6489_s4 + $0x28c] sm:$0xf] }
 0x31b   : > { %v2592_v60 = vpop.f32.mrf.mxu3  ;;  %v2257_v31 = vadd.f32 %v2256_v28, %v2087_v33 }
 0x31c   : > { %v2593_v30 = vadd.f32 %v2592_v60, %v2424_v35  ;;  %v5616_v35 = vor.u32 %v5891_v61, %v5615_v26  ;;  %v5617_v60 = vld [vmem:[%s6489_s4 + $0x298] sm:$0xf0] }
 0x31d   : > { %v5620_v28 = vor.u32 %v5889_v42, %v5617_v60 }
 0x31e   : > { %4112 = vst [vmem:[%s6766_s12 + $0x48] sm:$0xff] %v2593_v30  ;;  %3088 = vmatpush.bf16.xpose.msra.mxu2 %v5616_v35 }
 0x31f   : > { %3257 = vmatpush.bf16.xpose.msra.mxu3 %v5620_v28 }
 0x321   : > { %v2425_v32 = vpop.f32.mrf.mxu2  ;;  %v2090_v27 = vpop.f32.mrf.mxu0 }
 0x322   : > { %v2426_v62 = vadd.f32 %v2425_v32, %v2257_v31  ;;  %v2259_v24 = vpop.f32.mrf.mxu1 }
 0x323   : > { %v2594_v29 = vpop.f32.mrf.mxu3  ;;  %v2260_v40 = vadd.f32 %v2259_v24, %v2090_v27  ;;  %v5607_v27 = vld [vmem:[%s6489_s4 + $0x280] sm:$0xf]  ;;  %v5890_v24 = vld [vmem:[%s6489_s4 + $0x28c] sm:$0xf0] }
 0x324   : > { %v2595_v34 = vadd.f32 %v2594_v29, %v2426_v62  ;;  %2129 = vmatmul.bf16.gmra.mxu0 %v8384_v41 }
 0x325   : > { %2298 = vmatmul.bf16.gmra.mxu1 %v8385_v44 }
 0x326   : > { %4116 = vst [vmem:[%s6766_s12 + $0x68] sm:$0xff] %v2595_v34  ;;  %2467 = vmatmul.bf16.gmra.mxu2 %v8386_v43  ;;  %v5608_v34 = vor.u32 %v5890_v24, %v5607_v27  ;;  %v5609_v43 = vld [vmem:[%s6489_s4 + $0x290] sm:$0xf0] }
 0x328   : > { %2636 = vmatmul.bf16.gmra.mxu3 %v8387_v46  ;;  %v5888_v46 = vld [vmem:[%s6489_s4 + $0x284] sm:$0xf]  ;;  %2750 = vmatpush.bf16.xpose.msra.mxu0 %v5608_v34 }
 0x329   : > { %v2428_v33 = vpop.f32.mrf.mxu2  ;;  %v2092_v32 = vpop.f32.mrf.mxu0  ;;  %v5612_v26 = vor.u32 %v5888_v46, %v5609_v43 }
 0x32a   : > { %v2429_v30 = vadd.f32 %v2428_v33, %v2260_v40  ;;  %v2261_v62 = vpop.f32.mrf.mxu1  ;;  %v8388_v33 = vld [vmem:[#allocation21_spill] sm:$0xff] }
 0x32b   : > { %v2597_v31 = vpop.f32.mrf.mxu3  ;;  %v2262_v44 = vadd.f32 %v2261_v62, %v2092_v32  ;;  %2919 = vmatpush.bf16.xpose.msra.mxu1 %v5612_v26 }
 0x32c   : > { %v2598_v29 = vadd.f32 %v2597_v31, %v2429_v30  ;;  %v8389_v30 = vld [vmem:[#allocation22_spill] sm:$0xff]  ;;  %v8390_v31 = vld [vmem:[#allocation23_spill] sm:$0xff] }
 0x32e   : > { %4120 = vst [vmem:[%s6766_s12 + $0x88] sm:$0xff] %v2598_v29  ;;  %v8391_v29 = vld [vmem:[#allocation24_spill] sm:$0xff] }
 0x331   : > { %v2430_v61 = vpop.f32.mrf.mxu2  ;;  %v2095_v40 = vpop.f32.mrf.mxu0 }
 0x332   : > { %v2431_v41 = vadd.f32 %v2430_v61, %v2262_v44  ;;  %v2264_v35 = vpop.f32.mrf.mxu1 }
 0x333   : > { %v2599_v42 = vpop.f32.mrf.mxu3  ;;  %v2265_v28 = vadd.f32 %v2264_v35, %v2095_v40  ;;  %v8392_v35 = vld [vmem:[#allocation25_spill] sm:$0xff] }
 0x334   : > { %v2600_v60 = vadd.f32 %v2599_v42, %v2431_v41  ;;  %2134 = vmatmul.bf16.gmra.mxu0 %v8388_v33 }
 0x335   : > { %2303 = vmatmul.bf16.gmra.mxu1 %v8389_v30 }
 0x336   : > { %4124 = vst [vmem:[%s6766_s12 + $0xa8] sm:$0xff] %v2600_v60  ;;  %2472 = vmatmul.bf16.gmra.mxu2 %v8390_v31  ;;  %v5593_v31 = vld [vmem:[%s6489_s4 + $0x270] sm:$0xf0] }
 0x338   : > { %2641 = vmatmul.bf16.gmra.mxu3 %v8391_v29  ;;  %v8393_v29 = vld [vmem:[#allocation26_spill] sm:$0xff] }
 0x339   : > { %v2433_v43 = vpop.f32.mrf.mxu2  ;;  %v2097_v32 = vpop.f32.mrf.mxu0 }
 0x33a   : > { %v2434_v46 = vadd.f32 %v2433_v43, %v2265_v28  ;;  %v2266_v62 = vpop.f32.mrf.mxu1  ;;  %v8394_v28 = vld [vmem:[#allocation27_spill] sm:$0xff]  ;;  %v8395_v43 = vld [vmem:[#allocation28_spill] sm:$0xff] }
 0x33b   : > { %v2602_v44 = vpop.f32.mrf.mxu3  ;;  %v2267_v24 = vadd.f32 %v2266_v62, %v2097_v32 }
 0x33c   : > { %v2603_v27 = vadd.f32 %v2602_v44, %v2434_v46 }
 0x33e   : > { %4128 = vst [vmem:[%s6766_s12 + $0xc8] sm:$0xff] %v2603_v27 }
 0x341   : > { %v2435_v41 = vpop.f32.mrf.mxu2  ;;  %v2100_v61 = vpop.f32.mrf.mxu0 }
 0x342   : > { %v2436_v34 = vadd.f32 %v2435_v41, %v2267_v24  ;;  %v2269_v42 = vpop.f32.mrf.mxu1 }
 0x343   : > { %v2604_v26 = vpop.f32.mrf.mxu3  ;;  %v2270_v60 = vadd.f32 %v2269_v42, %v2100_v61 }
 0x344   : > { %v2605_v40 = vadd.f32 %v2604_v26, %v2436_v34  ;;  %2139 = vmatmul.bf16.gmra.mxu0 %v8392_v35 }
 0x345   : > { %2308 = vmatmul.bf16.gmra.mxu1 %v8393_v29  ;;  %v8396_v29 = vld [vmem:[#allocation29_spill] sm:$0xff] }
 0x346   : > { %4132 = vst [vmem:[%s6766_s12 + $0xe8] sm:$0xff] %v2605_v40  ;;  %2477 = vmatmul.bf16.gmra.mxu2 %v8394_v28  ;;  %v8397_v28 = vld [vmem:[#allocation30_spill] sm:$0xff] }
 0x348   : > { %2646 = vmatmul.bf16.gmra.mxu3 %v8395_v43 }
 0x349   : > { %v2438_v46 = vpop.f32.mrf.mxu2  ;;  %v2102_v62 = vpop.f32.mrf.mxu0 }
 0x34a   : > { %v2439_v44 = vadd.f32 %v2438_v46, %v2270_v60  ;;  %v2271_v27 = vpop.f32.mrf.mxu1  ;;  %v8398_v60 = vld [vmem:[#allocation31_spill] sm:$0xff]  ;;  %v8399_v46 = vld [vmem:[#allocation32_spill] sm:$0xff] }
 0x34b   : > { %v2607_v32 = vpop.f32.mrf.mxu3  ;;  %v2272_v41 = vadd.f32 %v2271_v27, %v2102_v62 }
 0x34c   : > { %v2608_v24 = vadd.f32 %v2607_v32, %v2439_v44 }
 0x34e   : > { %4136 = vst [vmem:[%s6766_s12 + $0x108] sm:$0xff] %v2608_v24 }
 0x351   : > { %v2440_v34 = vpop.f32.mrf.mxu2  ;;  %v2105_v61 = vpop.f32.mrf.mxu0 }
 0x352   : > { %v2441_v26 = vadd.f32 %v2440_v34, %v2272_v41  ;;  %v2274_v42 = vpop.f32.mrf.mxu1 }
 0x353   : > { %v2609_v35 = vpop.f32.mrf.mxu3  ;;  %v2275_v43 = vadd.f32 %v2274_v42, %v2105_v61 }
 0x354   : > { %v2610_v40 = vadd.f32 %v2609_v35, %v2441_v26  ;;  %2144 = vmatmul.bf16.gmra.mxu0 %v8396_v29  ;;  %v5884_v29 = vld [vmem:[%s6489_s4 + $0x264] sm:$0xf] }
 0x355   : > { %2313 = vmatmul.bf16.gmra.mxu1 %v8397_v28  ;;  %v8402_v28 = vld [vmem:[#allocation35_spill] sm:$0xff] }
 0x356   : > { %4140 = vst [vmem:[%s6766_s12 + $0x128] sm:$0xff] %v2610_v40  ;;  %2482 = vmatmul.bf16.gmra.mxu2 %v8398_v60 }
 0x358   : > { %2651 = vmatmul.bf16.gmra.mxu3 %v8399_v46  ;;  %v8400_v46 = vld [vmem:[#allocation33_spill] sm:$0xff] }
 0x359   : > { %v2443_v44 = vpop.f32.mrf.mxu2  ;;  %v2107_v27 = vpop.f32.mrf.mxu0 }
 0x35a   : > { %v2444_v32 = vadd.f32 %v2443_v44, %v2275_v43  ;;  %v2276_v24 = vpop.f32.mrf.mxu1  ;;  %v8401_v44 = vld [vmem:[#allocation34_spill] sm:$0xff] }
 0x35b   : > { %v2612_v62 = vpop.f32.mrf.mxu3  ;;  %v2277_v35 = vadd.f32 %v2276_v24, %v2107_v27  ;;  %v5887_v27 = vld [vmem:[%s6489_s4 + $0x274] sm:$0xf0]  ;;  %v5885_v24 = vld [vmem:[%s6489_s4 + $0x26c] sm:$0xf] }
 0x35c   : > { %v2613_v41 = vadd.f32 %v2612_v62, %v2444_v32  ;;  %v8403_v32 = vld [vmem:[#allocation36_spill] sm:$0xff]  ;;  %v5599_v62 = vld [vmem:[%s6489_s4 + $0x268] sm:$0xf] }
 0x35e   : > { %4144 = vst [vmem:[%s6766_s12 + $0x148] sm:$0xff] %v2613_v41  ;;  %v5600_v41 = vor.u32 %v5887_v27, %v5599_v62  ;;  %v5596_v62 = vor.u32 %v5884_v29, %v5593_v31 }
 0x360   : > { %3089 = vmatpush.bf16.xpose.msra.mxu2 %v5600_v41  ;;  %2920 = vmatpush.bf16.xpose.msra.mxu1 %v5596_v62 }
 0x361   : > { %v2445_v34 = vpop.f32.mrf.mxu2  ;;  %v2110_v42 = vpop.f32.mrf.mxu0 }
 0x362   : > { %v2446_v26 = vadd.f32 %v2445_v34, %v2277_v35  ;;  %v2279_v40 = vpop.f32.mrf.mxu1  ;;  %v5601_v35 = vld [vmem:[%s6489_s4 + $0x278] sm:$0xf0] }
 0x363   : > { %v2614_v61 = vpop.f32.mrf.mxu3  ;;  %v2280_v43 = vadd.f32 %v2279_v40, %v2110_v42 }
 0x364   : > { %v2615_v60 = vadd.f32 %v2614_v61, %v2446_v26  ;;  %2149 = vmatmul.bf16.gmra.mxu0 %v8400_v46  ;;  %v5604_v26 = vor.u32 %v5885_v24, %v5601_v35 }
 0x365   : > { %2318 = vmatmul.bf16.gmra.mxu1 %v8401_v44  ;;  %v5886_v44 = vld [vmem:[%s6489_s4 + $0x26c] sm:$0xf0] }
 0x366   : > { %4148 = vst [vmem:[%s6766_s12 + $0x168] sm:$0xff] %v2615_v60  ;;  %2487 = vmatmul.bf16.gmra.mxu2 %v8402_v28  ;;  %3258 = vmatpush.bf16.xpose.msra.mxu3 %v5604_v26  ;;  %v8405_v26 = vld [vmem:[#allocation38_spill] sm:$0xff] }
 0x368   : > { %2656 = vmatmul.bf16.gmra.mxu3 %v8403_v32  ;;  %v5591_v32 = vld [vmem:[%s6489_s4 + $0x260] sm:$0xf] }
 0x369   : > { %v2448_v34 = vpop.f32.mrf.mxu2  ;;  %v2112_v42 = vpop.f32.mrf.mxu0  ;;  %v5592_v46 = vor.u32 %v5886_v44, %v5591_v32  ;;  %v8406_v44 = vld [vmem:[#allocation39_spill] sm:$0xff]  ;;  %v8407_v32 = vld [vmem:[#allocation40_spill] sm:$0xff] }
 0x36a   : > { %v2449_v60 = vadd.f32 %v2448_v34, %v2280_v43  ;;  %v2281_v40 = vpop.f32.mrf.mxu1  ;;  %v8404_v34 = vld [vmem:[#allocation37_spill] sm:$0xff] }
 0x36b   : > { %v2617_v61 = vpop.f32.mrf.mxu3  ;;  %v2282_v30 = vadd.f32 %v2281_v40, %v2112_v42  ;;  %2751 = vmatpush.bf16.xpose.msra.mxu0 %v5592_v46 }
 0x36c   : > { %v2618_v28 = vadd.f32 %v2617_v61, %v2449_v60 }
 0x36e   : > { %4152 = vst [vmem:[%s6766_s12 + $0x188] sm:$0xff] %v2618_v28 }
 0x371   : > { %v2450_v27 = vpop.f32.mrf.mxu2  ;;  %v2115_v43 = vpop.f32.mrf.mxu0 }
 0x372   : > { %v2451_v33 = vadd.f32 %v2450_v27, %v2282_v30  ;;  %v2284_v41 = vpop.f32.mrf.mxu1 }
 0x373   : > { %v2619_v24 = vpop.f32.mrf.mxu3  ;;  %v2285_v28 = vadd.f32 %v2284_v41, %v2115_v43  ;;  %v8408_v41 = vld [vmem:[#allocation41_spill] sm:$0xff] }
 0x374   : > { %v2620_v35 = vadd.f32 %v2619_v24, %v2451_v33  ;;  %2154 = vmatmul.bf16.gmra.mxu0 %v8404_v34 }
 0x375   : > { %2323 = vmatmul.bf16.gmra.mxu1 %v8405_v26 }
 0x376   : > { %4156 = vst [vmem:[%s6766_s12 + $0x1a8] sm:$0xff] %v2620_v35  ;;  %2492 = vmatmul.bf16.gmra.mxu2 %v8406_v44  ;;  %v5577_v44 = vld [vmem:[%s6489_s4 + $0x250] sm:$0xf0] }
 0x378   : > { %2661 = vmatmul.bf16.gmra.mxu3 %v8407_v32  ;;  %v8409_v32 = vld [vmem:[#allocation42_spill] sm:$0xff] }
 0x379   : > { %v2453_v31 = vpop.f32.mrf.mxu2  ;;  %v2117_v46 = vpop.f32.mrf.mxu0 }
 0x37a   : > { %v2454_v29 = vadd.f32 %v2453_v31, %v2285_v28  ;;  %v2286_v60 = vpop.f32.mrf.mxu1  ;;  %v8410_v28 = vld [vmem:[#allocation43_spill] sm:$0xff]  ;;  %v8411_v31 = vld [vmem:[#allocation44_spill] sm:$0xff] }
 0x37b   : > { %v2622_v30 = vpop.f32.mrf.mxu3  ;;  %v2287_v42 = vadd.f32 %v2286_v60, %v2117_v46 }
 0x37c   : > { %v2623_v61 = vadd.f32 %v2622_v30, %v2454_v29 }
 0x37e   : > { %4160 = vst [vmem:[%s6766_s12 + $0x1c8] sm:$0xff] %v2623_v61 }
 0x381   : > { %v2455_v33 = vpop.f32.mrf.mxu2  ;;  %v2120_v27 = vpop.f32.mrf.mxu0 }
 0x382   : > { %v2456_v40 = vadd.f32 %v2455_v33, %v2287_v42  ;;  %v2289_v24 = vpop.f32.mrf.mxu1 }
 0x383   : > { %v2624_v62 = vpop.f32.mrf.mxu3  ;;  %v2290_v35 = vadd.f32 %v2289_v24, %v2120_v27 }
 0x384   : > { %v2625_v43 = vadd.f32 %v2624_v62, %v2456_v40  ;;  %2159 = vmatmul.bf16.gmra.mxu0 %v8408_v41 }
 0x385   : > { %2328 = vmatmul.bf16.gmra.mxu1 %v8409_v32  ;;  %v8412_v32 = vld [vmem:[#allocation45_spill] sm:$0xff] }
 0x386   : > { %4164 = vst [vmem:[%s6766_s12 + $0x1e8] sm:$0xff] %v2625_v43  ;;  %2497 = vmatmul.bf16.gmra.mxu2 %v8410_v28  ;;  %v8413_v28 = vld [vmem:[#allocation46_spill] sm:$0xff] }
 0x388   : > { %2666 = vmatmul.bf16.gmra.mxu3 %v8411_v31 }
 0x389   : > { %v2458_v29 = vpop.f32.mrf.mxu2  ;;  %v2122_v60 = vpop.f32.mrf.mxu0 }
 0x38a   : > { %v2459_v30 = vadd.f32 %v2458_v29, %v2290_v35  ;;  %v2291_v61 = vpop.f32.mrf.mxu1  ;;  %v8414_v35 = vld [vmem:[#allocation47_spill] sm:$0xff]  ;;  %v8415_v29 = vld [vmem:[#allocation48_spill] sm:$0xff] }
 0x38b   : > { %v2627_v46 = vpop.f32.mrf.mxu3  ;;  %v2292_v33 = vadd.f32 %v2291_v61, %v2122_v60 }
 0x38c   : > { %v2628_v42 = vadd.f32 %v2627_v46, %v2459_v30 }
 0x38e   : > { %4168 = vst [vmem:[%s6766_s12 + $0x208] sm:$0xff] %v2628_v42 }
 0x391   : > { %v2460_v40 = vpop.f32.mrf.mxu2  ;;  %v2125_v27 = vpop.f32.mrf.mxu0 }
 0x392   : > { %v2461_v62 = vadd.f32 %v2460_v40, %v2292_v33  ;;  %v2294_v24 = vpop.f32.mrf.mxu1 }
 0x393   : > { %v2629_v41 = vpop.f32.mrf.mxu3  ;;  %v2295_v31 = vadd.f32 %v2294_v24, %v2125_v27 }
 0x394   : > { %v2630_v43 = vadd.f32 %v2629_v41, %v2461_v62  ;;  %2164 = vmatmul.bf16.gmra.mxu0 %v8412_v32  ;;  %v5880_v32 = vld [vmem:[%s6489_s4 + $0x244] sm:$0xf] }
 0x395   : > { %2333 = vmatmul.bf16.gmra.mxu1 %v8413_v28  ;;  %v8418_v28 = vld [vmem:[#allocation51_spill] sm:$0xff] }
 0x396   : > { %4172 = vst [vmem:[%s6766_s12 + $0x228] sm:$0xff] %v2630_v43  ;;  %2502 = vmatmul.bf16.gmra.mxu2 %v8414_v35 }
 0x398   : > { %2671 = vmatmul.bf16.gmra.mxu3 %v8415_v29  ;;  %v8416_v29 = vld [vmem:[#allocation49_spill] sm:$0xff] }
 0x399   : > { %v2463_v30 = vpop.f32.mrf.mxu2  ;;  %v2127_v61 = vpop.f32.mrf.mxu0 }
 0x39a   : > { %v2464_v46 = vadd.f32 %v2463_v30, %v2295_v31  ;;  %v2296_v42 = vpop.f32.mrf.mxu1  ;;  %v8417_v30 = vld [vmem:[#allocation50_spill] sm:$0xff] }
 0x39b   : > { %v2632_v60 = vpop.f32.mrf.mxu3  ;;  %v2297_v41 = vadd.f32 %v2296_v42, %v2127_v61  ;;  %v5883_v61 = vld [vmem:[%s6489_s4 + $0x254] sm:$0xf0]  ;;  %v5881_v42 = vld [vmem:[%s6489_s4 + $0x24c] sm:$0xf] }
 0x39c   : > { %v2633_v33 = vadd.f32 %v2632_v60, %v2464_v46  ;;  %v8419_v46 = vld [vmem:[#allocation52_spill] sm:$0xff]  ;;  %v5583_v60 = vld [vmem:[%s6489_s4 + $0x248] sm:$0xf] }
 0x39e   : > { %4176 = vst [vmem:[%s6766_s12 + $0x248] sm:$0xff] %v2633_v33  ;;  %v5584_v33 = vor.u32 %v5883_v61, %v5583_v60  ;;  %v5580_v60 = vor.u32 %v5880_v32, %v5577_v44 }
 0x3a0   : > { %3090 = vmatpush.bf16.xpose.msra.mxu2 %v5584_v33  ;;  %2921 = vmatpush.bf16.xpose.msra.mxu1 %v5580_v60 }
 0x3a1   : > { %v2465_v40 = vpop.f32.mrf.mxu2  ;;  %v2130_v24 = vpop.f32.mrf.mxu0 }
 0x3a2   : > { %v2466_v62 = vadd.f32 %v2465_v40, %v2297_v41  ;;  %v2299_v43 = vpop.f32.mrf.mxu1  ;;  %v5585_v41 = vld [vmem:[%s6489_s4 + $0x258] sm:$0xf0] }
 0x3a3   : > { %v2634_v27 = vpop.f32.mrf.mxu3  ;;  %v2300_v31 = vadd.f32 %v2299_v43, %v2130_v24 }
 0x3a4   : > { %v2635_v35 = vadd.f32 %v2634_v27, %v2466_v62  ;;  %2169 = vmatmul.bf16.gmra.mxu0 %v8416_v29  ;;  %v5588_v62 = vor.u32 %v5881_v42, %v5585_v41 }
 0x3a5   : > { %2338 = vmatmul.bf16.gmra.mxu1 %v8417_v30  ;;  %v5882_v30 = vld [vmem:[%s6489_s4 + $0x24c] sm:$0xf0] }
 0x3a6   : > { %4180 = vst [vmem:[%s6766_s12 + $0x268] sm:$0xff] %v2635_v35  ;;  %2507 = vmatmul.bf16.gmra.mxu2 %v8418_v28  ;;  %3259 = vmatpush.bf16.xpose.msra.mxu3 %v5588_v62  ;;  %v8421_v62 = vld [vmem:[#allocation54_spill] sm:$0xff] }
 0x3a8   : > { %2676 = vmatmul.bf16.gmra.mxu3 %v8419_v46  ;;  %v5575_v46 = vld [vmem:[%s6489_s4 + $0x240] sm:$0xf] }
 0x3a9   : > { %v2468_v40 = vpop.f32.mrf.mxu2  ;;  %v2132_v24 = vpop.f32.mrf.mxu0  ;;  %v5576_v29 = vor.u32 %v5882_v30, %v5575_v46  ;;  %v8422_v30 = vld [vmem:[#allocation55_spill] sm:$0xff]  ;;  %v8423_v46 = vld [vmem:[#allocation56_spill] sm:$0xff] }
 0x3aa   : > { %v2469_v35 = vadd.f32 %v2468_v40, %v2300_v31  ;;  %v2301_v43 = vpop.f32.mrf.mxu1  ;;  %v8420_v40 = vld [vmem:[#allocation53_spill] sm:$0xff] }
 0x3ab   : > { %v2637_v27 = vpop.f32.mrf.mxu3  ;;  %v2302_v26 = vadd.f32 %v2301_v43, %v2132_v24  ;;  %2752 = vmatpush.bf16.xpose.msra.mxu0 %v5576_v29 }
 0x3ac   : > { %v2638_v28 = vadd.f32 %v2637_v27, %v2469_v35 }
 0x3ae   : > { %4184 = vst [vmem:[%s6766_s12 + $0x288] sm:$0xff] %v2638_v28 }
 0x3b1   : > { %v2470_v61 = vpop.f32.mrf.mxu2  ;;  %v2135_v31 = vpop.f32.mrf.mxu0 }
 0x3b2   : > { %v2471_v34 = vadd.f32 %v2470_v61, %v2302_v26  ;;  %v2304_v33 = vpop.f32.mrf.mxu1 }
 0x3b3   : > { %v2639_v42 = vpop.f32.mrf.mxu3  ;;  %v2305_v28 = vadd.f32 %v2304_v33, %v2135_v31  ;;  %v8424_v33 = vld [vmem:[#allocation57_spill] sm:$0xff] }
 0x3b4   : > { %v2640_v41 = vadd.f32 %v2639_v42, %v2471_v34  ;;  %2174 = vmatmul.bf16.gmra.mxu0 %v8420_v40 }
 0x3b5   : > { %2343 = vmatmul.bf16.gmra.mxu1 %v8421_v62 }
 0x3b6   : > { %4188 = vst [vmem:[%s6766_s12 + $0x2a8] sm:$0xff] %v2640_v41  ;;  %2512 = vmatmul.bf16.gmra.mxu2 %v8422_v30  ;;  %v5561_v30 = vld [vmem:[%s6489_s4 + $0x230] sm:$0xf0] }
 0x3b8   : > { %2681 = vmatmul.bf16.gmra.mxu3 %v8423_v46  ;;  %v8425_v46 = vld [vmem:[#allocation58_spill] sm:$0xff] }
 0x3b9   : > { %v2473_v44 = vpop.f32.mrf.mxu2  ;;  %v2137_v29 = vpop.f32.mrf.mxu0 }
 0x3ba   : > { %v2474_v32 = vadd.f32 %v2473_v44, %v2305_v28  ;;  %v2306_v35 = vpop.f32.mrf.mxu1  ;;  %v8426_v28 = vld [vmem:[#allocation59_spill] sm:$0xff]  ;;  %v8427_v44 = vld [vmem:[#allocation60_spill] sm:$0xff] }
 0x3bb   : > { %v2642_v26 = vpop.f32.mrf.mxu3  ;;  %v2307_v24 = vadd.f32 %v2306_v35, %v2137_v29 }
 0x3bc   : > { %v2643_v27 = vadd.f32 %v2642_v26, %v2474_v32 }
 0x3be   : > { %4192 = vst [vmem:[%s6766_s12 + $0x2c8] sm:$0xff] %v2643_v27 }
 0x3c1   : > { %v2475_v34 = vpop.f32.mrf.mxu2  ;;  %v2140_v61 = vpop.f32.mrf.mxu0 }
 0x3c2   : > { %v2476_v43 = vadd.f32 %v2475_v34, %v2307_v24  ;;  %v2309_v42 = vpop.f32.mrf.mxu1 }
 0x3c3   : > { %v2644_v60 = vpop.f32.mrf.mxu3  ;;  %v2310_v41 = vadd.f32 %v2309_v42, %v2140_v61 }
 0x3c4   : > { %v2645_v31 = vadd.f32 %v2644_v60, %v2476_v43  ;;  %2179 = vmatmul.bf16.gmra.mxu0 %v8424_v33 }
 0x3c5   : > { %2348 = vmatmul.bf16.gmra.mxu1 %v8425_v46  ;;  %v8428_v46 = vld [vmem:[#allocation61_spill] sm:$0xff] }
 0x3c6   : > { %4196 = vst [vmem:[%s6766_s12 + $0x2e8] sm:$0xff] %v2645_v31  ;;  %2517 = vmatmul.bf16.gmra.mxu2 %v8426_v28  ;;  %v8429_v28 = vld [vmem:[#allocation62_spill] sm:$0xff] }
 0x3c8   : > { %2686 = vmatmul.bf16.gmra.mxu3 %v8427_v44 }
 0x3c9   : > { %v2478_v32 = vpop.f32.mrf.mxu2  ;;  %v2142_v35 = vpop.f32.mrf.mxu0 }
 0x3ca   : > { %v2479_v26 = vadd.f32 %v2478_v32, %v2310_v41  ;;  %v2311_v27 = vpop.f32.mrf.mxu1  ;;  %v8430_v41 = vld [vmem:[#allocation63_spill] sm:$0xff]  ;;  %v8431_v32 = vld [vmem:[#allocation64_spill] sm:$0xff] }
 0x3cb   : > { %v2647_v29 = vpop.f32.mrf.mxu3  ;;  %v2312_v34 = vadd.f32 %v2311_v27, %v2142_v35 }
 0x3cc   : > { %v2648_v24 = vadd.f32 %v2647_v29, %v2479_v26 }
 0x3ce   : > { %4200 = vst [vmem:[%s6766_s12 + $0x308] sm:$0xff] %v2648_v24 }
 0x3d1   : > { %v2480_v43 = vpop.f32.mrf.mxu2  ;;  %v2145_v61 = vpop.f32.mrf.mxu0 }
 0x3d2   : > { %v2481_v60 = vadd.f32 %v2480_v43, %v2312_v34  ;;  %v2314_v42 = vpop.f32.mrf.mxu1 }
 0x3d3   : > { %v2649_v33 = vpop.f32.mrf.mxu3  ;;  %v2315_v44 = vadd.f32 %v2314_v42, %v2145_v61 }
 0x3d4   : > { %v2650_v31 = vadd.f32 %v2649_v33, %v2481_v60  ;;  %2184 = vmatmul.bf16.gmra.mxu0 %v8428_v46  ;;  %v5876_v46 = vld [vmem:[%s6489_s4 + $0x224] sm:$0xf] }
 0x3d5   : > { %2353 = vmatmul.bf16.gmra.mxu1 %v8429_v28  ;;  %v8434_v28 = vld [vmem:[#allocation67_spill] sm:$0xff] }
 0x3d6   : > { %4204 = vst [vmem:[%s6766_s12 + $0x328] sm:$0xff] %v2650_v31  ;;  %2522 = vmatmul.bf16.gmra.mxu2 %v8430_v41 }
 0x3d8   : > { %2691 = vmatmul.bf16.gmra.mxu3 %v8431_v32  ;;  %v8432_v32 = vld [vmem:[#allocation65_spill] sm:$0xff] }
 0x3d9   : > { %v2483_v26 = vpop.f32.mrf.mxu2  ;;  %v2147_v27 = vpop.f32.mrf.mxu0 }
 0x3da   : > { %v2484_v29 = vadd.f32 %v2483_v26, %v2315_v44  ;;  %v2316_v24 = vpop.f32.mrf.mxu1  ;;  %v8433_v26 = vld [vmem:[#allocation66_spill] sm:$0xff] }
 0x3db   : > { %v2652_v35 = vpop.f32.mrf.mxu3  ;;  %v2317_v33 = vadd.f32 %v2316_v24, %v2147_v27  ;;  %v5879_v27 = vld [vmem:[%s6489_s4 + $0x234] sm:$0xf0]  ;;  %v5877_v24 = vld [vmem:[%s6489_s4 + $0x22c] sm:$0xf] }
 0x3dc   : > { %v2653_v34 = vadd.f32 %v2652_v35, %v2484_v29  ;;  %v8435_v29 = vld [vmem:[#allocation68_spill] sm:$0xff]  ;;  %v5567_v35 = vld [vmem:[%s6489_s4 + $0x228] sm:$0xf] }
 0x3de   : > { %4208 = vst [vmem:[%s6766_s12 + $0x348] sm:$0xff] %v2653_v34  ;;  %v5568_v34 = vor.u32 %v5879_v27, %v5567_v35  ;;  %v5564_v35 = vor.u32 %v5876_v46, %v5561_v30 }
 0x3e0   : > { %3091 = vmatpush.bf16.xpose.msra.mxu2 %v5568_v34  ;;  %2922 = vmatpush.bf16.xpose.msra.mxu1 %v5564_v35 }
 0x3e1   : > { %v2485_v43 = vpop.f32.mrf.mxu2  ;;  %v2150_v42 = vpop.f32.mrf.mxu0 }
 0x3e2   : > { %v2486_v60 = vadd.f32 %v2485_v43, %v2317_v33  ;;  %v2319_v31 = vpop.f32.mrf.mxu1  ;;  %v5569_v33 = vld [vmem:[%s6489_s4 + $0x238] sm:$0xf0] }
 0x3e3   : > { %v2654_v61 = vpop.f32.mrf.mxu3  ;;  %v2320_v44 = vadd.f32 %v2319_v31, %v2150_v42 }
 0x3e4   : > { %v2655_v41 = vadd.f32 %v2654_v61, %v2486_v60  ;;  %2189 = vmatmul.bf16.gmra.mxu0 %v8432_v32  ;;  %v5572_v60 = vor.u32 %v5877_v24, %v5569_v33 }
 0x3e5   : > { %2358 = vmatmul.bf16.gmra.mxu1 %v8433_v26  ;;  %v5878_v26 = vld [vmem:[%s6489_s4 + $0x22c] sm:$0xf0] }
 0x3e6   : > { %4212 = vst [vmem:[%s6766_s12 + $0x368] sm:$0xff] %v2655_v41  ;;  %2527 = vmatmul.bf16.gmra.mxu2 %v8434_v28  ;;  %3260 = vmatpush.bf16.xpose.msra.mxu3 %v5572_v60  ;;  %v8437_v60 = vld [vmem:[#allocation70_spill] sm:$0xff] }
 0x3e8   : > { %2696 = vmatmul.bf16.gmra.mxu3 %v8435_v29  ;;  %v5559_v29 = vld [vmem:[%s6489_s4 + $0x220] sm:$0xf] }
 0x3e9   : > { %v2488_v43 = vpop.f32.mrf.mxu2  ;;  %v2152_v42 = vpop.f32.mrf.mxu0  ;;  %v5560_v32 = vor.u32 %v5878_v26, %v5559_v29  ;;  %v8438_v26 = vld [vmem:[#allocation71_spill] sm:$0xff]  ;;  %v8439_v29 = vld [vmem:[#allocation72_spill] sm:$0xff] }
 0x3ea   : > { %v2489_v41 = vadd.f32 %v2488_v43, %v2320_v44  ;;  %v2321_v31 = vpop.f32.mrf.mxu1  ;;  %v8436_v43 = vld [vmem:[#allocation69_spill] sm:$0xff] }
 0x3eb   : > { %v2657_v61 = vpop.f32.mrf.mxu3  ;;  %v2322_v62 = vadd.f32 %v2321_v31, %v2152_v42  ;;  %2753 = vmatpush.bf16.xpose.msra.mxu0 %v5560_v32 }
 0x3ec   : > { %v2658_v28 = vadd.f32 %v2657_v61, %v2489_v41 }
 0x3ee   : > { %4216 = vst [vmem:[%s6766_s12 + $0x388] sm:$0xff] %v2658_v28 }
 0x3f1   : > { %v2490_v27 = vpop.f32.mrf.mxu2  ;;  %v2155_v44 = vpop.f32.mrf.mxu0 }
 0x3f2   : > { %v2491_v40 = vadd.f32 %v2490_v27, %v2322_v62  ;;  %v2324_v34 = vpop.f32.mrf.mxu1 }
 0x3f3   : > { %v2659_v24 = vpop.f32.mrf.mxu3  ;;  %v2325_v28 = vadd.f32 %v2324_v34, %v2155_v44  ;;  %v8440_v34 = vld [vmem:[#allocation73_spill] sm:$0xff] }
 0x3f4   : > { %v2660_v33 = vadd.f32 %v2659_v24, %v2491_v40  ;;  %2194 = vmatmul.bf16.gmra.mxu0 %v8436_v43 }
 0x3f5   : > { %2363 = vmatmul.bf16.gmra.mxu1 %v8437_v60 }
 0x3f6   : > { %4220 = vst [vmem:[%s6766_s12 + $0x3a8] sm:$0xff] %v2660_v33  ;;  %2532 = vmatmul.bf16.gmra.mxu2 %v8438_v26  ;;  %v5545_v26 = vld [vmem:[%s6489_s4 + $0x210] sm:$0xf0] }
 0x3f8   : > { %2701 = vmatmul.bf16.gmra.mxu3 %v8439_v29  ;;  %v8441_v29 = vld [vmem:[#allocation74_spill] sm:$0xff] }
 0x3f9   : > { %v2493_v30 = vpop.f32.mrf.mxu2  ;;  %v2157_v32 = vpop.f32.mrf.mxu0 }
 0x3fa   : > { %v2494_v46 = vadd.f32 %v2493_v30, %v2325_v28  ;;  %v2326_v41 = vpop.f32.mrf.mxu1  ;;  %v8442_v28 = vld [vmem:[#allocation75_spill] sm:$0xff]  ;;  %v8443_v30 = vld [vmem:[#allocation76_spill] sm:$0xff] }
 0x3fb   : > { %v2662_v62 = vpop.f32.mrf.mxu3  ;;  %v2327_v42 = vadd.f32 %v2326_v41, %v2157_v32 }
 0x3fc   : > { %v2663_v61 = vadd.f32 %v2662_v62, %v2494_v46 }
 0x3fe   : > { %4224 = vst [vmem:[%s6766_s12 + $0x3c8] sm:$0xff] %v2663_v61 }
 0x401   : > { %v2495_v40 = vpop.f32.mrf.mxu2  ;;  %v2160_v27 = vpop.f32.mrf.mxu0 }
 0x402   : > { %v2496_v31 = vadd.f32 %v2495_v40, %v2327_v42  ;;  %v2329_v24 = vpop.f32.mrf.mxu1 }
 0x403   : > { %v2664_v35 = vpop.f32.mrf.mxu3  ;;  %v2330_v33 = vadd.f32 %v2329_v24, %v2160_v27 }
 0x404   : > { %v2665_v44 = vadd.f32 %v2664_v35, %v2496_v31  ;;  %2199 = vmatmul.bf16.gmra.mxu0 %v8440_v34 }
 0x405   : > { %2368 = vmatmul.bf16.gmra.mxu1 %v8441_v29  ;;  %v8444_v29 = vld [vmem:[#allocation77_spill] sm:$0xff] }
 0x406   : > { %4228 = vst [vmem:[%s6766_s12 + $0x3e8] sm:$0xff] %v2665_v44  ;;  %2537 = vmatmul.bf16.gmra.mxu2 %v8442_v28  ;;  %v8445_v28 = vld [vmem:[#allocation78_spill] sm:$0xff] }
 0x408   : > { %2706 = vmatmul.bf16.gmra.mxu3 %v8443_v30 }
 0x409   : > { %v2498_v46 = vpop.f32.mrf.mxu2  ;;  %v2162_v41 = vpop.f32.mrf.mxu0 }
 0x40a   : > { %v2499_v62 = vadd.f32 %v2498_v46, %v2330_v33  ;;  %v2331_v61 = vpop.f32.mrf.mxu1  ;;  %v8446_v33 = vld [vmem:[#allocation79_spill] sm:$0xff]  ;;  %v8447_v46 = vld [vmem:[#allocation80_spill] sm:$0xff] }
 0x40b   : > { %v2667_v32 = vpop.f32.mrf.mxu3  ;;  %v2332_v40 = vadd.f32 %v2331_v61, %v2162_v41 }
 0x40c   : > { %v2668_v42 = vadd.f32 %v2667_v32, %v2499_v62 }
 0x40e   : > { %4232 = vst [vmem:[%s6766_s12 + $0x408] sm:$0xff] %v2668_v42 }
 0x411   : > { %v2500_v31 = vpop.f32.mrf.mxu2  ;;  %v2165_v27 = vpop.f32.mrf.mxu0 }
 0x412   : > { %v2501_v35 = vadd.f32 %v2500_v31, %v2332_v40  ;;  %v2334_v24 = vpop.f32.mrf.mxu1 }
 0x413   : > { %v2669_v34 = vpop.f32.mrf.mxu3  ;;  %v2335_v30 = vadd.f32 %v2334_v24, %v2165_v27 }
 0x414   : > { %v2670_v44 = vadd.f32 %v2669_v34, %v2501_v35  ;;  %2204 = vmatmul.bf16.gmra.mxu0 %v8444_v29  ;;  %v5872_v29 = vld [vmem:[%s6489_s4 + $0x204] sm:$0xf] }
 0x415   : > { %2373 = vmatmul.bf16.gmra.mxu1 %v8445_v28  ;;  %v8450_v28 = vld [vmem:[#allocation83_spill] sm:$0xff] }
 0x416   : > { %4236 = vst [vmem:[%s6766_s12 + $0x428] sm:$0xff] %v2670_v44  ;;  %2542 = vmatmul.bf16.gmra.mxu2 %v8446_v33 }
 0x418   : > { %2711 = vmatmul.bf16.gmra.mxu3 %v8447_v46  ;;  %v8448_v46 = vld [vmem:[#allocation81_spill] sm:$0xff] }
 0x419   : > { %v2503_v62 = vpop.f32.mrf.mxu2  ;;  %v2167_v61 = vpop.f32.mrf.mxu0 }
 0x41a   : > { %v2504_v32 = vadd.f32 %v2503_v62, %v2335_v30  ;;  %v2336_v42 = vpop.f32.mrf.mxu1  ;;  %v8449_v62 = vld [vmem:[#allocation82_spill] sm:$0xff] }
 0x41b   : > { %v2672_v41 = vpop.f32.mrf.mxu3  ;;  %v2337_v34 = vadd.f32 %v2336_v42, %v2167_v61  ;;  %v5875_v61 = vld [vmem:[%s6489_s4 + $0x214] sm:$0xf0]  ;;  %v5873_v42 = vld [vmem:[%s6489_s4 + $0x20c] sm:$0xf] }
 0x41c   : > { %v2673_v40 = vadd.f32 %v2672_v41, %v2504_v32  ;;  %v8451_v32 = vld [vmem:[#allocation84_spill] sm:$0xff]  ;;  %v5551_v41 = vld [vmem:[%s6489_s4 + $0x208] sm:$0xf] }
 0x41e   : > { %4240 = vst [vmem:[%s6766_s12 + $0x448] sm:$0xff] %v2673_v40  ;;  %v5552_v40 = vor.u32 %v5875_v61, %v5551_v41  ;;  %v5548_v41 = vor.u32 %v5872_v29, %v5545_v26 }
 0x420   : > { %3092 = vmatpush.bf16.xpose.msra.mxu2 %v5552_v40  ;;  %2923 = vmatpush.bf16.xpose.msra.mxu1 %v5548_v41 }
 0x421   : > { %v2505_v31 = vpop.f32.mrf.mxu2  ;;  %v2170_v24 = vpop.f32.mrf.mxu0 }
 0x422   : > { %v2506_v35 = vadd.f32 %v2505_v31, %v2337_v34  ;;  %v2339_v44 = vpop.f32.mrf.mxu1  ;;  %v5553_v34 = vld [vmem:[%s6489_s4 + $0x218] sm:$0xf0] }
 0x423   : > { %v2674_v27 = vpop.f32.mrf.mxu3  ;;  %v2340_v30 = vadd.f32 %v2339_v44, %v2170_v24 }
 0x424   : > { %v2675_v33 = vadd.f32 %v2674_v27, %v2506_v35  ;;  %2209 = vmatmul.bf16.gmra.mxu0 %v8448_v46  ;;  %v5556_v35 = vor.u32 %v5873_v42, %v5553_v34 }
 0x425   : > { %2378 = vmatmul.bf16.gmra.mxu1 %v8449_v62  ;;  %v5874_v62 = vld [vmem:[%s6489_s4 + $0x20c] sm:$0xf0] }
 0x426   : > { %4244 = vst [vmem:[%s6766_s12 + $0x468] sm:$0xff] %v2675_v33  ;;  %2547 = vmatmul.bf16.gmra.mxu2 %v8450_v28  ;;  %3261 = vmatpush.bf16.xpose.msra.mxu3 %v5556_v35  ;;  %v8453_v35 = vld [vmem:[#allocation86_spill] sm:$0xff] }
 0x428   : > { %2716 = vmatmul.bf16.gmra.mxu3 %v8451_v32  ;;  %v5543_v32 = vld [vmem:[%s6489_s4 + $0x200] sm:$0xf] }
 0x429   : > { %v2508_v31 = vpop.f32.mrf.mxu2  ;;  %v2172_v24 = vpop.f32.mrf.mxu0  ;;  %v5544_v46 = vor.u32 %v5874_v62, %v5543_v32  ;;  %v8454_v62 = vld [vmem:[#allocation87_spill] sm:$0xff]  ;;  %v8455_v32 = vld [vmem:[#allocation88_spill] sm:$0xff] }
 0x42a   : > { %v2509_v33 = vadd.f32 %v2508_v31, %v2340_v30  ;;  %v2341_v44 = vpop.f32.mrf.mxu1  ;;  %v8452_v31 = vld [vmem:[#allocation85_spill] sm:$0xff] }
 0x42b   : > { %v2677_v27 = vpop.f32.mrf.mxu3  ;;  %v2342_v60 = vadd.f32 %v2341_v44, %v2172_v24  ;;  %2754 = vmatpush.bf16.xpose.msra.mxu0 %v5544_v46 }
 0x42c   : > { %v2678_v28 = vadd.f32 %v2677_v27, %v2509_v33 }
 0x42e   : > { %4248 = vst [vmem:[%s6766_s12 + $0x488] sm:$0xff] %v2678_v28 }
 0x431   : > { %v2510_v61 = vpop.f32.mrf.mxu2  ;;  %v2175_v30 = vpop.f32.mrf.mxu0 }
 0x432   : > { %v2511_v43 = vadd.f32 %v2510_v61, %v2342_v60  ;;  %v2344_v40 = vpop.f32.mrf.mxu1 }
 0x433   : > { %v2679_v42 = vpop.f32.mrf.mxu3  ;;  %v2345_v28 = vadd.f32 %v2344_v40, %v2175_v30  ;;  %v8456_v40 = vld [vmem:[#allocation89_spill] sm:$0xff] }
 0x434   : > { %v2680_v34 = vadd.f32 %v2679_v42, %v2511_v43  ;;  %2214 = vmatmul.bf16.gmra.mxu0 %v8452_v31 }
 0x435   : > { %2383 = vmatmul.bf16.gmra.mxu1 %v8453_v35 }
 0x436   : > { %4252 = vst [vmem:[%s6766_s12 + $0x4a8] sm:$0xff] %v2680_v34  ;;  %2552 = vmatmul.bf16.gmra.mxu2 %v8454_v62  ;;  %v5785_v62 = vld [vmem:[%s6489_s4 + $0x3f0] sm:$0xf0] }
 0x438   : > { %2721 = vmatmul.bf16.gmra.mxu3 %v8455_v32  ;;  %v8457_v32 = vld [vmem:[#allocation90_spill] sm:$0xff] }
 0x439   : > { %v2513_v26 = vpop.f32.mrf.mxu2  ;;  %v2177_v46 = vpop.f32.mrf.mxu0 }
 0x43a   : > { %v2514_v29 = vadd.f32 %v2513_v26, %v2345_v28  ;;  %v2346_v33 = vpop.f32.mrf.mxu1  ;;  %v8458_v28 = vld [vmem:[#allocation91_spill] sm:$0xff]  ;;  %v8459_v26 = vld [vmem:[#allocation92_spill] sm:$0xff] }
 0x43b   : > { %v2682_v60 = vpop.f32.mrf.mxu3  ;;  %v2347_v24 = vadd.f32 %v2346_v33, %v2177_v46 }
 0x43c   : > { %v2683_v27 = vadd.f32 %v2682_v60, %v2514_v29 }
 0x43e   : > { %4256 = vst [vmem:[%s6766_s12 + $0x4c8] sm:$0xff] %v2683_v27 }
 0x441   : > { %v2515_v43 = vpop.f32.mrf.mxu2  ;;  %v2180_v61 = vpop.f32.mrf.mxu0 }
 0x442   : > { %v2516_v44 = vadd.f32 %v2515_v43, %v2347_v24  ;;  %v2349_v42 = vpop.f32.mrf.mxu1 }
 0x443   : > { %v2684_v41 = vpop.f32.mrf.mxu3  ;;  %v2350_v34 = vadd.f32 %v2349_v42, %v2180_v61 }
 0x444   : > { %v2685_v30 = vadd.f32 %v2684_v41, %v2516_v44  ;;  %2219 = vmatmul.bf16.gmra.mxu0 %v8456_v40 }
 0x445   : > { %2388 = vmatmul.bf16.gmra.mxu1 %v8457_v32  ;;  %v8460_v32 = vld [vmem:[#allocation93_spill] sm:$0xff] }
 0x446   : > { %4260 = vst [vmem:[%s6766_s12 + $0x4e8] sm:$0xff] %v2685_v30  ;;  %2557 = vmatmul.bf16.gmra.mxu2 %v8458_v28  ;;  %v8461_v28 = vld [vmem:[#allocation94_spill] sm:$0xff] }
 0x448   : > { %2726 = vmatmul.bf16.gmra.mxu3 %v8459_v26 }
 0x449   : > { %v2518_v29 = vpop.f32.mrf.mxu2  ;;  %v2182_v33 = vpop.f32.mrf.mxu0 }
 0x44a   : > { %v2519_v60 = vadd.f32 %v2518_v29, %v2350_v34  ;;  %v2351_v27 = vpop.f32.mrf.mxu1  ;;  %v8462_v34 = vld [vmem:[#allocation95_spill] sm:$0xff]  ;;  %v8463_v29 = vld [vmem:[#allocation96_spill] sm:$0xff] }
 0x44b   : > { %v2687_v46 = vpop.f32.mrf.mxu3  ;;  %v2352_v43 = vadd.f32 %v2351_v27, %v2182_v33 }
 0x44c   : > { %v2688_v24 = vadd.f32 %v2687_v46, %v2519_v60 }
 0x44e   : > { %4264 = vst [vmem:[%s6766_s12 + $0x508] sm:$0xff] %v2688_v24 }
 0x451   : > { %v2520_v44 = vpop.f32.mrf.mxu2  ;;  %v2185_v61 = vpop.f32.mrf.mxu0 }
 0x452   : > { %v2521_v41 = vadd.f32 %v2520_v44, %v2352_v43  ;;  %v2354_v42 = vpop.f32.mrf.mxu1 }
 0x453   : > { %v2689_v40 = vpop.f32.mrf.mxu3  ;;  %v2355_v26 = vadd.f32 %v2354_v42, %v2185_v61 }
 0x454   : > { %v2690_v30 = vadd.f32 %v2689_v40, %v2521_v41  ;;  %2224 = vmatmul.bf16.gmra.mxu0 %v8460_v32  ;;  %v5932_v32 = vld [vmem:[%s6489_s4 + $0x3e4] sm:$0xf] }
 0x455   : > { %2393 = vmatmul.bf16.gmra.mxu1 %v8461_v28  ;;  %v8466_v28 = vld [vmem:[#allocation99_spill] sm:$0xff] }
 0x456   : > { %4268 = vst [vmem:[%s6766_s12 + $0x528] sm:$0xff] %v2690_v30  ;;  %2562 = vmatmul.bf16.gmra.mxu2 %v8462_v34 }
 0x458   : > { %2731 = vmatmul.bf16.gmra.mxu3 %v8463_v29  ;;  %v8464_v29 = vld [vmem:[#allocation97_spill] sm:$0xff] }
 0x459   : > { %v2523_v60 = vpop.f32.mrf.mxu2  ;;  %v2187_v27 = vpop.f32.mrf.mxu0 }
 0x45a   : > { %v2524_v46 = vadd.f32 %v2523_v60, %v2355_v26  ;;  %v2356_v24 = vpop.f32.mrf.mxu1  ;;  %v8465_v60 = vld [vmem:[#allocation98_spill] sm:$0xff] }
 0x45b   : > { %v2692_v33 = vpop.f32.mrf.mxu3  ;;  %v2357_v40 = vadd.f32 %v2356_v24, %v2187_v27  ;;  %v5935_v27 = vld [vmem:[%s6489_s4 + $0x3f4] sm:$0xf0]  ;;  %v5933_v24 = vld [vmem:[%s6489_s4 + $0x3ec] sm:$0xf] }
 0x45c   : > { %v2693_v43 = vadd.f32 %v2692_v33, %v2524_v46  ;;  %v8467_v46 = vld [vmem:[#allocation100_spill] sm:$0xff]  ;;  %v5791_v33 = vld [vmem:[%s6489_s4 + $0x3e8] sm:$0xf] }
 0x45e   : > { %4272 = vst [vmem:[%s6766_s12 + $0x548] sm:$0xff] %v2693_v43  ;;  %v5792_v43 = vor.u32 %v5935_v27, %v5791_v33  ;;  %v5788_v33 = vor.u32 %v5932_v32, %v5785_v62 }
 0x460   : > { %3761 = vmatpush.bf16.xpose.msrb.mxu2 %v5792_v43  ;;  %3592 = vmatpush.bf16.xpose.msrb.mxu1 %v5788_v33 }
 0x461   : > { %v2525_v44 = vpop.f32.mrf.mxu2  ;;  %v2190_v42 = vpop.f32.mrf.mxu0 }
 0x462   : > { %v2526_v41 = vadd.f32 %v2525_v44, %v2357_v40  ;;  %v2359_v30 = vpop.f32.mrf.mxu1  ;;  %v5793_v40 = vld [vmem:[%s6489_s4 + $0x3f8] sm:$0xf0] }
 0x463   : > { %v2694_v61 = vpop.f32.mrf.mxu3  ;;  %v2360_v26 = vadd.f32 %v2359_v30, %v2190_v42 }
 0x464   : > { %v2695_v34 = vadd.f32 %v2694_v61, %v2526_v41  ;;  %2229 = vmatmul.bf16.gmra.mxu0 %v8464_v29  ;;  %v5796_v41 = vor.u32 %v5933_v24, %v5793_v40 }
 0x465   : > { %2398 = vmatmul.bf16.gmra.mxu1 %v8465_v60  ;;  %v5934_v60 = vld [vmem:[%s6489_s4 + $0x3ec] sm:$0xf0] }
 0x466   : > { %4276 = vst [vmem:[%s6766_s12 + $0x568] sm:$0xff] %v2695_v34  ;;  %2567 = vmatmul.bf16.gmra.mxu2 %v8466_v28  ;;  %3930 = vmatpush.bf16.xpose.msrb.mxu3 %v5796_v41 }
 0x468   : > { %2736 = vmatmul.bf16.gmra.mxu3 %v8467_v46  ;;  %v5783_v46 = vld [vmem:[%s6489_s4 + $0x3e0] sm:$0xf] }
 0x469   : > { %v2528_v44 = vpop.f32.mrf.mxu2  ;;  %v2192_v42 = vpop.f32.mrf.mxu0  ;;  %v5784_v29 = vor.u32 %v5934_v60, %v5783_v46 }
 0x46a   : > { %v2529_v34 = vadd.f32 %v2528_v44, %v2360_v26  ;;  %v2361_v30 = vpop.f32.mrf.mxu1 }
 0x46b   : > { %v2697_v61 = vpop.f32.mrf.mxu3  ;;  %v2362_v35 = vadd.f32 %v2361_v30, %v2192_v42  ;;  %3423 = vmatpush.bf16.xpose.msrb.mxu0 %v5784_v29 }
 0x46c   : > { %v2698_v28 = vadd.f32 %v2697_v61, %v2529_v34 }
 0x46e   : > { %4280 = vst [vmem:[%s6766_s12 + $0x588] sm:$0xff] %v2698_v28 }
 0x471   : > { %v2530_v27 = vpop.f32.mrf.mxu2  ;;  %v2195_v26 = vpop.f32.mrf.mxu0 }
 0x472   : > { %v2531_v31 = vadd.f32 %v2530_v27, %v2362_v35  ;;  %v2364_v43 = vpop.f32.mrf.mxu1 }
 0x473   : > { %v2699_v24 = vpop.f32.mrf.mxu3  ;;  %v2365_v28 = vadd.f32 %v2364_v43, %v2195_v26 }
 0x474   : > { %v2700_v40 = vadd.f32 %v2699_v24, %v2531_v31  ;;  %2234 = vmatmul.bf16.gmra.mxu0 %v7309_v45 }
 0x475   : > { %2403 = vmatmul.bf16.gmra.mxu1 %v7311_v11 }
 0x476   : > { %4284 = vst [vmem:[%s6766_s12 + $0x5a8] sm:$0xff] %v2700_v40  ;;  %2572 = vmatmul.bf16.gmra.mxu2 %v7313_v9 }
 0x478   : > { %2741 = vmatmul.bf16.gmra.mxu3 %v7315_v17 }
 0x479   : > { %v2533_v62 = vpop.f32.mrf.mxu2  ;;  %v2197_v29 = vpop.f32.mrf.mxu0 }
 0x47a   : > { %v2534_v32 = vadd.f32 %v2533_v62, %v2365_v28  ;;  %v2366_v60 = vpop.f32.mrf.mxu1 }
 0x47b   : > { %v2702_v35 = vpop.f32.mrf.mxu3  ;;  %v2367_v44 = vadd.f32 %v2366_v60, %v2197_v29 }
 0x47c   : > { %v2703_v46 = vadd.f32 %v2702_v35, %v2534_v32 }
 0x47e   : > { %4288 = vst [vmem:[%s6766_s12 + $0x5c8] sm:$0xff] %v2703_v46 }
 0x481   : > { %v2535_v31 = vpop.f32.mrf.mxu2  ;;  %v2200_v61 = vpop.f32.mrf.mxu0 }
 0x482   : > { %v2536_v41 = vadd.f32 %v2535_v31, %v2367_v44  ;;  %v2369_v42 = vpop.f32.mrf.mxu1 }
 0x483   : > { %v2704_v34 = vpop.f32.mrf.mxu3  ;;  %v2370_v33 = vadd.f32 %v2369_v42, %v2200_v61 }
 0x484   : > { %v2705_v30 = vadd.f32 %v2704_v34, %v2536_v41  ;;  %2755 = vmatmul.bf16.vlgmr.msra.gmra.mxu0 %v6575_v52 }
 0x485   : > { %2924 = vmatmul.bf16.vlgmr.msra.gmra.mxu1 %v6577_v53 }
 0x486   : > { %4292 = vst [vmem:[%s6766_s12 + $0x5e8] sm:$0xff] %v2705_v30  ;;  %3093 = vmatmul.bf16.vlgmr.msra.gmra.mxu2 %v6579_v54 }
 0x488   : > { %3262 = vmatmul.bf16.vlgmr.msra.gmra.mxu3 %v6581_v55 }
 0x489   : > { %v2538_v27 = vpop.f32.mrf.mxu2  ;;  %v2202_v43 = vpop.f32.mrf.mxu0 }
 0x48a   : > { %v2539_v24 = vadd.f32 %v2538_v27, %v2370_v33  ;;  %v2371_v40 = vpop.f32.mrf.mxu1 }
 0x48b   : > { %v2707_v26 = vpop.f32.mrf.mxu3  ;;  %v2372_v62 = vadd.f32 %v2371_v40, %v2202_v43 }
 0x48c   : > { %v2708_v28 = vadd.f32 %v2707_v26, %v2539_v24 }
 0x48e   : > { %4296 = vst [vmem:[%s6766_s12 + $0x608] sm:$0xff] %v2708_v28 }
 0x491   : > { %v2540_v32 = vpop.f32.mrf.mxu2  ;;  %v2205_v60 = vpop.f32.mrf.mxu0 }
 0x492   : > { %v2541_v35 = vadd.f32 %v2540_v32, %v2372_v62  ;;  %v2374_v46 = vpop.f32.mrf.mxu1 }
 0x493   : > { %v2709_v29 = vpop.f32.mrf.mxu3  ;;  %v2375_v31 = vadd.f32 %v2374_v46, %v2205_v60  ;;  %v5929_v60 = vld [vmem:[%s6489_s4 + $0x3cc] sm:$0xf] }
 0x494   : > { %v2710_v44 = vadd.f32 %v2709_v29, %v2541_v35  ;;  %2760 = vmatmul.bf16.gmra.mxu0 %v6595_v0  ;;  %v5775_v35 = vld [vmem:[%s6489_s4 + $0x3c8] sm:$0xf]  ;;  %v5931_v29 = vld [vmem:[%s6489_s4 + $0x3d4] sm:$0xf0] }
 0x495   : > { %2929 = vmatmul.bf16.gmra.mxu1 %v6597_v1  ;;  %v5776_v46 = vor.u32 %v5931_v29, %v5775_v35 }
 0x496   : > { %4300 = vst [vmem:[%s6766_s12 + $0x628] sm:$0xff] %v2710_v44  ;;  %3098 = vmatmul.bf16.gmra.mxu2 %v6599_v2  ;;  %v5777_v44 = vld [vmem:[%s6489_s4 + $0x3d8] sm:$0xf0] }
 0x497   : > { %3762 = vmatpush.bf16.xpose.msrb.mxu2 %v5776_v46 }
 0x498   : > { %3267 = vmatmul.bf16.gmra.mxu3 %v6601_v3 }
 0x499   : > { %v2543_v41 = vpop.f32.mrf.mxu2  ;;  %v2207_v42 = vpop.f32.mrf.mxu0 }
 0x49a   : > { %v2544_v34 = vadd.f32 %v2543_v41, %v2375_v31  ;;  %v2376_v30 = vpop.f32.mrf.mxu1  ;;  %v5780_v41 = vor.u32 %v5929_v60, %v5777_v44 }
 0x49b   : > { %v2712_v61 = vpop.f32.mrf.mxu3  ;;  %v2377_v27 = vadd.f32 %v2376_v30, %v2207_v42 }
 0x49c   : > { %v2713_v33 = vadd.f32 %v2712_v61, %v2544_v34  ;;  %3931 = vmatpush.bf16.xpose.msrb.mxu3 %v5780_v41 }
 0x49e   : > { %4304 = vst [vmem:[%s6766_s12 + $0x648] sm:$0xff] %v2713_v33 }
 0x4a1   : > { %v2545_v24 = vpop.f32.mrf.mxu2  ;;  %v2210_v40 = vpop.f32.mrf.mxu0 }
 0x4a2   : > { %v2546_v26 = vadd.f32 %v2545_v24, %v2377_v27  ;;  %v2379_v28 = vpop.f32.mrf.mxu1  ;;  %v5767_v27 = vld [vmem:[%s6489_s4 + $0x3c0] sm:$0xf]  ;;  %v5930_v24 = vld [vmem:[%s6489_s4 + $0x3cc] sm:$0xf0] }
 0x4a3   : > { %v2714_v43 = vpop.f32.mrf.mxu3  ;;  %v2380_v32 = vadd.f32 %v2379_v28, %v2210_v40  ;;  %v5769_v40 = vld [vmem:[%s6489_s4 + $0x3d0] sm:$0xf0] }
 0x4a4   : > { %v2715_v62 = vadd.f32 %v2714_v43, %v2546_v26  ;;  %2765 = vmatmul.bf16.gmra.mxu0 %v6615_v12  ;;  %v5768_v26 = vor.u32 %v5930_v24, %v5767_v27  ;;  %v5928_v43 = vld [vmem:[%s6489_s4 + $0x3c4] sm:$0xf] }
 0x4a5   : > { %2934 = vmatmul.bf16.gmra.mxu1 %v6617_v13 }
 0x4a6   : > { %4308 = vst [vmem:[%s6766_s12 + $0x668] sm:$0xff] %v2715_v62  ;;  %3103 = vmatmul.bf16.gmra.mxu2 %v6619_v14  ;;  %v5772_v62 = vor.u32 %v5928_v43, %v5769_v40  ;;  %3424 = vmatpush.bf16.xpose.msrb.mxu0 %v5768_v26 }
 0x4a8   : > { %3272 = vmatmul.bf16.gmra.mxu3 %v6621_v15  ;;  %3593 = vmatpush.bf16.xpose.msrb.mxu1 %v5772_v62 }
 0x4a9   : > { %v2548_v31 = vpop.f32.mrf.mxu2  ;;  %v2212_v42 = vpop.f32.mrf.mxu0 }
 0x4aa   : > { %v2549_v34 = vadd.f32 %v2548_v31, %v2380_v32  ;;  %v2381_v30 = vpop.f32.mrf.mxu1 }
 0x4ab   : > { %v2717_v61 = vpop.f32.mrf.mxu3  ;;  %v2382_v28 = vadd.f32 %v2381_v30, %v2212_v42 }
 0x4ac   : > { %v2718_v33 = vadd.f32 %v2717_v61, %v2549_v34 }
 0x4ae   : > { %4312 = vst [vmem:[%s6766_s12 + $0x688] sm:$0xff] %v2718_v33 }
 0x4b1   : > { %v2550_v35 = vpop.f32.mrf.mxu2  ;;  %v2215_v32 = vpop.f32.mrf.mxu0 }
 0x4b2   : > { %v2551_v29 = vadd.f32 %v2550_v35, %v2382_v28  ;;  %v2384_v46 = vpop.f32.mrf.mxu1 }
 0x4b3   : > { %v2719_v60 = vpop.f32.mrf.mxu3  ;;  %v2385_v31 = vadd.f32 %v2384_v46, %v2215_v32 }
 0x4b4   : > { %v2720_v44 = vadd.f32 %v2719_v60, %v2551_v29  ;;  %2770 = vmatmul.bf16.gmra.mxu0 %v6643_v36 }
 0x4b5   : > { %2939 = vmatmul.bf16.gmra.mxu1 %v6645_v37 }
 0x4b6   : > { %4316 = vst [vmem:[%s6766_s12 + $0x6a8] sm:$0xff] %v2720_v44  ;;  %3108 = vmatmul.bf16.gmra.mxu2 %v6647_v38 }
 0x4b8   : > { %3277 = vmatmul.bf16.gmra.mxu3 %v6649_v39 }
 0x4b9   : > { %v2553_v41 = vpop.f32.mrf.mxu2  ;;  %v2217_v42 = vpop.f32.mrf.mxu0 }
 0x4ba   : > { %v2554_v34 = vadd.f32 %v2553_v41, %v2385_v31  ;;  %v2386_v30 = vpop.f32.mrf.mxu1 }
 0x4bb   : > { %v2722_v61 = vpop.f32.mrf.mxu3  ;;  %v2387_v27 = vadd.f32 %v2386_v30, %v2217_v42 }
 0x4bc   : > { %v2723_v33 = vadd.f32 %v2722_v61, %v2554_v34 }
 0x4be   : > { %4320 = vst [vmem:[%s6766_s12 + $0x6c8] sm:$0xff] %v2723_v33 }
 0x4c1   : > { %v2555_v24 = vpop.f32.mrf.mxu2  ;;  %v2220_v40 = vpop.f32.mrf.mxu0 }
 0x4c2   : > { %v2556_v26 = vadd.f32 %v2555_v24, %v2387_v27  ;;  %v2389_v28 = vpop.f32.mrf.mxu1 }
 0x4c3   : > { %v2724_v43 = vpop.f32.mrf.mxu3  ;;  %v2390_v35 = vadd.f32 %v2389_v28, %v2220_v40 }
 0x4c4   : > { %v2725_v62 = vadd.f32 %v2724_v43, %v2556_v26  ;;  %2775 = vmatmul.bf16.gmra.mxu0 %v6663_v48 }
 0x4c5   : > { %2944 = vmatmul.bf16.gmra.mxu1 %v6665_v49 }
 0x4c6   : > { %4324 = vst [vmem:[%s6766_s12 + $0x6e8] sm:$0xff] %v2725_v62  ;;  %3113 = vmatmul.bf16.gmra.mxu2 %v6667_v50 }
 0x4c8   : > { %3282 = vmatmul.bf16.gmra.mxu3 %v6669_v51 }
 0x4c9   : > { %v2558_v29 = vpop.f32.mrf.mxu2  ;;  %v2222_v46 = vpop.f32.mrf.mxu0 }
 0x4ca   : > { %v2559_v60 = vadd.f32 %v2558_v29, %v2390_v35  ;;  %v2391_v44 = vpop.f32.mrf.mxu1 }
 0x4cb   : > { %v2727_v32 = vpop.f32.mrf.mxu3  ;;  %v2392_v41 = vadd.f32 %v2391_v44, %v2222_v46 }
 0x4cc   : > { %v2728_v31 = vadd.f32 %v2727_v32, %v2559_v60 }
 0x4ce   : > { %4328 = vst [vmem:[%s6766_s12 + $0x708] sm:$0xff] %v2728_v31 }
 0x4d1   : > { %v2560_v34 = vpop.f32.mrf.mxu2  ;;  %v2225_v30 = vpop.f32.mrf.mxu0 }
 0x4d2   : > { %v2561_v61 = vadd.f32 %v2560_v34, %v2392_v41  ;;  %v2394_v33 = vpop.f32.mrf.mxu1 }
 0x4d3   : > { %v2729_v42 = vpop.f32.mrf.mxu3  ;;  %v2395_v24 = vadd.f32 %v2394_v33, %v2225_v30  ;;  %v5925_v30 = vld [vmem:[%s6489_s4 + $0x3ac] sm:$0xf] }
 0x4d4   : > { %v2730_v27 = vadd.f32 %v2729_v42, %v2561_v61  ;;  %2780 = vmatmul.bf16.gmra.mxu0 %v6683_v4  ;;  %v5759_v61 = vld [vmem:[%s6489_s4 + $0x3a8] sm:$0xf]  ;;  %v5927_v42 = vld [vmem:[%s6489_s4 + $0x3b4] sm:$0xf0] }
 0x4d5   : > { %2949 = vmatmul.bf16.gmra.mxu1 %v6685_v5  ;;  %v5760_v33 = vor.u32 %v5927_v42, %v5759_v61 }
 0x4d6   : > { %4332 = vst [vmem:[%s6766_s12 + $0x728] sm:$0xff] %v2730_v27  ;;  %3118 = vmatmul.bf16.gmra.mxu2 %v6687_v6  ;;  %v5761_v27 = vld [vmem:[%s6489_s4 + $0x3b8] sm:$0xf0] }
 0x4d7   : > { %3763 = vmatpush.bf16.xpose.msrb.mxu2 %v5760_v33 }
 0x4d8   : > { %3287 = vmatmul.bf16.gmra.mxu3 %v6689_v7 }
 0x4d9   : > { %v2563_v26 = vpop.f32.mrf.mxu2  ;;  %v2227_v28 = vpop.f32.mrf.mxu0 }
 0x4da   : > { %v2564_v43 = vadd.f32 %v2563_v26, %v2395_v24  ;;  %v2396_v62 = vpop.f32.mrf.mxu1  ;;  %v5764_v26 = vor.u32 %v5925_v30, %v5761_v27 }
 0x4db   : > { %v2732_v40 = vpop.f32.mrf.mxu3  ;;  %v2397_v29 = vadd.f32 %v2396_v62, %v2227_v28 }
 0x4dc   : > { %v2733_v35 = vadd.f32 %v2732_v40, %v2564_v43  ;;  %3932 = vmatpush.bf16.xpose.msrb.mxu3 %v5764_v26 }
 0x4de   : > { %4336 = vst [vmem:[%s6766_s12 + $0x748] sm:$0xff] %v2733_v35 }
 0x4e1   : > { %v2565_v60 = vpop.f32.mrf.mxu2  ;;  %v2230_v44 = vpop.f32.mrf.mxu0 }
 0x4e2   : > { %v2566_v32 = vadd.f32 %v2565_v60, %v2397_v29  ;;  %v2399_v31 = vpop.f32.mrf.mxu1  ;;  %v5751_v29 = vld [vmem:[%s6489_s4 + $0x3a0] sm:$0xf]  ;;  %v5926_v60 = vld [vmem:[%s6489_s4 + $0x3ac] sm:$0xf0] }
 0x4e3   : > { %v2734_v46 = vpop.f32.mrf.mxu3  ;;  %v2400_v34 = vadd.f32 %v2399_v31, %v2230_v44  ;;  %v5753_v44 = vld [vmem:[%s6489_s4 + $0x3b0] sm:$0xf0] }
 0x4e4   : > { %v2735_v41 = vadd.f32 %v2734_v46, %v2566_v32  ;;  %2785 = vmatmul.bf16.gmra.mxu0 %v6703_v20  ;;  %v5752_v32 = vor.u32 %v5926_v60, %v5751_v29  ;;  %v5924_v46 = vld [vmem:[%s6489_s4 + $0x3a4] sm:$0xf] }
 0x4e5   : > { %2954 = vmatmul.bf16.gmra.mxu1 %v6705_v21 }
 0x4e6   : > { %4340 = vst [vmem:[%s6766_s12 + $0x768] sm:$0xff] %v2735_v41  ;;  %3123 = vmatmul.bf16.gmra.mxu2 %v6707_v22  ;;  %v5756_v41 = vor.u32 %v5924_v46, %v5753_v44  ;;  %3425 = vmatpush.bf16.xpose.msrb.mxu0 %v5752_v32 }
 0x4e8   : > { %3292 = vmatmul.bf16.gmra.mxu3 %v6709_v23  ;;  %3594 = vmatpush.bf16.xpose.msrb.mxu1 %v5756_v41 }
 0x4e9   : > { %v2568_v24 = vpop.f32.mrf.mxu2  ;;  %v2232_v28 = vpop.f32.mrf.mxu0 }
 0x4ea   : > { %v2569_v43 = vadd.f32 %v2568_v24, %v2400_v34  ;;  %v2401_v62 = vpop.f32.mrf.mxu1 }
 0x4eb   : > { %v2737_v40 = vpop.f32.mrf.mxu3  ;;  %v2402_v31 = vadd.f32 %v2401_v62, %v2232_v28 }
 0x4ec   : > { %v2738_v35 = vadd.f32 %v2737_v40, %v2569_v43 }
 0x4ee   : > { %4344 = vst [vmem:[%s6766_s12 + $0x788] sm:$0xff] %v2738_v35 }
 0x4f1   : > { %v2570_v61 = vpop.f32.mrf.mxu2  ;;  %v2235_v34 = vpop.f32.mrf.mxu0 }
 0x4f2   : > { %v2571_v42 = vadd.f32 %v2570_v61, %v2402_v31  ;;  %v2404_v33 = vpop.f32.mrf.mxu1 }
 0x4f3   : > { %v2739_v30 = vpop.f32.mrf.mxu3  ;;  %v2405_v24 = vadd.f32 %v2404_v33, %v2235_v34 }
 0x4f4   : > { %v2740_v27 = vadd.f32 %v2739_v30, %v2571_v42  ;;  %2790 = vmatmul.bf16.gmra.mxu0 %v6731_v56 }
 0x4f5   : > { %2959 = vmatmul.bf16.gmra.mxu1 %v6733_v57 }
 0x4f6   : > { %4348 = vst [vmem:[%s6766_s12 + $0x7a8] sm:$0xff] %v2740_v27  ;;  %3128 = vmatmul.bf16.gmra.mxu2 %v6735_v58 }
 0x4f8   : > { %3297 = vmatmul.bf16.gmra.mxu3 %v6737_v59 }
 0x4f9   : > { %v2573_v26 = vpop.f32.mrf.mxu2  ;;  %v2237_v28 = vpop.f32.mrf.mxu0 }
 0x4fa   : > { %v2574_v43 = vadd.f32 %v2573_v26, %v2405_v24  ;;  %v2406_v62 = vpop.f32.mrf.mxu1 }
 0x4fb   : > { %v2742_v40 = vpop.f32.mrf.mxu3  ;;  %v2407_v29 = vadd.f32 %v2406_v62, %v2237_v28 }
 0x4fc   : > { %v2743_v35 = vadd.f32 %v2742_v40, %v2574_v43 }
 0x4fe   : > { %4352 = vst [vmem:[%s6766_s12 + $0x7c8] sm:$0xff] %v2743_v35 }
 0x501   : > { %v2575_v60 = vpop.f32.mrf.mxu2  ;;  %v2756_v44 = vpop.f32.mrf.mxu0 }
 0x502   : > { %v2576_v32 = vadd.f32 %v2575_v60, %v2407_v29  ;;  %v2925_v31 = vpop.f32.mrf.mxu1 }
 0x503   : > { %v2744_v46 = vpop.f32.mrf.mxu3  ;;  %v2926_v61 = vadd.f32 %v2925_v31, %v2756_v44 }
 0x504   : > { %v2745_v41 = vadd.f32 %v2744_v46, %v2576_v32  ;;  %2795 = vmatmul.bf16.gmra.mxu0 %v6751_v16 }
 0x505   : > { %2964 = vmatmul.bf16.gmra.mxu1 %v6753_v18 }
 0x506   : > { %4356 = vst [vmem:[%s6766_s12 + $0x7e8] sm:$0xff] %v2745_v41  ;;  %3133 = vmatmul.bf16.gmra.mxu2 %v6755_v19 }
 0x508   : > { %3302 = vmatmul.bf16.gmra.mxu3 %v6757_v25 }
 0x509   : > { %v3094_v42 = vpop.f32.mrf.mxu2  ;;  %v2758_v33 = vpop.f32.mrf.mxu0 }
 0x50a   : > { %v3095_v30 = vadd.f32 %v3094_v42, %v2926_v61  ;;  %v2927_v27 = vpop.f32.mrf.mxu1 }
 0x50b   : > { %v3263_v34 = vpop.f32.mrf.mxu3  ;;  %v2928_v26 = vadd.f32 %v2927_v27, %v2758_v33 }
 0x50c   : > { %v3264_v24 = vadd.f32 %v3263_v34, %v3095_v30 }
 0x50e   : > { %4105 = vst [vmem:[%s6766_s12 + $0x10] sm:$0xff] %v3264_v24 }
 0x511   : > { %v3096_v43 = vpop.f32.mrf.mxu2  ;;  %v2761_v62 = vpop.f32.mrf.mxu0 }
 0x512   : > { %v3097_v40 = vadd.f32 %v3096_v43, %v2928_v26  ;;  %v2930_v35 = vpop.f32.mrf.mxu1  ;;  %v8468_v43 = vld [vmem:[#allocation17_spill] sm:$0xff] }
 0x513   : > { %v3265_v28 = vpop.f32.mrf.mxu3  ;;  %v2931_v60 = vadd.f32 %v2930_v35, %v2761_v62  ;;  %v8470_v62 = vld [vmem:[#allocation19_spill] sm:$0xff]  ;;  %v8471_v35 = vld [vmem:[#allocation20_spill] sm:$0xff] }
 0x514   : > { %v3266_v29 = vadd.f32 %v3265_v28, %v3097_v40  ;;  %2800 = vmatmul.bf16.gmra.mxu0 %v6777_v47  ;;  %v8469_v28 = vld [vmem:[#allocation18_spill] sm:$0xff] }
 0x515   : > { %2969 = vmatmul.bf16.gmra.mxu1 %v6779_v63 }
 0x516   : > { %4109 = vst [vmem:[%s6766_s12 + $0x30] sm:$0xff] %v3266_v29  ;;  %3138 = vmatmul.bf16.gmra.mxu2 %v6781_v8  ;;  %v5743_v29 = vld [vmem:[%s6489_s4 + $0x388] sm:$0xf] }
 0x518   : > { %3307 = vmatmul.bf16.gmra.mxu3 %v6783_v10 }
 0x519   : > { %v3099_v32 = vpop.f32.mrf.mxu2  ;;  %v2763_v31 = vpop.f32.mrf.mxu0 }
 0x51a   : > { %v3100_v46 = vadd.f32 %v3099_v32, %v2931_v60  ;;  %v2932_v41 = vpop.f32.mrf.mxu1  ;;  %v5923_v60 = vld [vmem:[%s6489_s4 + $0x394] sm:$0xf0]  ;;  %v5921_v32 = vld [vmem:[%s6489_s4 + $0x38c] sm:$0xf] }
 0x51b   : > { %v3268_v44 = vpop.f32.mrf.mxu3  ;;  %v2933_v42 = vadd.f32 %v2932_v41, %v2763_v31 }
 0x51c   : > { %v3269_v61 = vadd.f32 %v3268_v44, %v3100_v46  ;;  %v5744_v46 = vor.u32 %v5923_v60, %v5743_v29  ;;  %v5745_v44 = vld [vmem:[%s6489_s4 + $0x398] sm:$0xf0] }
 0x51d   : > { %v5748_v41 = vor.u32 %v5921_v32, %v5745_v44 }
 0x51e   : > { %4113 = vst [vmem:[%s6766_s12 + $0x50] sm:$0xff] %v3269_v61  ;;  %3764 = vmatpush.bf16.xpose.msrb.mxu2 %v5744_v46 }
 0x51f   : > { %3933 = vmatpush.bf16.xpose.msrb.mxu3 %v5748_v41 }
 0x521   : > { %v3101_v30 = vpop.f32.mrf.mxu2  ;;  %v2766_v27 = vpop.f32.mrf.mxu0 }
 0x522   : > { %v3102_v34 = vadd.f32 %v3101_v30, %v2933_v42  ;;  %v2935_v24 = vpop.f32.mrf.mxu1 }
 0x523   : > { %v3270_v33 = vpop.f32.mrf.mxu3  ;;  %v2936_v40 = vadd.f32 %v2935_v24, %v2766_v27  ;;  %v5735_v27 = vld [vmem:[%s6489_s4 + $0x380] sm:$0xf]  ;;  %v5922_v24 = vld [vmem:[%s6489_s4 + $0x38c] sm:$0xf0] }
 0x524   : > { %v3271_v26 = vadd.f32 %v3270_v33, %v3102_v34  ;;  %2805 = vmatmul.bf16.gmra.mxu0 %v8468_v43 }
 0x525   : > { %2974 = vmatmul.bf16.gmra.mxu1 %v8469_v28 }
 0x526   : > { %4117 = vst [vmem:[%s6766_s12 + $0x70] sm:$0xff] %v3271_v26  ;;  %3143 = vmatmul.bf16.gmra.mxu2 %v8470_v62  ;;  %v5736_v26 = vor.u32 %v5922_v24, %v5735_v27  ;;  %v5737_v62 = vld [vmem:[%s6489_s4 + $0x390] sm:$0xf0] }
 0x528   : > { %3312 = vmatmul.bf16.gmra.mxu3 %v8471_v35  ;;  %v5920_v35 = vld [vmem:[%s6489_s4 + $0x384] sm:$0xf]  ;;  %3426 = vmatpush.bf16.xpose.msrb.mxu0 %v5736_v26 }
 0x529   : > { %v3104_v31 = vpop.f32.mrf.mxu2  ;;  %v2768_v30 = vpop.f32.mrf.mxu0  ;;  %v5740_v29 = vor.u32 %v5920_v35, %v5737_v62 }
 0x52a   : > { %v3105_v61 = vadd.f32 %v3104_v31, %v2936_v40  ;;  %v2937_v34 = vpop.f32.mrf.mxu1  ;;  %v8472_v31 = vld [vmem:[#allocation21_spill] sm:$0xff] }
 0x52b   : > { %v3273_v42 = vpop.f32.mrf.mxu3  ;;  %v2938_v28 = vadd.f32 %v2937_v34, %v2768_v30  ;;  %3595 = vmatpush.bf16.xpose.msrb.mxu1 %v5740_v29 }
 0x52c   : > { %v3274_v33 = vadd.f32 %v3273_v42, %v3105_v61  ;;  %v8473_v61 = vld [vmem:[#allocation22_spill] sm:$0xff]  ;;  %v8474_v42 = vld [vmem:[#allocation23_spill] sm:$0xff] }
 0x52e   : > { %4121 = vst [vmem:[%s6766_s12 + $0x90] sm:$0xff] %v3274_v33  ;;  %v8475_v33 = vld [vmem:[#allocation24_spill] sm:$0xff] }
 0x531   : > { %v3106_v60 = vpop.f32.mrf.mxu2  ;;  %v2771_v40 = vpop.f32.mrf.mxu0 }
 0x532   : > { %v3107_v43 = vadd.f32 %v3106_v60, %v2938_v28  ;;  %v2940_v46 = vpop.f32.mrf.mxu1 }
 0x533   : > { %v3275_v32 = vpop.f32.mrf.mxu3  ;;  %v2941_v41 = vadd.f32 %v2940_v46, %v2771_v40  ;;  %v8476_v46 = vld [vmem:[#allocation25_spill] sm:$0xff] }
 0x534   : > { %v3276_v44 = vadd.f32 %v3275_v32, %v3107_v43  ;;  %2810 = vmatmul.bf16.gmra.mxu0 %v8472_v31 }
 0x535   : > { %2979 = vmatmul.bf16.gmra.mxu1 %v8473_v61 }
 0x536   : > { %4125 = vst [vmem:[%s6766_s12 + $0xb0] sm:$0xff] %v3276_v44  ;;  %3148 = vmatmul.bf16.gmra.mxu2 %v8474_v42  ;;  %v5721_v42 = vld [vmem:[%s6489_s4 + $0x370] sm:$0xf0] }
 0x538   : > { %3317 = vmatmul.bf16.gmra.mxu3 %v8475_v33  ;;  %v8477_v33 = vld [vmem:[#allocation26_spill] sm:$0xff] }
 0x539   : > { %v3109_v62 = vpop.f32.mrf.mxu2  ;;  %v2773_v30 = vpop.f32.mrf.mxu0 }
 0x53a   : > { %v3110_v35 = vadd.f32 %v3109_v62, %v2941_v41  ;;  %v2942_v34 = vpop.f32.mrf.mxu1  ;;  %v8478_v41 = vld [vmem:[#allocation27_spill] sm:$0xff]  ;;  %v8479_v62 = vld [vmem:[#allocation28_spill] sm:$0xff] }
 0x53b   : > { %v3278_v28 = vpop.f32.mrf.mxu3  ;;  %v2943_v24 = vadd.f32 %v2942_v34, %v2773_v30 }
 0x53c   : > { %v3279_v27 = vadd.f32 %v3278_v28, %v3110_v35 }
 0x53e   : > { %4129 = vst [vmem:[%s6766_s12 + $0xd0] sm:$0xff] %v3279_v27 }
 0x541   : > { %v3111_v43 = vpop.f32.mrf.mxu2  ;;  %v2776_v60 = vpop.f32.mrf.mxu0 }
 0x542   : > { %v3112_v26 = vadd.f32 %v3111_v43, %v2943_v24  ;;  %v2945_v32 = vpop.f32.mrf.mxu1 }
 0x543   : > { %v3280_v29 = vpop.f32.mrf.mxu3  ;;  %v2946_v44 = vadd.f32 %v2945_v32, %v2776_v60 }
 0x544   : > { %v3281_v40 = vadd.f32 %v3280_v29, %v3112_v26  ;;  %2815 = vmatmul.bf16.gmra.mxu0 %v8476_v46 }
 0x545   : > { %2984 = vmatmul.bf16.gmra.mxu1 %v8477_v33  ;;  %v8480_v33 = vld [vmem:[#allocation29_spill] sm:$0xff] }
 0x546   : > { %4133 = vst [vmem:[%s6766_s12 + $0xf0] sm:$0xff] %v3281_v40  ;;  %3153 = vmatmul.bf16.gmra.mxu2 %v8478_v41  ;;  %v8481_v41 = vld [vmem:[#allocation30_spill] sm:$0xff] }
 0x548   : > { %3322 = vmatmul.bf16.gmra.mxu3 %v8479_v62 }
 0x549   : > { %v3114_v35 = vpop.f32.mrf.mxu2  ;;  %v2778_v34 = vpop.f32.mrf.mxu0 }
 0x54a   : > { %v3115_v28 = vadd.f32 %v3114_v35, %v2946_v44  ;;  %v2947_v27 = vpop.f32.mrf.mxu1  ;;  %v8482_v44 = vld [vmem:[#allocation31_spill] sm:$0xff]  ;;  %v8483_v35 = vld [vmem:[#allocation32_spill] sm:$0xff] }
 0x54b   : > { %v3283_v30 = vpop.f32.mrf.mxu3  ;;  %v2948_v43 = vadd.f32 %v2947_v27, %v2778_v34 }
 0x54c   : > { %v3284_v24 = vadd.f32 %v3283_v30, %v3115_v28 }
 0x54e   : > { %4137 = vst [vmem:[%s6766_s12 + $0x110] sm:$0xff] %v3284_v24 }
 0x551   : > { %v3116_v26 = vpop.f32.mrf.mxu2  ;;  %v2781_v60 = vpop.f32.mrf.mxu0 }
 0x552   : > { %v3117_v29 = vadd.f32 %v3116_v26, %v2948_v43  ;;  %v2950_v32 = vpop.f32.mrf.mxu1 }
 0x553   : > { %v3285_v46 = vpop.f32.mrf.mxu3  ;;  %v2951_v62 = vadd.f32 %v2950_v32, %v2781_v60 }
 0x554   : > { %v3286_v40 = vadd.f32 %v3285_v46, %v3117_v29  ;;  %2820 = vmatmul.bf16.gmra.mxu0 %v8480_v33  ;;  %v5916_v33 = vld [vmem:[%s6489_s4 + $0x364] sm:$0xf] }
 0x555   : > { %2989 = vmatmul.bf16.gmra.mxu1 %v8481_v41  ;;  %v8486_v41 = vld [vmem:[#allocation35_spill] sm:$0xff] }
 0x556   : > { %4141 = vst [vmem:[%s6766_s12 + $0x130] sm:$0xff] %v3286_v40  ;;  %3158 = vmatmul.bf16.gmra.mxu2 %v8482_v44 }
 0x558   : > { %3327 = vmatmul.bf16.gmra.mxu3 %v8483_v35  ;;  %v8484_v35 = vld [vmem:[#allocation33_spill] sm:$0xff] }
 0x559   : > { %v3119_v28 = vpop.f32.mrf.mxu2  ;;  %v2783_v27 = vpop.f32.mrf.mxu0 }
 0x55a   : > { %v3120_v30 = vadd.f32 %v3119_v28, %v2951_v62  ;;  %v2952_v24 = vpop.f32.mrf.mxu1  ;;  %v8485_v28 = vld [vmem:[#allocation34_spill] sm:$0xff] }
 0x55b   : > { %v3288_v34 = vpop.f32.mrf.mxu3  ;;  %v2953_v46 = vadd.f32 %v2952_v24, %v2783_v27  ;;  %v5919_v27 = vld [vmem:[%s6489_s4 + $0x374] sm:$0xf0]  ;;  %v5917_v24 = vld [vmem:[%s6489_s4 + $0x36c] sm:$0xf] }
 0x55c   : > { %v3289_v43 = vadd.f32 %v3288_v34, %v3120_v30  ;;  %v8487_v30 = vld [vmem:[#allocation36_spill] sm:$0xff]  ;;  %v5727_v34 = vld [vmem:[%s6489_s4 + $0x368] sm:$0xf] }
 0x55e   : > { %4145 = vst [vmem:[%s6766_s12 + $0x150] sm:$0xff] %v3289_v43  ;;  %v5728_v43 = vor.u32 %v5919_v27, %v5727_v34  ;;  %v5724_v34 = vor.u32 %v5916_v33, %v5721_v42 }
 0x560   : > { %3765 = vmatpush.bf16.xpose.msrb.mxu2 %v5728_v43  ;;  %3596 = vmatpush.bf16.xpose.msrb.mxu1 %v5724_v34 }
 0x561   : > { %v3121_v26 = vpop.f32.mrf.mxu2  ;;  %v2786_v32 = vpop.f32.mrf.mxu0 }
 0x562   : > { %v3122_v29 = vadd.f32 %v3121_v26, %v2953_v46  ;;  %v2955_v40 = vpop.f32.mrf.mxu1  ;;  %v5729_v46 = vld [vmem:[%s6489_s4 + $0x378] sm:$0xf0] }
 0x563   : > { %v3290_v60 = vpop.f32.mrf.mxu3  ;;  %v2956_v62 = vadd.f32 %v2955_v40, %v2786_v32 }
 0x564   : > { %v3291_v44 = vadd.f32 %v3290_v60, %v3122_v29  ;;  %2825 = vmatmul.bf16.gmra.mxu0 %v8484_v35  ;;  %v5732_v29 = vor.u32 %v5917_v24, %v5729_v46 }
 0x565   : > { %2994 = vmatmul.bf16.gmra.mxu1 %v8485_v28  ;;  %v5918_v28 = vld [vmem:[%s6489_s4 + $0x36c] sm:$0xf0] }
 0x566   : > { %4149 = vst [vmem:[%s6766_s12 + $0x170] sm:$0xff] %v3291_v44  ;;  %3163 = vmatmul.bf16.gmra.mxu2 %v8486_v41  ;;  %3934 = vmatpush.bf16.xpose.msrb.mxu3 %v5732_v29  ;;  %v8489_v29 = vld [vmem:[#allocation38_spill] sm:$0xff] }
 0x568   : > { %3332 = vmatmul.bf16.gmra.mxu3 %v8487_v30  ;;  %v5719_v30 = vld [vmem:[%s6489_s4 + $0x360] sm:$0xf] }
 0x569   : > { %v3124_v26 = vpop.f32.mrf.mxu2  ;;  %v2788_v32 = vpop.f32.mrf.mxu0  ;;  %v5720_v35 = vor.u32 %v5918_v28, %v5719_v30  ;;  %v8490_v28 = vld [vmem:[#allocation39_spill] sm:$0xff]  ;;  %v8491_v30 = vld [vmem:[#allocation40_spill] sm:$0xff] }
 0x56a   : > { %v3125_v44 = vadd.f32 %v3124_v26, %v2956_v62  ;;  %v2957_v40 = vpop.f32.mrf.mxu1  ;;  %v8488_v26 = vld [vmem:[#allocation37_spill] sm:$0xff] }
 0x56b   : > { %v3293_v60 = vpop.f32.mrf.mxu3  ;;  %v2958_v61 = vadd.f32 %v2957_v40, %v2788_v32  ;;  %3427 = vmatpush.bf16.xpose.msrb.mxu0 %v5720_v35 }
 0x56c   : > { %v3294_v41 = vadd.f32 %v3293_v60, %v3125_v44 }
 0x56e   : > { %4153 = vst [vmem:[%s6766_s12 + $0x190] sm:$0xff] %v3294_v41 }
 0x571   : > { %v3126_v27 = vpop.f32.mrf.mxu2  ;;  %v2791_v62 = vpop.f32.mrf.mxu0 }
 0x572   : > { %v3127_v31 = vadd.f32 %v3126_v27, %v2958_v61  ;;  %v2960_v43 = vpop.f32.mrf.mxu1 }
 0x573   : > { %v3295_v24 = vpop.f32.mrf.mxu3  ;;  %v2961_v41 = vadd.f32 %v2960_v43, %v2791_v62  ;;  %v8492_v43 = vld [vmem:[#allocation41_spill] sm:$0xff] }
 0x574   : > { %v3296_v46 = vadd.f32 %v3295_v24, %v3127_v31  ;;  %2830 = vmatmul.bf16.gmra.mxu0 %v8488_v26 }
 0x575   : > { %2999 = vmatmul.bf16.gmra.mxu1 %v8489_v29 }
 0x576   : > { %4157 = vst [vmem:[%s6766_s12 + $0x1b0] sm:$0xff] %v3296_v46  ;;  %3168 = vmatmul.bf16.gmra.mxu2 %v8490_v28  ;;  %v5705_v28 = vld [vmem:[%s6489_s4 + $0x350] sm:$0xf0] }
 0x578   : > { %3337 = vmatmul.bf16.gmra.mxu3 %v8491_v30  ;;  %v8493_v30 = vld [vmem:[#allocation42_spill] sm:$0xff] }
 0x579   : > { %v3129_v42 = vpop.f32.mrf.mxu2  ;;  %v2793_v35 = vpop.f32.mrf.mxu0 }
 0x57a   : > { %v3130_v33 = vadd.f32 %v3129_v42, %v2961_v41  ;;  %v2962_v44 = vpop.f32.mrf.mxu1  ;;  %v8494_v41 = vld [vmem:[#allocation43_spill] sm:$0xff]  ;;  %v8495_v42 = vld [vmem:[#allocation44_spill] sm:$0xff] }
 0x57b   : > { %v3298_v61 = vpop.f32.mrf.mxu3  ;;  %v2963_v32 = vadd.f32 %v2962_v44, %v2793_v35 }
 0x57c   : > { %v3299_v60 = vadd.f32 %v3298_v61, %v3130_v33 }
 0x57e   : > { %4161 = vst [vmem:[%s6766_s12 + $0x1d0] sm:$0xff] %v3299_v60 }
 0x581   : > { %v3131_v31 = vpop.f32.mrf.mxu2  ;;  %v2796_v27 = vpop.f32.mrf.mxu0 }
 0x582   : > { %v3132_v40 = vadd.f32 %v3131_v31, %v2963_v32  ;;  %v2965_v24 = vpop.f32.mrf.mxu1 }
 0x583   : > { %v3300_v34 = vpop.f32.mrf.mxu3  ;;  %v2966_v46 = vadd.f32 %v2965_v24, %v2796_v27 }
 0x584   : > { %v3301_v62 = vadd.f32 %v3300_v34, %v3132_v40  ;;  %2835 = vmatmul.bf16.gmra.mxu0 %v8492_v43 }
 0x585   : > { %3004 = vmatmul.bf16.gmra.mxu1 %v8493_v30  ;;  %v8496_v30 = vld [vmem:[#allocation45_spill] sm:$0xff] }
 0x586   : > { %4165 = vst [vmem:[%s6766_s12 + $0x1f0] sm:$0xff] %v3301_v62  ;;  %3173 = vmatmul.bf16.gmra.mxu2 %v8494_v41  ;;  %v8497_v41 = vld [vmem:[#allocation46_spill] sm:$0xff] }
 0x588   : > { %3342 = vmatmul.bf16.gmra.mxu3 %v8495_v42 }
 0x589   : > { %v3134_v33 = vpop.f32.mrf.mxu2  ;;  %v2798_v44 = vpop.f32.mrf.mxu0 }
 0x58a   : > { %v3135_v61 = vadd.f32 %v3134_v33, %v2966_v46  ;;  %v2967_v60 = vpop.f32.mrf.mxu1  ;;  %v8498_v46 = vld [vmem:[#allocation47_spill] sm:$0xff]  ;;  %v8499_v33 = vld [vmem:[#allocation48_spill] sm:$0xff] }
 0x58b   : > { %v3303_v35 = vpop.f32.mrf.mxu3  ;;  %v2968_v31 = vadd.f32 %v2967_v60, %v2798_v44 }
 0x58c   : > { %v3304_v32 = vadd.f32 %v3303_v35, %v3135_v61 }
 0x58e   : > { %4169 = vst [vmem:[%s6766_s12 + $0x210] sm:$0xff] %v3304_v32 }
 0x591   : > { %v3136_v40 = vpop.f32.mrf.mxu2  ;;  %v2801_v27 = vpop.f32.mrf.mxu0 }
 0x592   : > { %v3137_v34 = vadd.f32 %v3136_v40, %v2968_v31  ;;  %v2970_v24 = vpop.f32.mrf.mxu1 }
 0x593   : > { %v3305_v43 = vpop.f32.mrf.mxu3  ;;  %v2971_v42 = vadd.f32 %v2970_v24, %v2801_v27 }
 0x594   : > { %v3306_v62 = vadd.f32 %v3305_v43, %v3137_v34  ;;  %2840 = vmatmul.bf16.gmra.mxu0 %v8496_v30  ;;  %v5912_v30 = vld [vmem:[%s6489_s4 + $0x344] sm:$0xf] }
 0x595   : > { %3009 = vmatmul.bf16.gmra.mxu1 %v8497_v41  ;;  %v8502_v41 = vld [vmem:[#allocation51_spill] sm:$0xff] }
 0x596   : > { %4173 = vst [vmem:[%s6766_s12 + $0x230] sm:$0xff] %v3306_v62  ;;  %3178 = vmatmul.bf16.gmra.mxu2 %v8498_v46 }
 0x598   : > { %3347 = vmatmul.bf16.gmra.mxu3 %v8499_v33  ;;  %v8500_v33 = vld [vmem:[#allocation49_spill] sm:$0xff] }
 0x599   : > { %v3139_v61 = vpop.f32.mrf.mxu2  ;;  %v2803_v60 = vpop.f32.mrf.mxu0 }
 0x59a   : > { %v3140_v35 = vadd.f32 %v3139_v61, %v2971_v42  ;;  %v2972_v32 = vpop.f32.mrf.mxu1  ;;  %v8501_v61 = vld [vmem:[#allocation50_spill] sm:$0xff] }
 0x59b   : > { %v3308_v44 = vpop.f32.mrf.mxu3  ;;  %v2973_v43 = vadd.f32 %v2972_v32, %v2803_v60  ;;  %v5915_v60 = vld [vmem:[%s6489_s4 + $0x354] sm:$0xf0]  ;;  %v5913_v32 = vld [vmem:[%s6489_s4 + $0x34c] sm:$0xf] }
 0x59c   : > { %v3309_v31 = vadd.f32 %v3308_v44, %v3140_v35  ;;  %v8503_v35 = vld [vmem:[#allocation52_spill] sm:$0xff]  ;;  %v5711_v44 = vld [vmem:[%s6489_s4 + $0x348] sm:$0xf] }
 0x59e   : > { %4177 = vst [vmem:[%s6766_s12 + $0x250] sm:$0xff] %v3309_v31  ;;  %v5712_v31 = vor.u32 %v5915_v60, %v5711_v44  ;;  %v5708_v44 = vor.u32 %v5912_v30, %v5705_v28 }
 0x5a0   : > { %3766 = vmatpush.bf16.xpose.msrb.mxu2 %v5712_v31  ;;  %3597 = vmatpush.bf16.xpose.msrb.mxu1 %v5708_v44 }
 0x5a1   : > { %v3141_v40 = vpop.f32.mrf.mxu2  ;;  %v2806_v24 = vpop.f32.mrf.mxu0 }
 0x5a2   : > { %v3142_v34 = vadd.f32 %v3141_v40, %v2973_v43  ;;  %v2975_v62 = vpop.f32.mrf.mxu1  ;;  %v5713_v43 = vld [vmem:[%s6489_s4 + $0x358] sm:$0xf0] }
 0x5a3   : > { %v3310_v27 = vpop.f32.mrf.mxu3  ;;  %v2976_v42 = vadd.f32 %v2975_v62, %v2806_v24 }
 0x5a4   : > { %v3311_v46 = vadd.f32 %v3310_v27, %v3142_v34  ;;  %2845 = vmatmul.bf16.gmra.mxu0 %v8500_v33  ;;  %v5716_v34 = vor.u32 %v5913_v32, %v5713_v43 }
 0x5a5   : > { %3014 = vmatmul.bf16.gmra.mxu1 %v8501_v61  ;;  %v5914_v61 = vld [vmem:[%s6489_s4 + $0x34c] sm:$0xf0] }
 0x5a6   : > { %4181 = vst [vmem:[%s6766_s12 + $0x270] sm:$0xff] %v3311_v46  ;;  %3183 = vmatmul.bf16.gmra.mxu2 %v8502_v41  ;;  %3935 = vmatpush.bf16.xpose.msrb.mxu3 %v5716_v34  ;;  %v8505_v34 = vld [vmem:[#allocation54_spill] sm:$0xff] }
 0x5a8   : > { %3352 = vmatmul.bf16.gmra.mxu3 %v8503_v35  ;;  %v5703_v35 = vld [vmem:[%s6489_s4 + $0x340] sm:$0xf] }
 0x5a9   : > { %v3144_v40 = vpop.f32.mrf.mxu2  ;;  %v2808_v24 = vpop.f32.mrf.mxu0  ;;  %v5704_v33 = vor.u32 %v5914_v61, %v5703_v35  ;;  %v8506_v61 = vld [vmem:[#allocation55_spill] sm:$0xff]  ;;  %v8507_v35 = vld [vmem:[#allocation56_spill] sm:$0xff] }
 0x5aa   : > { %v3145_v46 = vadd.f32 %v3144_v40, %v2976_v42  ;;  %v2977_v62 = vpop.f32.mrf.mxu1  ;;  %v8504_v40 = vld [vmem:[#allocation53_spill] sm:$0xff] }
 0x5ab   : > { %v3313_v27 = vpop.f32.mrf.mxu3  ;;  %v2978_v29 = vadd.f32 %v2977_v62, %v2808_v24  ;;  %3428 = vmatpush.bf16.xpose.msrb.mxu0 %v5704_v33 }
 0x5ac   : > { %v3314_v41 = vadd.f32 %v3313_v27, %v3145_v46 }
 0x5ae   : > { %4185 = vst [vmem:[%s6766_s12 + $0x290] sm:$0xff] %v3314_v41 }
 0x5b1   : > { %v3146_v60 = vpop.f32.mrf.mxu2  ;;  %v2811_v42 = vpop.f32.mrf.mxu0 }
 0x5b2   : > { %v3147_v26 = vadd.f32 %v3146_v60, %v2978_v29  ;;  %v2980_v31 = vpop.f32.mrf.mxu1 }
 0x5b3   : > { %v3315_v32 = vpop.f32.mrf.mxu3  ;;  %v2981_v41 = vadd.f32 %v2980_v31, %v2811_v42  ;;  %v8508_v31 = vld [vmem:[#allocation57_spill] sm:$0xff] }
 0x5b4   : > { %v3316_v43 = vadd.f32 %v3315_v32, %v3147_v26  ;;  %2850 = vmatmul.bf16.gmra.mxu0 %v8504_v40 }
 0x5b5   : > { %3019 = vmatmul.bf16.gmra.mxu1 %v8505_v34 }
 0x5b6   : > { %4189 = vst [vmem:[%s6766_s12 + $0x2b0] sm:$0xff] %v3316_v43  ;;  %3188 = vmatmul.bf16.gmra.mxu2 %v8506_v61  ;;  %v5689_v61 = vld [vmem:[%s6489_s4 + $0x330] sm:$0xf0] }
 0x5b8   : > { %3357 = vmatmul.bf16.gmra.mxu3 %v8507_v35  ;;  %v8509_v35 = vld [vmem:[#allocation58_spill] sm:$0xff] }
 0x5b9   : > { %v3149_v28 = vpop.f32.mrf.mxu2  ;;  %v2813_v33 = vpop.f32.mrf.mxu0 }
 0x5ba   : > { %v3150_v30 = vadd.f32 %v3149_v28, %v2981_v41  ;;  %v2982_v46 = vpop.f32.mrf.mxu1  ;;  %v8510_v41 = vld [vmem:[#allocation59_spill] sm:$0xff]  ;;  %v8511_v28 = vld [vmem:[#allocation60_spill] sm:$0xff] }
 0x5bb   : > { %v3318_v29 = vpop.f32.mrf.mxu3  ;;  %v2983_v24 = vadd.f32 %v2982_v46, %v2813_v33 }
 0x5bc   : > { %v3319_v27 = vadd.f32 %v3318_v29, %v3150_v30 }
 0x5be   : > { %4193 = vst [vmem:[%s6766_s12 + $0x2d0] sm:$0xff] %v3319_v27 }
 0x5c1   : > { %v3151_v26 = vpop.f32.mrf.mxu2  ;;  %v2816_v60 = vpop.f32.mrf.mxu0 }
 0x5c2   : > { %v3152_v62 = vadd.f32 %v3151_v26, %v2983_v24  ;;  %v2985_v32 = vpop.f32.mrf.mxu1 }
 0x5c3   : > { %v3320_v44 = vpop.f32.mrf.mxu3  ;;  %v2986_v43 = vadd.f32 %v2985_v32, %v2816_v60 }
 0x5c4   : > { %v3321_v42 = vadd.f32 %v3320_v44, %v3152_v62  ;;  %2855 = vmatmul.bf16.gmra.mxu0 %v8508_v31 }
 0x5c5   : > { %3024 = vmatmul.bf16.gmra.mxu1 %v8509_v35  ;;  %v8512_v35 = vld [vmem:[#allocation61_spill] sm:$0xff] }
 0x5c6   : > { %4197 = vst [vmem:[%s6766_s12 + $0x2f0] sm:$0xff] %v3321_v42  ;;  %3193 = vmatmul.bf16.gmra.mxu2 %v8510_v41  ;;  %v8513_v41 = vld [vmem:[#allocation62_spill] sm:$0xff] }
 0x5c8   : > { %3362 = vmatmul.bf16.gmra.mxu3 %v8511_v28 }
 0x5c9   : > { %v3154_v30 = vpop.f32.mrf.mxu2  ;;  %v2818_v46 = vpop.f32.mrf.mxu0 }
 0x5ca   : > { %v3155_v29 = vadd.f32 %v3154_v30, %v2986_v43  ;;  %v2987_v27 = vpop.f32.mrf.mxu1  ;;  %v8514_v43 = vld [vmem:[#allocation63_spill] sm:$0xff]  ;;  %v8515_v30 = vld [vmem:[#allocation64_spill] sm:$0xff] }
 0x5cb   : > { %v3323_v33 = vpop.f32.mrf.mxu3  ;;  %v2988_v26 = vadd.f32 %v2987_v27, %v2818_v46 }
 0x5cc   : > { %v3324_v24 = vadd.f32 %v3323_v33, %v3155_v29 }
 0x5ce   : > { %4201 = vst [vmem:[%s6766_s12 + $0x310] sm:$0xff] %v3324_v24 }
 0x5d1   : > { %v3156_v62 = vpop.f32.mrf.mxu2  ;;  %v2821_v60 = vpop.f32.mrf.mxu0 }
 0x5d2   : > { %v3157_v44 = vadd.f32 %v3156_v62, %v2988_v26  ;;  %v2990_v32 = vpop.f32.mrf.mxu1 }
 0x5d3   : > { %v3325_v31 = vpop.f32.mrf.mxu3  ;;  %v2991_v28 = vadd.f32 %v2990_v32, %v2821_v60 }
 0x5d4   : > { %v3326_v42 = vadd.f32 %v3325_v31, %v3157_v44  ;;  %2860 = vmatmul.bf16.gmra.mxu0 %v8512_v35  ;;  %v5908_v35 = vld [vmem:[%s6489_s4 + $0x324] sm:$0xf] }
 0x5d5   : > { %3029 = vmatmul.bf16.gmra.mxu1 %v8513_v41  ;;  %v8518_v41 = vld [vmem:[#allocation67_spill] sm:$0xff] }
 0x5d6   : > { %4205 = vst [vmem:[%s6766_s12 + $0x330] sm:$0xff] %v3326_v42  ;;  %3198 = vmatmul.bf16.gmra.mxu2 %v8514_v43 }
 0x5d8   : > { %3367 = vmatmul.bf16.gmra.mxu3 %v8515_v30  ;;  %v8516_v30 = vld [vmem:[#allocation65_spill] sm:$0xff] }
 0x5d9   : > { %v3159_v29 = vpop.f32.mrf.mxu2  ;;  %v2823_v27 = vpop.f32.mrf.mxu0 }
 0x5da   : > { %v3160_v33 = vadd.f32 %v3159_v29, %v2991_v28  ;;  %v2992_v24 = vpop.f32.mrf.mxu1  ;;  %v8517_v29 = vld [vmem:[#allocation66_spill] sm:$0xff] }
 0x5db   : > { %v3328_v46 = vpop.f32.mrf.mxu3  ;;  %v2993_v31 = vadd.f32 %v2992_v24, %v2823_v27  ;;  %v5911_v27 = vld [vmem:[%s6489_s4 + $0x334] sm:$0xf0]  ;;  %v5909_v24 = vld [vmem:[%s6489_s4 + $0x32c] sm:$0xf] }
 0x5dc   : > { %v3329_v26 = vadd.f32 %v3328_v46, %v3160_v33  ;;  %v8519_v33 = vld [vmem:[#allocation68_spill] sm:$0xff]  ;;  %v5695_v46 = vld [vmem:[%s6489_s4 + $0x328] sm:$0xf] }
 0x5de   : > { %4209 = vst [vmem:[%s6766_s12 + $0x350] sm:$0xff] %v3329_v26  ;;  %v5696_v26 = vor.u32 %v5911_v27, %v5695_v46  ;;  %v5692_v46 = vor.u32 %v5908_v35, %v5689_v61 }
 0x5e0   : > { %3767 = vmatpush.bf16.xpose.msrb.mxu2 %v5696_v26  ;;  %3598 = vmatpush.bf16.xpose.msrb.mxu1 %v5692_v46 }
 0x5e1   : > { %v3161_v62 = vpop.f32.mrf.mxu2  ;;  %v2826_v32 = vpop.f32.mrf.mxu0 }
 0x5e2   : > { %v3162_v44 = vadd.f32 %v3161_v62, %v2993_v31  ;;  %v2995_v42 = vpop.f32.mrf.mxu1  ;;  %v5697_v31 = vld [vmem:[%s6489_s4 + $0x338] sm:$0xf0] }
 0x5e3   : > { %v3330_v60 = vpop.f32.mrf.mxu3  ;;  %v2996_v28 = vadd.f32 %v2995_v42, %v2826_v32 }
 0x5e4   : > { %v3331_v43 = vadd.f32 %v3330_v60, %v3162_v44  ;;  %2865 = vmatmul.bf16.gmra.mxu0 %v8516_v30  ;;  %v5700_v44 = vor.u32 %v5909_v24, %v5697_v31 }
 0x5e5   : > { %3034 = vmatmul.bf16.gmra.mxu1 %v8517_v29  ;;  %v5910_v29 = vld [vmem:[%s6489_s4 + $0x32c] sm:$0xf0] }
 0x5e6   : > { %4213 = vst [vmem:[%s6766_s12 + $0x370] sm:$0xff] %v3331_v43  ;;  %3203 = vmatmul.bf16.gmra.mxu2 %v8518_v41  ;;  %3936 = vmatpush.bf16.xpose.msrb.mxu3 %v5700_v44  ;;  %v8521_v44 = vld [vmem:[#allocation70_spill] sm:$0xff] }
 0x5e8   : > { %3372 = vmatmul.bf16.gmra.mxu3 %v8519_v33  ;;  %v5687_v33 = vld [vmem:[%s6489_s4 + $0x320] sm:$0xf] }
 0x5e9   : > { %v3164_v62 = vpop.f32.mrf.mxu2  ;;  %v2828_v32 = vpop.f32.mrf.mxu0  ;;  %v5688_v30 = vor.u32 %v5910_v29, %v5687_v33  ;;  %v8522_v29 = vld [vmem:[#allocation71_spill] sm:$0xff]  ;;  %v8523_v33 = vld [vmem:[#allocation72_spill] sm:$0xff] }
 0x5ea   : > { %v3165_v43 = vadd.f32 %v3164_v62, %v2996_v28  ;;  %v2997_v42 = vpop.f32.mrf.mxu1  ;;  %v8520_v62 = vld [vmem:[#allocation69_spill] sm:$0xff] }
 0x5eb   : > { %v3333_v60 = vpop.f32.mrf.mxu3  ;;  %v2998_v34 = vadd.f32 %v2997_v42, %v2828_v32  ;;  %3429 = vmatpush.bf16.xpose.msrb.mxu0 %v5688_v30 }
 0x5ec   : > { %v3334_v41 = vadd.f32 %v3333_v60, %v3165_v43 }
 0x5ee   : > { %4217 = vst [vmem:[%s6766_s12 + $0x390] sm:$0xff] %v3334_v41 }
 0x5f1   : > { %v3166_v27 = vpop.f32.mrf.mxu2  ;;  %v2831_v28 = vpop.f32.mrf.mxu0 }
 0x5f2   : > { %v3167_v40 = vadd.f32 %v3166_v27, %v2998_v34  ;;  %v3000_v26 = vpop.f32.mrf.mxu1 }
 0x5f3   : > { %v3335_v24 = vpop.f32.mrf.mxu3  ;;  %v3001_v41 = vadd.f32 %v3000_v26, %v2831_v28  ;;  %v8524_v26 = vld [vmem:[#allocation73_spill] sm:$0xff] }
 0x5f4   : > { %v3336_v31 = vadd.f32 %v3335_v24, %v3167_v40  ;;  %2870 = vmatmul.bf16.gmra.mxu0 %v8520_v62 }
 0x5f5   : > { %3039 = vmatmul.bf16.gmra.mxu1 %v8521_v44 }
 0x5f6   : > { %4221 = vst [vmem:[%s6766_s12 + $0x3b0] sm:$0xff] %v3336_v31  ;;  %3208 = vmatmul.bf16.gmra.mxu2 %v8522_v29  ;;  %v5673_v29 = vld [vmem:[%s6489_s4 + $0x310] sm:$0xf0] }
 0x5f8   : > { %3377 = vmatmul.bf16.gmra.mxu3 %v8523_v33  ;;  %v8525_v33 = vld [vmem:[#allocation74_spill] sm:$0xff] }
 0x5f9   : > { %v3169_v61 = vpop.f32.mrf.mxu2  ;;  %v2833_v30 = vpop.f32.mrf.mxu0 }
 0x5fa   : > { %v3170_v35 = vadd.f32 %v3169_v61, %v3001_v41  ;;  %v3002_v43 = vpop.f32.mrf.mxu1  ;;  %v8526_v41 = vld [vmem:[#allocation75_spill] sm:$0xff]  ;;  %v8527_v61 = vld [vmem:[#allocation76_spill] sm:$0xff] }
 0x5fb   : > { %v3338_v34 = vpop.f32.mrf.mxu3  ;;  %v3003_v32 = vadd.f32 %v3002_v43, %v2833_v30 }
 0x5fc   : > { %v3339_v60 = vadd.f32 %v3338_v34, %v3170_v35 }
 0x5fe   : > { %4225 = vst [vmem:[%s6766_s12 + $0x3d0] sm:$0xff] %v3339_v60 }
 0x601   : > { %v3171_v40 = vpop.f32.mrf.mxu2  ;;  %v2836_v27 = vpop.f32.mrf.mxu0 }
 0x602   : > { %v3172_v42 = vadd.f32 %v3171_v40, %v3003_v32  ;;  %v3005_v24 = vpop.f32.mrf.mxu1 }
 0x603   : > { %v3340_v46 = vpop.f32.mrf.mxu3  ;;  %v3006_v31 = vadd.f32 %v3005_v24, %v2836_v27 }
 0x604   : > { %v3341_v28 = vadd.f32 %v3340_v46, %v3172_v42  ;;  %2875 = vmatmul.bf16.gmra.mxu0 %v8524_v26 }
 0x605   : > { %3044 = vmatmul.bf16.gmra.mxu1 %v8525_v33  ;;  %v8528_v33 = vld [vmem:[#allocation77_spill] sm:$0xff] }
 0x606   : > { %4229 = vst [vmem:[%s6766_s12 + $0x3f0] sm:$0xff] %v3341_v28  ;;  %3213 = vmatmul.bf16.gmra.mxu2 %v8526_v41  ;;  %v8529_v41 = vld [vmem:[#allocation78_spill] sm:$0xff] }
 0x608   : > { %3382 = vmatmul.bf16.gmra.mxu3 %v8527_v61 }
 0x609   : > { %v3174_v35 = vpop.f32.mrf.mxu2  ;;  %v2838_v43 = vpop.f32.mrf.mxu0 }
 0x60a   : > { %v3175_v34 = vadd.f32 %v3174_v35, %v3006_v31  ;;  %v3007_v60 = vpop.f32.mrf.mxu1  ;;  %v8530_v31 = vld [vmem:[#allocation79_spill] sm:$0xff]  ;;  %v8531_v35 = vld [vmem:[#allocation80_spill] sm:$0xff] }
 0x60b   : > { %v3343_v30 = vpop.f32.mrf.mxu3  ;;  %v3008_v40 = vadd.f32 %v3007_v60, %v2838_v43 }
 0x60c   : > { %v3344_v32 = vadd.f32 %v3343_v30, %v3175_v34 }
 0x60e   : > { %4233 = vst [vmem:[%s6766_s12 + $0x410] sm:$0xff] %v3344_v32 }
 0x611   : > { %v3176_v42 = vpop.f32.mrf.mxu2  ;;  %v2841_v27 = vpop.f32.mrf.mxu0 }
 0x612   : > { %v3177_v46 = vadd.f32 %v3176_v42, %v3008_v40  ;;  %v3010_v24 = vpop.f32.mrf.mxu1 }
 0x613   : > { %v3345_v26 = vpop.f32.mrf.mxu3  ;;  %v3011_v61 = vadd.f32 %v3010_v24, %v2841_v27 }
 0x614   : > { %v3346_v28 = vadd.f32 %v3345_v26, %v3177_v46  ;;  %2880 = vmatmul.bf16.gmra.mxu0 %v8528_v33  ;;  %v5904_v33 = vld [vmem:[%s6489_s4 + $0x304] sm:$0xf] }
 0x615   : > { %3049 = vmatmul.bf16.gmra.mxu1 %v8529_v41  ;;  %v8534_v41 = vld [vmem:[#allocation83_spill] sm:$0xff] }
 0x616   : > { %4237 = vst [vmem:[%s6766_s12 + $0x430] sm:$0xff] %v3346_v28  ;;  %3218 = vmatmul.bf16.gmra.mxu2 %v8530_v31 }
 0x618   : > { %3387 = vmatmul.bf16.gmra.mxu3 %v8531_v35  ;;  %v8532_v35 = vld [vmem:[#allocation81_spill] sm:$0xff] }
 0x619   : > { %v3179_v34 = vpop.f32.mrf.mxu2  ;;  %v2843_v60 = vpop.f32.mrf.mxu0 }
 0x61a   : > { %v3180_v30 = vadd.f32 %v3179_v34, %v3011_v61  ;;  %v3012_v32 = vpop.f32.mrf.mxu1  ;;  %v8533_v34 = vld [vmem:[#allocation82_spill] sm:$0xff] }
 0x61b   : > { %v3348_v43 = vpop.f32.mrf.mxu3  ;;  %v3013_v26 = vadd.f32 %v3012_v32, %v2843_v60  ;;  %v5907_v60 = vld [vmem:[%s6489_s4 + $0x314] sm:$0xf0]  ;;  %v5905_v32 = vld [vmem:[%s6489_s4 + $0x30c] sm:$0xf] }
 0x61c   : > { %v3349_v40 = vadd.f32 %v3348_v43, %v3180_v30  ;;  %v8535_v30 = vld [vmem:[#allocation84_spill] sm:$0xff]  ;;  %v5679_v43 = vld [vmem:[%s6489_s4 + $0x308] sm:$0xf] }
 0x61e   : > { %4241 = vst [vmem:[%s6766_s12 + $0x450] sm:$0xff] %v3349_v40  ;;  %v5680_v40 = vor.u32 %v5907_v60, %v5679_v43  ;;  %v5676_v43 = vor.u32 %v5904_v33, %v5673_v29 }
 0x620   : > { %3768 = vmatpush.bf16.xpose.msrb.mxu2 %v5680_v40  ;;  %3599 = vmatpush.bf16.xpose.msrb.mxu1 %v5676_v43 }
 0x621   : > { %v3181_v42 = vpop.f32.mrf.mxu2  ;;  %v2846_v24 = vpop.f32.mrf.mxu0 }
 0x622   : > { %v3182_v46 = vadd.f32 %v3181_v42, %v3013_v26  ;;  %v3015_v28 = vpop.f32.mrf.mxu1  ;;  %v5681_v26 = vld [vmem:[%s6489_s4 + $0x318] sm:$0xf0] }
 0x623   : > { %v3350_v27 = vpop.f32.mrf.mxu3  ;;  %v3016_v61 = vadd.f32 %v3015_v28, %v2846_v24 }
 0x624   : > { %v3351_v31 = vadd.f32 %v3350_v27, %v3182_v46  ;;  %2885 = vmatmul.bf16.gmra.mxu0 %v8532_v35  ;;  %v5684_v46 = vor.u32 %v5905_v32, %v5681_v26 }
 0x625   : > { %3054 = vmatmul.bf16.gmra.mxu1 %v8533_v34  ;;  %v5906_v34 = vld [vmem:[%s6489_s4 + $0x30c] sm:$0xf0] }
 0x626   : > { %4245 = vst [vmem:[%s6766_s12 + $0x470] sm:$0xff] %v3351_v31  ;;  %3223 = vmatmul.bf16.gmra.mxu2 %v8534_v41  ;;  %3937 = vmatpush.bf16.xpose.msrb.mxu3 %v5684_v46  ;;  %v8537_v46 = vld [vmem:[#allocation86_spill] sm:$0xff] }
 0x628   : > { %3392 = vmatmul.bf16.gmra.mxu3 %v8535_v30  ;;  %v5671_v30 = vld [vmem:[%s6489_s4 + $0x300] sm:$0xf]  ;;  %s6151_s4 = scalar_lea.hbm %s6150_s15, 2048 }
 0x629   : > { %v3184_v42 = vpop.f32.mrf.mxu2  ;;  %v2848_v24 = vpop.f32.mrf.mxu0  ;;  %v5672_v35 = vor.u32 %v5906_v34, %v5671_v30  ;;  %v8538_v34 = vld [vmem:[#allocation87_spill] sm:$0xff]  ;;  %v8539_v30 = vld [vmem:[#allocation88_spill] sm:$0xff]  ;;  %p6152_p6 = scmp.ne.s32.totalorder %s6150_s15, %s6151_s4  ;;  %p6157_p8 = scmp.lt.s32.totalorder %s6155_s7, %s6151_s4 }
 0x62a   : > { %v3185_v31 = vadd.f32 %v3184_v42, %v3016_v61  ;;  %v3017_v28 = vpop.f32.mrf.mxu1  ;;  %v8536_v42 = vld [vmem:[#allocation85_spill] sm:$0xff] }
 0x62b   : > { %v3353_v27 = vpop.f32.mrf.mxu3  ;;  %v3018_v44 = vadd.f32 %v3017_v28, %v2848_v24  ;;  %3430 = vmatpush.bf16.xpose.msrb.mxu0 %v5672_v35  ;;  %p6153_p7 = pnand %p6152_p6, %p6452_p1  ;;  %p6158_p9 = por %p6157_p8, %p6156_p2 }
 0x62c   : > { %v3354_v41 = vadd.f32 %v3353_v27, %v3185_v31 }
 0x62d   : > { %p6154_p11 = pneg %p6153_p7 }
 0x62e   : > { %4249 = vst [vmem:[%s6766_s12 + $0x490] sm:$0xff] %v3354_v41 }
 0x62f   : > { %p6159_p10 = pnand %p6158_p9, %p6154_p11 }
 0x631   : > { %v3186_v60 = vpop.f32.mrf.mxu2  ;;  %v2851_v61 = vpop.f32.mrf.mxu0 }
 0x632   : > { %v3187_v62 = vadd.f32 %v3186_v60, %v3018_v44  ;;  %v3020_v40 = vpop.f32.mrf.mxu1 }
 0x633   : > { %v3355_v32 = vpop.f32.mrf.mxu3  ;;  %v3021_v41 = vadd.f32 %v3020_v40, %v2851_v61  ;;  %v8540_v40 = vld [vmem:[#allocation89_spill] sm:$0xff] }
 0x634   : > { %v3356_v26 = vadd.f32 %v3355_v32, %v3187_v62  ;;  %2890 = vmatmul.bf16.gmra.mxu0 %v8536_v42 }
 0x635   : > { %3059 = vmatmul.bf16.gmra.mxu1 %v8537_v46 }
 0x636   : > { %4253 = vst [vmem:[%s6766_s12 + $0x4b0] sm:$0xff] %v3356_v26  ;;  %3228 = vmatmul.bf16.gmra.mxu2 %v8538_v34 }
 0x638   : > { %3397 = vmatmul.bf16.gmra.mxu3 %v8539_v30  ;;  %v8541_v30 = vld [vmem:[#allocation90_spill] sm:$0xff] }
 0x639   : > { %v3189_v29 = vpop.f32.mrf.mxu2  ;;  %v2853_v35 = vpop.f32.mrf.mxu0 }
 0x63a   : > { %v3190_v33 = vadd.f32 %v3189_v29, %v3021_v41  ;;  %v3022_v31 = vpop.f32.mrf.mxu1  ;;  %v8542_v41 = vld [vmem:[#allocation91_spill] sm:$0xff]  ;;  %v8543_v29 = vld [vmem:[#allocation92_spill] sm:$0xff] }
 0x63b   : > { %v3358_v44 = vpop.f32.mrf.mxu3  ;;  %v3023_v24 = vadd.f32 %v3022_v31, %v2853_v35 }
 0x63c   : > { %v3359_v27 = vadd.f32 %v3358_v44, %v3190_v33 }
 0x63e   : > { %4257 = vst [vmem:[%s6766_s12 + $0x4d0] sm:$0xff] %v3359_v27 }
 0x641   : > { %v3191_v62 = vpop.f32.mrf.mxu2  ;;  %v2856_v60 = vpop.f32.mrf.mxu0 }
 0x642   : > { %v3192_v28 = vadd.f32 %v3191_v62, %v3023_v24  ;;  %v3025_v32 = vpop.f32.mrf.mxu1 }
 0x643   : > { %v3360_v43 = vpop.f32.mrf.mxu3  ;;  %v3026_v26 = vadd.f32 %v3025_v32, %v2856_v60 }
 0x644   : > { %v3361_v61 = vadd.f32 %v3360_v43, %v3192_v28  ;;  %2895 = vmatmul.bf16.gmra.mxu0 %v8540_v40 }
 0x645   : > { %3064 = vmatmul.bf16.gmra.mxu1 %v8541_v30  ;;  %v8544_v30 = vld [vmem:[#allocation93_spill] sm:$0xff] }
 0x646   : > { %4261 = vst [vmem:[%s6766_s12 + $0x4f0] sm:$0xff] %v3361_v61  ;;  %3233 = vmatmul.bf16.gmra.mxu2 %v8542_v41  ;;  %v8545_v41 = vld [vmem:[#allocation94_spill] sm:$0xff] }
 0x648   : > { %3402 = vmatmul.bf16.gmra.mxu3 %v8543_v29 }
 0x649   : > { %v3194_v33 = vpop.f32.mrf.mxu2  ;;  %v2858_v31 = vpop.f32.mrf.mxu0 }
 0x64a   : > { %v3195_v44 = vadd.f32 %v3194_v33, %v3026_v26  ;;  %v3027_v27 = vpop.f32.mrf.mxu1  ;;  %v8546_v26 = vld [vmem:[#allocation95_spill] sm:$0xff]  ;;  %v8547_v33 = vld [vmem:[#allocation96_spill] sm:$0xff] }
 0x64b   : > { %v3363_v35 = vpop.f32.mrf.mxu3  ;;  %v3028_v62 = vadd.f32 %v3027_v27, %v2858_v31 }
 0x64c   : > { %v3364_v24 = vadd.f32 %v3363_v35, %v3195_v44 }
 0x64e   : > { %4265 = vst [vmem:[%s6766_s12 + $0x510] sm:$0xff] %v3364_v24 }
 0x651   : > { %v3196_v28 = vpop.f32.mrf.mxu2  ;;  %v2861_v60 = vpop.f32.mrf.mxu0 }
 0x652   : > { %v3197_v43 = vadd.f32 %v3196_v28, %v3028_v62  ;;  %v3030_v32 = vpop.f32.mrf.mxu1 }
 0x653   : > { %v3365_v40 = vpop.f32.mrf.mxu3  ;;  %v3031_v29 = vadd.f32 %v3030_v32, %v2861_v60 }
 0x654   : > { %v3366_v61 = vadd.f32 %v3365_v40, %v3197_v43  ;;  %2900 = vmatmul.bf16.gmra.mxu0 %v8544_v30 }
 0x655   : > { %3069 = vmatmul.bf16.gmra.mxu1 %v8545_v41  ;;  %v8548_v41 = vld [vmem:[#allocation97_spill] sm:$0xff] }
 0x656   : > { %4269 = vst [vmem:[%s6766_s12 + $0x530] sm:$0xff] %v3366_v61  ;;  %3238 = vmatmul.bf16.gmra.mxu2 %v8546_v26  ;;  %v8549_v26 = vld [vmem:[#allocation98_spill] sm:$0xff] }
 0x658   : > { %3407 = vmatmul.bf16.gmra.mxu3 %v8547_v33 }
 0x659   : > { %v3199_v44 = vpop.f32.mrf.mxu2  ;;  %v2863_v27 = vpop.f32.mrf.mxu0 }
 0x65a   : > { %v3200_v35 = vadd.f32 %v3199_v44, %v3031_v29  ;;  %v3032_v24 = vpop.f32.mrf.mxu1  ;;  %v8550_v29 = vld [vmem:[#allocation99_spill] sm:$0xff]  ;;  %v8551_v44 = vld [vmem:[#allocation100_spill] sm:$0xff] }
 0x65b   : > { %v3368_v31 = vpop.f32.mrf.mxu3  ;;  %v3033_v28 = vadd.f32 %v3032_v24, %v2863_v27 }
 0x65c   : > { %v3369_v62 = vadd.f32 %v3368_v31, %v3200_v35 }
 0x65e   : > { %4273 = vst [vmem:[%s6766_s12 + $0x550] sm:$0xff] %v3369_v62 }
 0x661   : > { %v3201_v40 = vpop.f32.mrf.mxu2  ;;  %v2866_v60 = vpop.f32.mrf.mxu0 }
 0x662   : > { %v3202_v43 = vadd.f32 %v3201_v40, %v3033_v28  ;;  %v3035_v32 = vpop.f32.mrf.mxu1 }
 0x663   : > { %v3370_v30 = vpop.f32.mrf.mxu3  ;;  %v3036_v33 = vadd.f32 %v3035_v32, %v2866_v60 }
 0x664   : > { %v3371_v61 = vadd.f32 %v3370_v30, %v3202_v43  ;;  %2905 = vmatmul.bf16.gmra.mxu0 %v8548_v41 }
 0x665   : > { %3074 = vmatmul.bf16.gmra.mxu1 %v8549_v26 }
 0x666   : > { %4277 = vst [vmem:[%s6766_s12 + $0x570] sm:$0xff] %v3371_v61  ;;  %3243 = vmatmul.bf16.gmra.mxu2 %v8550_v29 }
 0x668   : > { %3412 = vmatmul.bf16.gmra.mxu3 %v8551_v44 }
 0x669   : > { %v3204_v35 = vpop.f32.mrf.mxu2  ;;  %v2868_v24 = vpop.f32.mrf.mxu0 }
 0x66a   : > { %v3205_v31 = vadd.f32 %v3204_v35, %v3036_v33  ;;  %v3037_v62 = vpop.f32.mrf.mxu1 }
 0x66b   : > { %v3373_v27 = vpop.f32.mrf.mxu3  ;;  %v3038_v40 = vadd.f32 %v3037_v62, %v2868_v24 }
 0x66c   : > { %v3374_v28 = vadd.f32 %v3373_v27, %v3205_v31 }
 0x66e   : > { %4281 = vst [vmem:[%s6766_s12 + $0x590] sm:$0xff] %v3374_v28 }
 0x671   : > { %v3206_v30 = vpop.f32.mrf.mxu2  ;;  %v2871_v60 = vpop.f32.mrf.mxu0 }
 0x672   : > { %v3207_v43 = vadd.f32 %v3206_v30, %v3038_v40  ;;  %v3040_v32 = vpop.f32.mrf.mxu1 }
 0x673   : > { %v3375_v41 = vpop.f32.mrf.mxu3  ;;  %v3041_v44 = vadd.f32 %v3040_v32, %v2871_v60 }
 0x674   : > { %v3376_v61 = vadd.f32 %v3375_v41, %v3207_v43  ;;  %2910 = vmatmul.bf16.gmra.mxu0 %v7309_v45 }
 0x675   : > { %3079 = vmatmul.bf16.gmra.mxu1 %v7311_v11 }
 0x676   : > { %4285 = vst [vmem:[%s6766_s12 + $0x5b0] sm:$0xff] %v3376_v61  ;;  %3248 = vmatmul.bf16.gmra.mxu2 %v7313_v9 }
 0x678   : > { %3417 = vmatmul.bf16.gmra.mxu3 %v7315_v17 }
 0x679   : > { %v3209_v33 = vpop.f32.mrf.mxu2  ;;  %v2873_v27 = vpop.f32.mrf.mxu0 }
 0x67a   : > { %v3210_v35 = vadd.f32 %v3209_v33, %v3041_v44  ;;  %v3042_v24 = vpop.f32.mrf.mxu1 }
 0x67b   : > { %v3378_v31 = vpop.f32.mrf.mxu3  ;;  %v3043_v28 = vadd.f32 %v3042_v24, %v2873_v27 }
 0x67c   : > { %v3379_v62 = vadd.f32 %v3378_v31, %v3210_v35 }
 0x67e   : > { %4289 = vst [vmem:[%s6766_s12 + $0x5d0] sm:$0xff] %v3379_v62 }
 0x681   : > { %v3211_v41 = vpop.f32.mrf.mxu2  ;;  %v2876_v43 = vpop.f32.mrf.mxu0 }
 0x682   : > { %v3212_v40 = vadd.f32 %v3211_v41, %v3043_v28  ;;  %v3045_v60 = vpop.f32.mrf.mxu1 }
 0x683   : > { %v3380_v30 = vpop.f32.mrf.mxu3  ;;  %v3046_v61 = vadd.f32 %v3045_v60, %v2876_v43 }
 0x684   : > { %v3381_v32 = vadd.f32 %v3380_v30, %v3212_v40  ;;  %3431 = vmatmul.bf16.vlgmr.msrb.gmra.mxu0 %v6575_v52 }
 0x685   : > { %3600 = vmatmul.bf16.vlgmr.msrb.gmra.mxu1 %v6577_v53 }
 0x686   : > { %4293 = vst [vmem:[%s6766_s12 + $0x5f0] sm:$0xff] %v3381_v32  ;;  %3769 = vmatmul.bf16.vlgmr.msrb.gmra.mxu2 %v6579_v54 }
 0x688   : > { %3938 = vmatmul.bf16.vlgmr.msrb.gmra.mxu3 %v6581_v55 }
 0x689   : > { %v3214_v44 = vpop.f32.mrf.mxu2  ;;  %v2878_v31 = vpop.f32.mrf.mxu0 }
 0x68a   : > { %v3215_v33 = vadd.f32 %v3214_v44, %v3046_v61  ;;  %v3047_v27 = vpop.f32.mrf.mxu1 }
 0x68b   : > { %v3383_v35 = vpop.f32.mrf.mxu3  ;;  %v3048_v62 = vadd.f32 %v3047_v27, %v2878_v31 }
 0x68c   : > { %v3384_v24 = vadd.f32 %v3383_v35, %v3215_v33 }
 0x68e   : > { %4297 = vst [vmem:[%s6766_s12 + $0x610] sm:$0xff] %v3384_v24 }
 0x691   : > { %v3216_v28 = vpop.f32.mrf.mxu2  ;;  %v2881_v40 = vpop.f32.mrf.mxu0 }
 0x692   : > { %v3217_v41 = vadd.f32 %v3216_v28, %v3048_v62  ;;  %v3050_v30 = vpop.f32.mrf.mxu1 }
 0x693   : > { %v3385_v52 = vpop.f32.mrf.mxu3  ;;  %v3051_v54 = vadd.f32 %v3050_v30, %v2881_v40 }
 0x694   : > { %v3386_v53 = vadd.f32 %v3385_v52, %v3217_v41  ;;  %3436 = vmatmul.bf16.gmra.mxu0 %v6595_v0 }
 0x695   : > { %3605 = vmatmul.bf16.gmra.mxu1 %v6597_v1 }
 0x696   : > { %4301 = vst [vmem:[%s6766_s12 + $0x630] sm:$0xff] %v3386_v53  ;;  %3774 = vmatmul.bf16.gmra.mxu2 %v6599_v2 }
 0x698   : > { %3943 = vmatmul.bf16.gmra.mxu3 %v6601_v3 }
 0x699   : > { %v3219_v55 = vpop.f32.mrf.mxu2  ;;  %v2883_v32 = vpop.f32.mrf.mxu0 }
 0x69a   : > { %v3220_v43 = vadd.f32 %v3219_v55, %v3051_v54  ;;  %v3052_v61 = vpop.f32.mrf.mxu1 }
 0x69b   : > { %v3388_v60 = vpop.f32.mrf.mxu3  ;;  %v3053_v33 = vadd.f32 %v3052_v61, %v2883_v32 }
 0x69c   : > { %v3389_v44 = vadd.f32 %v3388_v60, %v3220_v43 }
 0x69e   : > { %4305 = vst [vmem:[%s6766_s12 + $0x650] sm:$0xff] %v3389_v44 }
 0x6a1   : > { %v3221_v35 = vpop.f32.mrf.mxu2  ;;  %v2886_v27 = vpop.f32.mrf.mxu0 }
 0x6a2   : > { %v3222_v31 = vadd.f32 %v3221_v35, %v3053_v33  ;;  %v3055_v24 = vpop.f32.mrf.mxu1 }
 0x6a3   : > { %v3390_v0 = vpop.f32.mrf.mxu3  ;;  %v3056_v2 = vadd.f32 %v3055_v24, %v2886_v27 }
 0x6a4   : > { %v3391_v1 = vadd.f32 %v3390_v0, %v3222_v31  ;;  %3441 = vmatmul.bf16.gmra.mxu0 %v6615_v12 }
 0x6a5   : > { %3610 = vmatmul.bf16.gmra.mxu1 %v6617_v13 }
 0x6a6   : > { %4309 = vst [vmem:[%s6766_s12 + $0x670] sm:$0xff] %v3391_v1  ;;  %3779 = vmatmul.bf16.gmra.mxu2 %v6619_v14 }
 0x6a8   : > { %3948 = vmatmul.bf16.gmra.mxu3 %v6621_v15 }
 0x6a9   : > { %v3224_v3 = vpop.f32.mrf.mxu2  ;;  %v2888_v41 = vpop.f32.mrf.mxu0 }
 0x6aa   : > { %v3225_v62 = vadd.f32 %v3224_v3, %v3056_v2  ;;  %v3057_v52 = vpop.f32.mrf.mxu1 }
 0x6ab   : > { %v3393_v28 = vpop.f32.mrf.mxu3  ;;  %v3058_v30 = vadd.f32 %v3057_v52, %v2888_v41 }
 0x6ac   : > { %v3394_v40 = vadd.f32 %v3393_v28, %v3225_v62 }
 0x6ae   : > { %4313 = vst [vmem:[%s6766_s12 + $0x690] sm:$0xff] %v3394_v40 }
 0x6b1   : > { %v3226_v53 = vpop.f32.mrf.mxu2  ;;  %v2891_v55 = vpop.f32.mrf.mxu0 }
 0x6b2   : > { %v3227_v54 = vadd.f32 %v3226_v53, %v3058_v30  ;;  %v3060_v43 = vpop.f32.mrf.mxu1 }
 0x6b3   : > { %v3395_v12 = vpop.f32.mrf.mxu3  ;;  %v3061_v14 = vadd.f32 %v3060_v43, %v2891_v55 }
 0x6b4   : > { %v3396_v13 = vadd.f32 %v3395_v12, %v3227_v54  ;;  %3446 = vmatmul.bf16.gmra.mxu0 %v6643_v36 }
 0x6b5   : > { %3615 = vmatmul.bf16.gmra.mxu1 %v6645_v37 }
 0x6b6   : > { %4317 = vst [vmem:[%s6766_s12 + $0x6b0] sm:$0xff] %v3396_v13  ;;  %3784 = vmatmul.bf16.gmra.mxu2 %v6647_v38 }
 0x6b8   : > { %3953 = vmatmul.bf16.gmra.mxu3 %v6649_v39 }
 0x6b9   : > { %v3229_v15 = vpop.f32.mrf.mxu2  ;;  %v2893_v61 = vpop.f32.mrf.mxu0 }
 0x6ba   : > { %v3230_v60 = vadd.f32 %v3229_v15, %v3061_v14  ;;  %v3062_v44 = vpop.f32.mrf.mxu1 }
 0x6bb   : > { %v3398_v32 = vpop.f32.mrf.mxu3  ;;  %v3063_v35 = vadd.f32 %v3062_v44, %v2893_v61 }
 0x6bc   : > { %v3399_v33 = vadd.f32 %v3398_v32, %v3230_v60 }
 0x6be   : > { %4321 = vst [vmem:[%s6766_s12 + $0x6d0] sm:$0xff] %v3399_v33 }
 0x6c1   : > { %v3231_v31 = vpop.f32.mrf.mxu2  ;;  %v2896_v27 = vpop.f32.mrf.mxu0 }
 0x6c2   : > { %v3232_v0 = vadd.f32 %v3231_v31, %v3063_v35  ;;  %v3065_v24 = vpop.f32.mrf.mxu1 }
 0x6c3   : > { %v3400_v36 = vpop.f32.mrf.mxu3  ;;  %v3066_v38 = vadd.f32 %v3065_v24, %v2896_v27 }
 0x6c4   : > { %v3401_v37 = vadd.f32 %v3400_v36, %v3232_v0  ;;  %3451 = vmatmul.bf16.gmra.mxu0 %v6663_v48 }
 0x6c5   : > { %3620 = vmatmul.bf16.gmra.mxu1 %v6665_v49 }
 0x6c6   : > { %4325 = vst [vmem:[%s6766_s12 + $0x6f0] sm:$0xff] %v3401_v37  ;;  %3789 = vmatmul.bf16.gmra.mxu2 %v6667_v50 }
 0x6c8   : > { %3958 = vmatmul.bf16.gmra.mxu3 %v6669_v51 }
 0x6c9   : > { %v3234_v39 = vpop.f32.mrf.mxu2  ;;  %v2898_v3 = vpop.f32.mrf.mxu0 }
 0x6ca   : > { %v3235_v1 = vadd.f32 %v3234_v39, %v3066_v38  ;;  %v3067_v62 = vpop.f32.mrf.mxu1 }
 0x6cb   : > { %v3403_v2 = vpop.f32.mrf.mxu3  ;;  %v3068_v41 = vadd.f32 %v3067_v62, %v2898_v3 }
 0x6cc   : > { %v3404_v28 = vadd.f32 %v3403_v2, %v3235_v1 }
 0x6ce   : > { %4329 = vst [vmem:[%s6766_s12 + $0x710] sm:$0xff] %v3404_v28 }
 0x6d1   : > { %v3236_v52 = vpop.f32.mrf.mxu2  ;;  %v2901_v30 = vpop.f32.mrf.mxu0 }
 0x6d2   : > { %v3237_v40 = vadd.f32 %v3236_v52, %v3068_v41  ;;  %v3070_v53 = vpop.f32.mrf.mxu1 }
 0x6d3   : > { %v3405_v48 = vpop.f32.mrf.mxu3  ;;  %v3071_v50 = vadd.f32 %v3070_v53, %v2901_v30 }
 0x6d4   : > { %v3406_v49 = vadd.f32 %v3405_v48, %v3237_v40  ;;  %3456 = vmatmul.bf16.gmra.mxu0 %v6683_v4 }
 0x6d5   : > { %3625 = vmatmul.bf16.gmra.mxu1 %v6685_v5 }
 0x6d6   : > { %4333 = vst [vmem:[%s6766_s12 + $0x730] sm:$0xff] %v3406_v49  ;;  %3794 = vmatmul.bf16.gmra.mxu2 %v6687_v6 }
 0x6d8   : > { %3963 = vmatmul.bf16.gmra.mxu3 %v6689_v7 }
 0x6d9   : > { %v3239_v51 = vpop.f32.mrf.mxu2  ;;  %v2903_v55 = vpop.f32.mrf.mxu0 }
 0x6da   : > { %v3240_v54 = vadd.f32 %v3239_v51, %v3071_v50  ;;  %v3072_v43 = vpop.f32.mrf.mxu1 }
 0x6db   : > { %v3408_v12 = vpop.f32.mrf.mxu3  ;;  %v3073_v14 = vadd.f32 %v3072_v43, %v2903_v55 }
 0x6dc   : > { %v3409_v13 = vadd.f32 %v3408_v12, %v3240_v54 }
 0x6de   : > { %4337 = vst [vmem:[%s6766_s12 + $0x750] sm:$0xff] %v3409_v13 }
 0x6e1   : > { %v3241_v15 = vpop.f32.mrf.mxu2  ;;  %v2906_v32 = vpop.f32.mrf.mxu0 }
 0x6e2   : > { %v3242_v60 = vadd.f32 %v3241_v15, %v3073_v14  ;;  %v3075_v61 = vpop.f32.mrf.mxu1 }
 0x6e3   : > { %v3410_v4 = vpop.f32.mrf.mxu3  ;;  %v3076_v6 = vadd.f32 %v3075_v61, %v2906_v32 }
 0x6e4   : > { %v3411_v5 = vadd.f32 %v3410_v4, %v3242_v60  ;;  %3461 = vmatmul.bf16.gmra.mxu0 %v6703_v20 }
 0x6e5   : > { %3630 = vmatmul.bf16.gmra.mxu1 %v6705_v21 }
 0x6e6   : > { %4341 = vst [vmem:[%s6766_s12 + $0x770] sm:$0xff] %v3411_v5  ;;  %3799 = vmatmul.bf16.gmra.mxu2 %v6707_v22 }
 0x6e8   : > { %3968 = vmatmul.bf16.gmra.mxu3 %v6709_v23 }
 0x6e9   : > { %v3244_v7 = vpop.f32.mrf.mxu2  ;;  %v2908_v35 = vpop.f32.mrf.mxu0 }
 0x6ea   : > { %v3245_v44 = vadd.f32 %v3244_v7, %v3076_v6  ;;  %v3077_v31 = vpop.f32.mrf.mxu1 }
 0x6eb   : > { %v3413_v33 = vpop.f32.mrf.mxu3  ;;  %v3078_v36 = vadd.f32 %v3077_v31, %v2908_v35  ;;  %v8554_v35 = vld [vmem:[#allocation19_spill] sm:$0xff]  ;;  %v8555_v31 = vld [vmem:[#allocation20_spill] sm:$0xff] }
 0x6ec   : > { %v3414_v0 = vadd.f32 %v3413_v33, %v3245_v44  ;;  %v8552_v33 = vld [vmem:[#allocation17_spill] sm:$0xff] }
 0x6ee   : > { %4345 = vst [vmem:[%s6766_s12 + $0x790] sm:$0xff] %v3414_v0 }
 0x6f1   : > { %v3246_v27 = vpop.f32.mrf.mxu2  ;;  %v2911_v37 = vpop.f32.mrf.mxu0 }
 0x6f2   : > { %v3247_v24 = vadd.f32 %v3246_v27, %v3078_v36  ;;  %v3080_v38 = vpop.f32.mrf.mxu1 }
 0x6f3   : > { %v3415_v20 = vpop.f32.mrf.mxu3  ;;  %v3081_v22 = vadd.f32 %v3080_v38, %v2911_v37 }
 0x6f4   : > { %v3416_v21 = vadd.f32 %v3415_v20, %v3247_v24  ;;  %3466 = vmatmul.bf16.gmra.mxu0 %v6731_v56 }
 0x6f5   : > { %3635 = vmatmul.bf16.gmra.mxu1 %v6733_v57 }
 0x6f6   : > { %4349 = vst [vmem:[%s6766_s12 + $0x7b0] sm:$0xff] %v3416_v21  ;;  %3804 = vmatmul.bf16.gmra.mxu2 %v6735_v58 }
 0x6f8   : > { %3973 = vmatmul.bf16.gmra.mxu3 %v6737_v59 }
 0x6f9   : > { %v3249_v23 = vpop.f32.mrf.mxu2  ;;  %v2913_v2 = vpop.f32.mrf.mxu0 }
 0x6fa   : > { %v3250_v39 = vadd.f32 %v3249_v23, %v3081_v22  ;;  %v3082_v3 = vpop.f32.mrf.mxu1 }
 0x6fb   : > { %v3418_v1 = vpop.f32.mrf.mxu3  ;;  %v3083_v28 = vadd.f32 %v3082_v3, %v2913_v2  ;;  %v8556_v3 = vld [vmem:[#allocation21_spill] sm:$0xff] }
 0x6fc   : > { %v3419_v62 = vadd.f32 %v3418_v1, %v3250_v39 }
 0x6fe   : > { %4353 = vst [vmem:[%s6766_s12 + $0x7d0] sm:$0xff] %v3419_v62 }
 0x701   : > { %v3251_v41 = vpop.f32.mrf.mxu2  ;;  %v3432_v40 = vpop.f32.mrf.mxu0 }
 0x702   : > { %v3252_v52 = vadd.f32 %v3251_v41, %v3083_v28  ;;  %v3601_v48 = vpop.f32.mrf.mxu1  ;;  %v8557_v28 = vld [vmem:[#allocation22_spill] sm:$0xff]  ;;  %v8558_v41 = vld [vmem:[#allocation23_spill] sm:$0xff] }
 0x703   : > { %v3420_v56 = vpop.f32.mrf.mxu3  ;;  %v3602_v58 = vadd.f32 %v3601_v48, %v3432_v40 }
 0x704   : > { %v3421_v57 = vadd.f32 %v3420_v56, %v3252_v52  ;;  %3471 = vmatmul.bf16.gmra.mxu0 %v6751_v16  ;;  %v8559_v52 = vld [vmem:[#allocation24_spill] sm:$0xff] }
 0x705   : > { %3640 = vmatmul.bf16.gmra.mxu1 %v6753_v18 }
 0x706   : > { %4357 = vst [vmem:[%s6766_s12 + $0x7f0] sm:$0xff] %v3421_v57  ;;  %3809 = vmatmul.bf16.gmra.mxu2 %v6755_v19 }
 0x708   : > { %3978 = vmatmul.bf16.gmra.mxu3 %v6757_v25 }
 0x709   : > { %v3770_v59 = vpop.f32.mrf.mxu2  ;;  %v3434_v49 = vpop.f32.mrf.mxu0 }
 0x70a   : > { %v3771_v30 = vadd.f32 %v3770_v59, %v3602_v58  ;;  %v3603_v50 = vpop.f32.mrf.mxu1 }
 0x70b   : > { %v3939_v53 = vpop.f32.mrf.mxu3  ;;  %v3604_v54 = vadd.f32 %v3603_v50, %v3434_v49 }
 0x70c   : > { %v3940_v51 = vadd.f32 %v3939_v53, %v3771_v30 }
 0x70e   : > { %4106 = vst [vmem:[%s6766_s12 + $0x18] sm:$0xff] %v3940_v51 }
 0x711   : > { %v3772_v12 = vpop.f32.mrf.mxu2  ;;  %v3437_v43 = vpop.f32.mrf.mxu0 }
 0x712   : > { %v3773_v55 = vadd.f32 %v3772_v12, %v3604_v54  ;;  %v3606_v13 = vpop.f32.mrf.mxu1 }
 0x713   : > { %v3941_v16 = vpop.f32.mrf.mxu3  ;;  %v3607_v19 = vadd.f32 %v3606_v13, %v3437_v43  ;;  %v8561_v43 = vld [vmem:[#allocation26_spill] sm:$0xff]  ;;  %v8562_v13 = vld [vmem:[#allocation27_spill] sm:$0xff] }
 0x714   : > { %v3942_v18 = vadd.f32 %v3941_v16, %v3773_v55  ;;  %3476 = vmatmul.bf16.gmra.mxu0 %v6777_v47  ;;  %v8560_v55 = vld [vmem:[#allocation25_spill] sm:$0xff] }
 0x715   : > { %3645 = vmatmul.bf16.gmra.mxu1 %v6779_v63 }
 0x716   : > { %4110 = vst [vmem:[%s6766_s12 + $0x38] sm:$0xff] %v3942_v18  ;;  %3814 = vmatmul.bf16.gmra.mxu2 %v6781_v8  ;;  %v8563_v18 = vld [vmem:[#allocation28_spill] sm:$0xff] }
 0x718   : > { %3983 = vmatmul.bf16.gmra.mxu3 %v6783_v10  ;;  %v8553_v10 = vld [vmem:[#allocation18_spill] sm:$0xff] }
 0x719   : > { %v3775_v25 = vpop.f32.mrf.mxu2  ;;  %v3439_v60 = vpop.f32.mrf.mxu0 }
 0x71a   : > { %v3776_v14 = vadd.f32 %v3775_v25, %v3607_v19  ;;  %v3608_v4 = vpop.f32.mrf.mxu1 }
 0x71b   : > { %v3944_v15 = vpop.f32.mrf.mxu3  ;;  %v3609_v61 = vadd.f32 %v3608_v4, %v3439_v60 }
 0x71c   : > { %v3945_v32 = vadd.f32 %v3944_v15, %v3776_v14 }
 0x71e   : > { %4114 = vst [vmem:[%s6766_s12 + $0x58] sm:$0xff] %v3945_v32 }
 0x721   : > { %v3777_v5 = vpop.f32.mrf.mxu2  ;;  %v3442_v7 = vpop.f32.mrf.mxu0 }
 0x722   : > { %v3778_v6 = vadd.f32 %v3777_v5, %v3609_v61  ;;  %v3611_v44 = vpop.f32.mrf.mxu1 }
 0x723   : > { %v3946_v47 = vpop.f32.mrf.mxu3  ;;  %v3612_v8 = vadd.f32 %v3611_v44, %v3442_v7 }
 0x724   : > { %v3947_v63 = vadd.f32 %v3946_v47, %v3778_v6  ;;  %3481 = vmatmul.bf16.gmra.mxu0 %v8552_v33 }
 0x725   : > { %3650 = vmatmul.bf16.gmra.mxu1 %v8553_v10  ;;  %v8566_v10 = vld [vmem:[#allocation31_spill] sm:$0xff] }
 0x726   : > { %4118 = vst [vmem:[%s6766_s12 + $0x78] sm:$0xff] %v3947_v63  ;;  %3819 = vmatmul.bf16.gmra.mxu2 %v8554_v35  ;;  %v8564_v63 = vld [vmem:[#allocation29_spill] sm:$0xff]  ;;  %v8567_v35 = vld [vmem:[#allocation32_spill] sm:$0xff] }
 0x728   : > { %3988 = vmatmul.bf16.gmra.mxu3 %v8555_v31 }
 0x729   : > { %v3780_v0 = vpop.f32.mrf.mxu2  ;;  %v3444_v24 = vpop.f32.mrf.mxu0 }
 0x72a   : > { %v3781_v36 = vadd.f32 %v3780_v0, %v3612_v8  ;;  %v3613_v20 = vpop.f32.mrf.mxu1  ;;  %v8565_v8 = vld [vmem:[#allocation30_spill] sm:$0xff] }
 0x72b   : > { %v3949_v27 = vpop.f32.mrf.mxu3  ;;  %v3614_v38 = vadd.f32 %v3613_v20, %v3444_v24 }
 0x72c   : > { %v3950_v37 = vadd.f32 %v3949_v27, %v3781_v36 }
 0x72e   : > { %4122 = vst [vmem:[%s6766_s12 + $0x98] sm:$0xff] %v3950_v37 }
 0x731   : > { %v3782_v21 = vpop.f32.mrf.mxu2  ;;  %v3447_v39 = vpop.f32.mrf.mxu0 }
 0x732   : > { %v3783_v22 = vadd.f32 %v3782_v21, %v3614_v38  ;;  %v3616_v1 = vpop.f32.mrf.mxu1 }
 0x733   : > { %v3951_v23 = vpop.f32.mrf.mxu3  ;;  %v3617_v62 = vadd.f32 %v3616_v1, %v3447_v39 }
 0x734   : > { %v3952_v2 = vadd.f32 %v3951_v23, %v3783_v22  ;;  %3486 = vmatmul.bf16.gmra.mxu0 %v8556_v3 }
 0x735   : > { %3655 = vmatmul.bf16.gmra.mxu1 %v8557_v28  ;;  %v8570_v28 = vld [vmem:[#allocation35_spill] sm:$0xff] }
 0x736   : > { %4126 = vst [vmem:[%s6766_s12 + $0xb8] sm:$0xff] %v3952_v2  ;;  %3824 = vmatmul.bf16.gmra.mxu2 %v8558_v41  ;;  %v8568_v2 = vld [vmem:[#allocation33_spill] sm:$0xff]  ;;  %v8571_v41 = vld [vmem:[#allocation36_spill] sm:$0xff] }
 0x738   : > { %3993 = vmatmul.bf16.gmra.mxu3 %v8559_v52 }
 0x739   : > { %v3785_v56 = vpop.f32.mrf.mxu2  ;;  %v3449_v57 = vpop.f32.mrf.mxu0 }
 0x73a   : > { %v3786_v40 = vadd.f32 %v3785_v56, %v3617_v62  ;;  %v3618_v58 = vpop.f32.mrf.mxu1  ;;  %v8569_v62 = vld [vmem:[#allocation34_spill] sm:$0xff] }
 0x73b   : > { %v3954_v48 = vpop.f32.mrf.mxu3  ;;  %v3619_v30 = vadd.f32 %v3618_v58, %v3449_v57 }
 0x73c   : > { %v3955_v59 = vadd.f32 %v3954_v48, %v3786_v40 }
 0x73e   : > { %4130 = vst [vmem:[%s6766_s12 + $0xd8] sm:$0xff] %v3955_v59 }
 0x741   : > { %v3787_v53 = vpop.f32.mrf.mxu2  ;;  %v3452_v51 = vpop.f32.mrf.mxu0 }
 0x742   : > { %v3788_v49 = vadd.f32 %v3787_v53, %v3619_v30  ;;  %v3621_v54 = vpop.f32.mrf.mxu1 }
 0x743   : > { %v3956_v50 = vpop.f32.mrf.mxu3  ;;  %v3622_v16 = vadd.f32 %v3621_v54, %v3452_v51 }
 0x744   : > { %v3957_v12 = vadd.f32 %v3956_v50, %v3788_v49  ;;  %3491 = vmatmul.bf16.gmra.mxu0 %v8560_v55 }
 0x745   : > { %3660 = vmatmul.bf16.gmra.mxu1 %v8561_v43  ;;  %v8574_v43 = vld [vmem:[#allocation39_spill] sm:$0xff] }
 0x746   : > { %4134 = vst [vmem:[%s6766_s12 + $0xf8] sm:$0xff] %v3957_v12  ;;  %3829 = vmatmul.bf16.gmra.mxu2 %v8562_v13  ;;  %v8572_v12 = vld [vmem:[#allocation37_spill] sm:$0xff]  ;;  %v8575_v13 = vld [vmem:[#allocation40_spill] sm:$0xff] }
 0x748   : > { %3998 = vmatmul.bf16.gmra.mxu3 %v8563_v18 }
 0x749   : > { %v3790_v19 = vpop.f32.mrf.mxu2  ;;  %v3454_v15 = vpop.f32.mrf.mxu0 }
 0x74a   : > { %v3791_v25 = vadd.f32 %v3790_v19, %v3622_v16  ;;  %v3623_v60 = vpop.f32.mrf.mxu1  ;;  %v8573_v16 = vld [vmem:[#allocation38_spill] sm:$0xff] }
 0x74b   : > { %v3959_v14 = vpop.f32.mrf.mxu3  ;;  %v3624_v32 = vadd.f32 %v3623_v60, %v3454_v15 }
 0x74c   : > { %v3960_v4 = vadd.f32 %v3959_v14, %v3791_v25 }
 0x74e   : > { %4138 = vst [vmem:[%s6766_s12 + $0x118] sm:$0xff] %v3960_v4 }
 0x751   : > { %v3792_v61 = vpop.f32.mrf.mxu2  ;;  %v3457_v47 = vpop.f32.mrf.mxu0 }
 0x752   : > { %v3793_v5 = vadd.f32 %v3792_v61, %v3624_v32  ;;  %v3626_v7 = vpop.f32.mrf.mxu1 }
 0x753   : > { %v3961_v6 = vpop.f32.mrf.mxu3  ;;  %v3627_v33 = vadd.f32 %v3626_v7, %v3457_v47 }
 0x754   : > { %v3962_v44 = vadd.f32 %v3961_v6, %v3793_v5  ;;  %3496 = vmatmul.bf16.gmra.mxu0 %v8564_v63 }
 0x755   : > { %3665 = vmatmul.bf16.gmra.mxu1 %v8565_v8  ;;  %v8578_v8 = vld [vmem:[#allocation43_spill] sm:$0xff] }
 0x756   : > { %4142 = vst [vmem:[%s6766_s12 + $0x138] sm:$0xff] %v3962_v44  ;;  %3834 = vmatmul.bf16.gmra.mxu2 %v8566_v10  ;;  %v8576_v44 = vld [vmem:[#allocation41_spill] sm:$0xff]  ;;  %v8579_v10 = vld [vmem:[#allocation44_spill] sm:$0xff] }
 0x758   : > { %4003 = vmatmul.bf16.gmra.mxu3 %v8567_v35 }
 0x759   : > { %v3795_v31 = vpop.f32.mrf.mxu2  ;;  %v3459_v27 = vpop.f32.mrf.mxu0 }
 0x75a   : > { %v3796_v0 = vadd.f32 %v3795_v31, %v3627_v33  ;;  %v3628_v24 = vpop.f32.mrf.mxu1  ;;  %v8577_v33 = vld [vmem:[#allocation42_spill] sm:$0xff] }
 0x75b   : > { %v3964_v36 = vpop.f32.mrf.mxu3  ;;  %v3629_v37 = vadd.f32 %v3628_v24, %v3459_v27 }
 0x75c   : > { %v3965_v20 = vadd.f32 %v3964_v36, %v3796_v0 }
 0x75e   : > { %4146 = vst [vmem:[%s6766_s12 + $0x158] sm:$0xff] %v3965_v20 }
 0x761   : > { %v3797_v38 = vpop.f32.mrf.mxu2  ;;  %v3462_v23 = vpop.f32.mrf.mxu0 }
 0x762   : > { %v3798_v21 = vadd.f32 %v3797_v38, %v3629_v37  ;;  %v3631_v39 = vpop.f32.mrf.mxu1 }
 0x763   : > { %v3966_v22 = vpop.f32.mrf.mxu3  ;;  %v3632_v3 = vadd.f32 %v3631_v39, %v3462_v23 }
 0x764   : > { %v3967_v1 = vadd.f32 %v3966_v22, %v3798_v21  ;;  %3501 = vmatmul.bf16.gmra.mxu0 %v8568_v2 }
 0x765   : > { %3670 = vmatmul.bf16.gmra.mxu1 %v8569_v62  ;;  %v8582_v62 = vld [vmem:[#allocation47_spill] sm:$0xff] }
 0x766   : > { %4150 = vst [vmem:[%s6766_s12 + $0x178] sm:$0xff] %v3967_v1  ;;  %3839 = vmatmul.bf16.gmra.mxu2 %v8570_v28  ;;  %v8580_v1 = vld [vmem:[#allocation45_spill] sm:$0xff]  ;;  %v8583_v28 = vld [vmem:[#allocation48_spill] sm:$0xff] }
 0x768   : > { %4008 = vmatmul.bf16.gmra.mxu3 %v8571_v41 }
 0x769   : > { %v3800_v52 = vpop.f32.mrf.mxu2  ;;  %v3464_v48 = vpop.f32.mrf.mxu0 }
 0x76a   : > { %v3801_v56 = vadd.f32 %v3800_v52, %v3632_v3  ;;  %v3633_v57 = vpop.f32.mrf.mxu1  ;;  %v8581_v3 = vld [vmem:[#allocation46_spill] sm:$0xff] }
 0x76b   : > { %v3969_v40 = vpop.f32.mrf.mxu3  ;;  %v3634_v59 = vadd.f32 %v3633_v57, %v3464_v48 }
 0x76c   : > { %v3970_v58 = vadd.f32 %v3969_v40, %v3801_v56 }
 0x76e   : > { %4154 = vst [vmem:[%s6766_s12 + $0x198] sm:$0xff] %v3970_v58 }
 0x771   : > { %v3802_v30 = vpop.f32.mrf.mxu2  ;;  %v3467_v50 = vpop.f32.mrf.mxu0 }
 0x772   : > { %v3803_v53 = vadd.f32 %v3802_v30, %v3634_v59  ;;  %v3636_v51 = vpop.f32.mrf.mxu1 }
 0x773   : > { %v3971_v49 = vpop.f32.mrf.mxu3  ;;  %v3637_v55 = vadd.f32 %v3636_v51, %v3467_v50 }
 0x774   : > { %v3972_v54 = vadd.f32 %v3971_v49, %v3803_v53  ;;  %3506 = vmatmul.bf16.gmra.mxu0 %v8572_v12 }
 0x775   : > { %3675 = vmatmul.bf16.gmra.mxu1 %v8573_v16  ;;  %v8586_v16 = vld [vmem:[#allocation51_spill] sm:$0xff] }
 0x776   : > { %4158 = vst [vmem:[%s6766_s12 + $0x1b8] sm:$0xff] %v3972_v54  ;;  %3844 = vmatmul.bf16.gmra.mxu2 %v8574_v43  ;;  %v8584_v54 = vld [vmem:[#allocation49_spill] sm:$0xff]  ;;  %v8587_v43 = vld [vmem:[#allocation52_spill] sm:$0xff] }
 0x778   : > { %4013 = vmatmul.bf16.gmra.mxu3 %v8575_v13 }
 0x779   : > { %v3805_v18 = vpop.f32.mrf.mxu2  ;;  %v3469_v14 = vpop.f32.mrf.mxu0 }
 0x77a   : > { %v3806_v19 = vadd.f32 %v3805_v18, %v3637_v55  ;;  %v3638_v15 = vpop.f32.mrf.mxu1  ;;  %v8585_v55 = vld [vmem:[#allocation50_spill] sm:$0xff] }
 0x77b   : > { %v3974_v25 = vpop.f32.mrf.mxu3  ;;  %v3639_v4 = vadd.f32 %v3638_v15, %v3469_v14 }
 0x77c   : > { %v3975_v60 = vadd.f32 %v3974_v25, %v3806_v19 }
 0x77e   : > { %4162 = vst [vmem:[%s6766_s12 + $0x1d8] sm:$0xff] %v3975_v60 }
 0x781   : > { %v3807_v32 = vpop.f32.mrf.mxu2  ;;  %v3472_v6 = vpop.f32.mrf.mxu0 }
 0x782   : > { %v3808_v61 = vadd.f32 %v3807_v32, %v3639_v4  ;;  %v3641_v47 = vpop.f32.mrf.mxu1 }
 0x783   : > { %v3976_v5 = vpop.f32.mrf.mxu3  ;;  %v3642_v63 = vadd.f32 %v3641_v47, %v3472_v6 }
 0x784   : > { %v3977_v7 = vadd.f32 %v3976_v5, %v3808_v61  ;;  %3511 = vmatmul.bf16.gmra.mxu0 %v8576_v44 }
 0x785   : > { %3680 = vmatmul.bf16.gmra.mxu1 %v8577_v33  ;;  %v8590_v33 = vld [vmem:[#allocation55_spill] sm:$0xff] }
 0x786   : > { %4166 = vst [vmem:[%s6766_s12 + $0x1f8] sm:$0xff] %v3977_v7  ;;  %3849 = vmatmul.bf16.gmra.mxu2 %v8578_v8  ;;  %v8588_v7 = vld [vmem:[#allocation53_spill] sm:$0xff]  ;;  %v8591_v8 = vld [vmem:[#allocation56_spill] sm:$0xff] }
 0x788   : > { %4018 = vmatmul.bf16.gmra.mxu3 %v8579_v10 }
 0x789   : > { %v3810_v35 = vpop.f32.mrf.mxu2  ;;  %v3474_v36 = vpop.f32.mrf.mxu0 }
 0x78a   : > { %v3811_v31 = vadd.f32 %v3810_v35, %v3642_v63  ;;  %v3643_v27 = vpop.f32.mrf.mxu1  ;;  %v8589_v63 = vld [vmem:[#allocation54_spill] sm:$0xff] }
 0x78b   : > { %v3979_v0 = vpop.f32.mrf.mxu3  ;;  %v3644_v20 = vadd.f32 %v3643_v27, %v3474_v36 }
 0x78c   : > { %v3980_v24 = vadd.f32 %v3979_v0, %v3811_v31 }
 0x78e   : > { %4170 = vst [vmem:[%s6766_s12 + $0x218] sm:$0xff] %v3980_v24 }
 0x791   : > { %v3812_v37 = vpop.f32.mrf.mxu2  ;;  %v3477_v22 = vpop.f32.mrf.mxu0 }
 0x792   : > { %v3813_v38 = vadd.f32 %v3812_v37, %v3644_v20  ;;  %v3646_v23 = vpop.f32.mrf.mxu1 }
 0x793   : > { %v3981_v21 = vpop.f32.mrf.mxu3  ;;  %v3647_v2 = vadd.f32 %v3646_v23, %v3477_v22 }
 0x794   : > { %v3982_v39 = vadd.f32 %v3981_v21, %v3813_v38  ;;  %3516 = vmatmul.bf16.gmra.mxu0 %v8580_v1 }
 0x795   : > { %3685 = vmatmul.bf16.gmra.mxu1 %v8581_v3  ;;  %v8594_v3 = vld [vmem:[#allocation59_spill] sm:$0xff] }
 0x796   : > { %4174 = vst [vmem:[%s6766_s12 + $0x238] sm:$0xff] %v3982_v39  ;;  %3854 = vmatmul.bf16.gmra.mxu2 %v8582_v62  ;;  %v8592_v39 = vld [vmem:[#allocation57_spill] sm:$0xff]  ;;  %v8595_v62 = vld [vmem:[#allocation60_spill] sm:$0xff] }
 0x798   : > { %4023 = vmatmul.bf16.gmra.mxu3 %v8583_v28 }
 0x799   : > { %v3815_v41 = vpop.f32.mrf.mxu2  ;;  %v3479_v40 = vpop.f32.mrf.mxu0 }
 0x79a   : > { %v3816_v52 = vadd.f32 %v3815_v41, %v3647_v2  ;;  %v3648_v48 = vpop.f32.mrf.mxu1  ;;  %v8593_v2 = vld [vmem:[#allocation58_spill] sm:$0xff] }
 0x79b   : > { %v3984_v56 = vpop.f32.mrf.mxu3  ;;  %v3649_v58 = vadd.f32 %v3648_v48, %v3479_v40 }
 0x79c   : > { %v3985_v57 = vadd.f32 %v3984_v56, %v3816_v52 }
 0x79e   : > { %4178 = vst [vmem:[%s6766_s12 + $0x258] sm:$0xff] %v3985_v57 }
 0x7a1   : > { %v3817_v59 = vpop.f32.mrf.mxu2  ;;  %v3482_v49 = vpop.f32.mrf.mxu0 }
 0x7a2   : > { %v3818_v30 = vadd.f32 %v3817_v59, %v3649_v58  ;;  %v3651_v50 = vpop.f32.mrf.mxu1 }
 0x7a3   : > { %v3986_v53 = vpop.f32.mrf.mxu3  ;;  %v3652_v12 = vadd.f32 %v3651_v50, %v3482_v49 }
 0x7a4   : > { %v3987_v51 = vadd.f32 %v3986_v53, %v3818_v30  ;;  %3521 = vmatmul.bf16.gmra.mxu0 %v8584_v54 }
 0x7a5   : > { %3690 = vmatmul.bf16.gmra.mxu1 %v8585_v55  ;;  %v8598_v55 = vld [vmem:[#allocation63_spill] sm:$0xff] }
 0x7a6   : > { %4182 = vst [vmem:[%s6766_s12 + $0x278] sm:$0xff] %v3987_v51  ;;  %3859 = vmatmul.bf16.gmra.mxu2 %v8586_v16  ;;  %v8596_v51 = vld [vmem:[#allocation61_spill] sm:$0xff]  ;;  %v8599_v16 = vld [vmem:[#allocation64_spill] sm:$0xff] }
 0x7a8   : > { %4028 = vmatmul.bf16.gmra.mxu3 %v8587_v43 }
 0x7a9   : > { %v3820_v13 = vpop.f32.mrf.mxu2  ;;  %v3484_v25 = vpop.f32.mrf.mxu0 }
 0x7aa   : > { %v3821_v18 = vadd.f32 %v3820_v13, %v3652_v12  ;;  %v3653_v14 = vpop.f32.mrf.mxu1  ;;  %v8597_v12 = vld [vmem:[#allocation62_spill] sm:$0xff] }
 0x7ab   : > { %v3989_v19 = vpop.f32.mrf.mxu3  ;;  %v3654_v60 = vadd.f32 %v3653_v14, %v3484_v25 }
 0x7ac   : > { %v3990_v15 = vadd.f32 %v3989_v19, %v3821_v18 }
 0x7ae   : > { %4186 = vst [vmem:[%s6766_s12 + $0x298] sm:$0xff] %v3990_v15 }
 0x7b1   : > { %v3822_v4 = vpop.f32.mrf.mxu2  ;;  %v3487_v5 = vpop.f32.mrf.mxu0 }
 0x7b2   : > { %v3823_v32 = vadd.f32 %v3822_v4, %v3654_v60  ;;  %v3656_v6 = vpop.f32.mrf.mxu1 }
 0x7b3   : > { %v3991_v61 = vpop.f32.mrf.mxu3  ;;  %v3657_v44 = vadd.f32 %v3656_v6, %v3487_v5 }
 0x7b4   : > { %v3992_v47 = vadd.f32 %v3991_v61, %v3823_v32  ;;  %3526 = vmatmul.bf16.gmra.mxu0 %v8588_v7 }
 0x7b5   : > { %3695 = vmatmul.bf16.gmra.mxu1 %v8589_v63  ;;  %v8602_v63 = vld [vmem:[#allocation67_spill] sm:$0xff] }
 0x7b6   : > { %4190 = vst [vmem:[%s6766_s12 + $0x2b8] sm:$0xff] %v3992_v47  ;;  %3864 = vmatmul.bf16.gmra.mxu2 %v8590_v33  ;;  %v8600_v47 = vld [vmem:[#allocation65_spill] sm:$0xff]  ;;  %v8603_v33 = vld [vmem:[#allocation68_spill] sm:$0xff] }
 0x7b8   : > { %4033 = vmatmul.bf16.gmra.mxu3 %v8591_v8 }
 0x7b9   : > { %v3825_v10 = vpop.f32.mrf.mxu2  ;;  %v3489_v0 = vpop.f32.mrf.mxu0 }
 0x7ba   : > { %v3826_v35 = vadd.f32 %v3825_v10, %v3657_v44  ;;  %v3658_v36 = vpop.f32.mrf.mxu1  ;;  %v8601_v44 = vld [vmem:[#allocation66_spill] sm:$0xff] }
 0x7bb   : > { %v3994_v31 = vpop.f32.mrf.mxu3  ;;  %v3659_v24 = vadd.f32 %v3658_v36, %v3489_v0 }
 0x7bc   : > { %v3995_v27 = vadd.f32 %v3994_v31, %v3826_v35 }
 0x7be   : > { %4194 = vst [vmem:[%s6766_s12 + $0x2d8] sm:$0xff] %v3995_v27 }
 0x7c1   : > { %v3827_v20 = vpop.f32.mrf.mxu2  ;;  %v3492_v21 = vpop.f32.mrf.mxu0 }
 0x7c2   : > { %v3828_v37 = vadd.f32 %v3827_v20, %v3659_v24  ;;  %v3661_v22 = vpop.f32.mrf.mxu1 }
 0x7c3   : > { %v3996_v38 = vpop.f32.mrf.mxu3  ;;  %v3662_v1 = vadd.f32 %v3661_v22, %v3492_v21 }
 0x7c4   : > { %v3997_v23 = vadd.f32 %v3996_v38, %v3828_v37  ;;  %3531 = vmatmul.bf16.gmra.mxu0 %v8592_v39 }
 0x7c5   : > { %3700 = vmatmul.bf16.gmra.mxu1 %v8593_v2  ;;  %v8606_v2 = vld [vmem:[#allocation71_spill] sm:$0xff] }
 0x7c6   : > { %4198 = vst [vmem:[%s6766_s12 + $0x2f8] sm:$0xff] %v3997_v23  ;;  %3869 = vmatmul.bf16.gmra.mxu2 %v8594_v3  ;;  %v8604_v23 = vld [vmem:[#allocation69_spill] sm:$0xff]  ;;  %v8607_v3 = vld [vmem:[#allocation72_spill] sm:$0xff] }
 0x7c8   : > { %4038 = vmatmul.bf16.gmra.mxu3 %v8595_v62 }
 0x7c9   : > { %v3830_v28 = vpop.f32.mrf.mxu2  ;;  %v3494_v56 = vpop.f32.mrf.mxu0 }
 0x7ca   : > { %v3831_v41 = vadd.f32 %v3830_v28, %v3662_v1  ;;  %v3663_v40 = vpop.f32.mrf.mxu1  ;;  %v8605_v1 = vld [vmem:[#allocation70_spill] sm:$0xff] }
 0x7cb   : > { %v3999_v52 = vpop.f32.mrf.mxu3  ;;  %v3664_v57 = vadd.f32 %v3663_v40, %v3494_v56 }
 0x7cc   : > { %v4000_v48 = vadd.f32 %v3999_v52, %v3831_v41 }
 0x7ce   : > { %4202 = vst [vmem:[%s6766_s12 + $0x318] sm:$0xff] %v4000_v48 }
 0x7d1   : > { %v3832_v58 = vpop.f32.mrf.mxu2  ;;  %v3497_v53 = vpop.f32.mrf.mxu0 }
 0x7d2   : > { %v3833_v59 = vadd.f32 %v3832_v58, %v3664_v57  ;;  %v3666_v49 = vpop.f32.mrf.mxu1 }
 0x7d3   : > { %v4001_v30 = vpop.f32.mrf.mxu3  ;;  %v3667_v54 = vadd.f32 %v3666_v49, %v3497_v53 }
 0x7d4   : > { %v4002_v50 = vadd.f32 %v4001_v30, %v3833_v59  ;;  %3536 = vmatmul.bf16.gmra.mxu0 %v8596_v51 }
 0x7d5   : > { %3705 = vmatmul.bf16.gmra.mxu1 %v8597_v12  ;;  %v8610_v12 = vld [vmem:[#allocation75_spill] sm:$0xff] }
 0x7d6   : > { %4206 = vst [vmem:[%s6766_s12 + $0x338] sm:$0xff] %v4002_v50  ;;  %3874 = vmatmul.bf16.gmra.mxu2 %v8598_v55  ;;  %v8608_v50 = vld [vmem:[#allocation73_spill] sm:$0xff]  ;;  %v8611_v55 = vld [vmem:[#allocation76_spill] sm:$0xff] }
 0x7d8   : > { %4043 = vmatmul.bf16.gmra.mxu3 %v8599_v16 }
 0x7d9   : > { %v3835_v43 = vpop.f32.mrf.mxu2  ;;  %v3499_v19 = vpop.f32.mrf.mxu0 }
 0x7da   : > { %v3836_v13 = vadd.f32 %v3835_v43, %v3667_v54  ;;  %v3668_v25 = vpop.f32.mrf.mxu1  ;;  %v8609_v54 = vld [vmem:[#allocation74_spill] sm:$0xff] }
 0x7db   : > { %v4004_v18 = vpop.f32.mrf.mxu3  ;;  %v3669_v15 = vadd.f32 %v3668_v25, %v3499_v19 }
 0x7dc   : > { %v4005_v14 = vadd.f32 %v4004_v18, %v3836_v13 }
 0x7de   : > { %4210 = vst [vmem:[%s6766_s12 + $0x358] sm:$0xff] %v4005_v14 }
 0x7e1   : > { %v3837_v60 = vpop.f32.mrf.mxu2  ;;  %v3502_v61 = vpop.f32.mrf.mxu0 }
 0x7e2   : > { %v3838_v4 = vadd.f32 %v3837_v60, %v3669_v15  ;;  %v3671_v5 = vpop.f32.mrf.mxu1 }
 0x7e3   : > { %v4006_v32 = vpop.f32.mrf.mxu3  ;;  %v3672_v7 = vadd.f32 %v3671_v5, %v3502_v61 }
 0x7e4   : > { %v4007_v6 = vadd.f32 %v4006_v32, %v3838_v4  ;;  %3541 = vmatmul.bf16.gmra.mxu0 %v8600_v47 }
 0x7e5   : > { %3710 = vmatmul.bf16.gmra.mxu1 %v8601_v44  ;;  %v8614_v44 = vld [vmem:[#allocation79_spill] sm:$0xff] }
 0x7e6   : > { %4214 = vst [vmem:[%s6766_s12 + $0x378] sm:$0xff] %v4007_v6  ;;  %3879 = vmatmul.bf16.gmra.mxu2 %v8602_v63  ;;  %v8612_v6 = vld [vmem:[#allocation77_spill] sm:$0xff]  ;;  %v8615_v63 = vld [vmem:[#allocation80_spill] sm:$0xff] }
 0x7e8   : > { %4048 = vmatmul.bf16.gmra.mxu3 %v8603_v33 }
 0x7e9   : > { %v3840_v8 = vpop.f32.mrf.mxu2  ;;  %v3504_v31 = vpop.f32.mrf.mxu0 }
 0x7ea   : > { %v3841_v10 = vadd.f32 %v3840_v8, %v3672_v7  ;;  %v3673_v0 = vpop.f32.mrf.mxu1  ;;  %v8613_v7 = vld [vmem:[#allocation78_spill] sm:$0xff] }
 0x7eb   : > { %v4009_v35 = vpop.f32.mrf.mxu3  ;;  %v3674_v27 = vadd.f32 %v3673_v0, %v3504_v31 }
 0x7ec   : > { %v4010_v36 = vadd.f32 %v4009_v35, %v3841_v10 }
 0x7ee   : > { %4218 = vst [vmem:[%s6766_s12 + $0x398] sm:$0xff] %v4010_v36 }
 0x7f1   : > { %v3842_v24 = vpop.f32.mrf.mxu2  ;;  %v3507_v38 = vpop.f32.mrf.mxu0 }
 0x7f2   : > { %v3843_v20 = vadd.f32 %v3842_v24, %v3674_v27  ;;  %v3676_v21 = vpop.f32.mrf.mxu1 }
 0x7f3   : > { %v4011_v37 = vpop.f32.mrf.mxu3  ;;  %v3677_v39 = vadd.f32 %v3676_v21, %v3507_v38 }
 0x7f4   : > { %v4012_v22 = vadd.f32 %v4011_v37, %v3843_v20  ;;  %3546 = vmatmul.bf16.gmra.mxu0 %v8604_v23 }
 0x7f5   : > { %3715 = vmatmul.bf16.gmra.mxu1 %v8605_v1  ;;  %v8618_v1 = vld [vmem:[#allocation83_spill] sm:$0xff] }
 0x7f6   : > { %4222 = vst [vmem:[%s6766_s12 + $0x3b8] sm:$0xff] %v4012_v22  ;;  %3884 = vmatmul.bf16.gmra.mxu2 %v8606_v2  ;;  %v8616_v22 = vld [vmem:[#allocation81_spill] sm:$0xff]  ;;  %v8619_v2 = vld [vmem:[#allocation84_spill] sm:$0xff] }
 0x7f8   : > { %4053 = vmatmul.bf16.gmra.mxu3 %v8607_v3 }
 0x7f9   : > { %v3845_v62 = vpop.f32.mrf.mxu2  ;;  %v3509_v52 = vpop.f32.mrf.mxu0 }
 0x7fa   : > { %v3846_v28 = vadd.f32 %v3845_v62, %v3677_v39  ;;  %v3678_v56 = vpop.f32.mrf.mxu1  ;;  %v8617_v39 = vld [vmem:[#allocation82_spill] sm:$0xff] }
 0x7fb   : > { %v4014_v41 = vpop.f32.mrf.mxu3  ;;  %v3679_v48 = vadd.f32 %v3678_v56, %v3509_v52 }
 0x7fc   : > { %v4015_v40 = vadd.f32 %v4014_v41, %v3846_v28 }
 0x7fe   : > { %4226 = vst [vmem:[%s6766_s12 + $0x3d8] sm:$0xff] %v4015_v40 }
 0x801   : > { %v3847_v57 = vpop.f32.mrf.mxu2  ;;  %v3512_v30 = vpop.f32.mrf.mxu0 }
 0x802   : > { %v3848_v58 = vadd.f32 %v3847_v57, %v3679_v48  ;;  %v3681_v53 = vpop.f32.mrf.mxu1 }
 0x803   : > { %v4016_v59 = vpop.f32.mrf.mxu3  ;;  %v3682_v51 = vadd.f32 %v3681_v53, %v3512_v30 }
 0x804   : > { %v4017_v49 = vadd.f32 %v4016_v59, %v3848_v58  ;;  %3551 = vmatmul.bf16.gmra.mxu0 %v8608_v50  ;;  %v8620_v50 = vld [vmem:[#allocation88_spill] sm:$0xff] }
 0x805   : > { %3720 = vmatmul.bf16.gmra.mxu1 %v8609_v54 }
 0x806   : > { %4230 = vst [vmem:[%s6766_s12 + $0x3f8] sm:$0xff] %v4017_v49  ;;  %3889 = vmatmul.bf16.gmra.mxu2 %v8610_v12 }
 0x808   : > { %4058 = vmatmul.bf16.gmra.mxu3 %v8611_v55 }
 0x809   : > { %v3850_v16 = vpop.f32.mrf.mxu2  ;;  %v3514_v18 = vpop.f32.mrf.mxu0 }
 0x80a   : > { %v3851_v43 = vadd.f32 %v3850_v16, %v3682_v51  ;;  %v3683_v19 = vpop.f32.mrf.mxu1 }
 0x80b   : > { %v4019_v13 = vpop.f32.mrf.mxu3  ;;  %v3684_v14 = vadd.f32 %v3683_v19, %v3514_v18 }
 0x80c   : > { %v4020_v25 = vadd.f32 %v4019_v13, %v3851_v43 }
 0x80e   : > { %4234 = vst [vmem:[%s6766_s12 + $0x418] sm:$0xff] %v4020_v25 }
 0x811   : > { %v3852_v15 = vpop.f32.mrf.mxu2  ;;  %v3517_v32 = vpop.f32.mrf.mxu0 }
 0x812   : > { %v3853_v60 = vadd.f32 %v3852_v15, %v3684_v14  ;;  %v3686_v61 = vpop.f32.mrf.mxu1  ;;  %v8621_v15 = vld [vmem:[#allocation89_spill] sm:$0xff] }
 0x813   : > { %v4021_v4 = vpop.f32.mrf.mxu3  ;;  %v3687_v47 = vadd.f32 %v3686_v61, %v3517_v32  ;;  %v8624_v32 = vld [vmem:[#allocation92_spill] sm:$0xff] }
 0x814   : > { %v4022_v5 = vadd.f32 %v4021_v4, %v3853_v60  ;;  %3556 = vmatmul.bf16.gmra.mxu0 %v8612_v6  ;;  %v8622_v60 = vld [vmem:[#allocation90_spill] sm:$0xff]  ;;  %v8623_v4 = vld [vmem:[#allocation91_spill] sm:$0xff] }
 0x815   : > { %3725 = vmatmul.bf16.gmra.mxu1 %v8613_v7 }
 0x816   : > { %4238 = vst [vmem:[%s6766_s12 + $0x438] sm:$0xff] %v4022_v5  ;;  %3894 = vmatmul.bf16.gmra.mxu2 %v8614_v44 }
 0x818   : > { %4063 = vmatmul.bf16.gmra.mxu3 %v8615_v63 }
 0x819   : > { %v3855_v33 = vpop.f32.mrf.mxu2  ;;  %v3519_v35 = vpop.f32.mrf.mxu0 }
 0x81a   : > { %v3856_v8 = vadd.f32 %v3855_v33, %v3687_v47  ;;  %v3688_v31 = vpop.f32.mrf.mxu1 }
 0x81b   : > { %v4024_v10 = vpop.f32.mrf.mxu3  ;;  %v3689_v36 = vadd.f32 %v3688_v31, %v3519_v35 }
 0x81c   : > { %v4025_v0 = vadd.f32 %v4024_v10, %v3856_v8 }
 0x81e   : > { %4242 = vst [vmem:[%s6766_s12 + $0x458] sm:$0xff] %v4025_v0 }
 0x821   : > { %v3857_v27 = vpop.f32.mrf.mxu2  ;;  %v3522_v37 = vpop.f32.mrf.mxu0 }
 0x822   : > { %v3858_v24 = vadd.f32 %v3857_v27, %v3689_v36  ;;  %v3691_v38 = vpop.f32.mrf.mxu1  ;;  %v8625_v36 = vld [vmem:[#allocation93_spill] sm:$0xff] }
 0x823   : > { %v4026_v20 = vpop.f32.mrf.mxu3  ;;  %v3692_v23 = vadd.f32 %v3691_v38, %v3522_v37  ;;  %v8628_v37 = vld [vmem:[#allocation96_spill] sm:$0xff] }
 0x824   : > { %v4027_v21 = vadd.f32 %v4026_v20, %v3858_v24  ;;  %3561 = vmatmul.bf16.gmra.mxu0 %v8616_v22  ;;  %v8626_v24 = vld [vmem:[#allocation94_spill] sm:$0xff]  ;;  %v8627_v20 = vld [vmem:[#allocation95_spill] sm:$0xff] }
 0x825   : > { %3730 = vmatmul.bf16.gmra.mxu1 %v8617_v39 }
 0x826   : > { %4246 = vst [vmem:[%s6766_s12 + $0x478] sm:$0xff] %v4027_v21  ;;  %3899 = vmatmul.bf16.gmra.mxu2 %v8618_v1 }
 0x828   : > { %4068 = vmatmul.bf16.gmra.mxu3 %v8619_v2 }
 0x829   : > { %v3860_v3 = vpop.f32.mrf.mxu2  ;;  %v3524_v41 = vpop.f32.mrf.mxu0 }
 0x82a   : > { %v3861_v62 = vadd.f32 %v3860_v3, %v3692_v23  ;;  %v3693_v52 = vpop.f32.mrf.mxu1 }
 0x82b   : > { %v4029_v28 = vpop.f32.mrf.mxu3  ;;  %v3694_v40 = vadd.f32 %v3693_v52, %v3524_v41 }
 0x82c   : > { %v4030_v56 = vadd.f32 %v4029_v28, %v3861_v62 }
 0x82e   : > { %4250 = vst [vmem:[%s6766_s12 + $0x498] sm:$0xff] %v4030_v56 }
 0x831   : > { %v3862_v48 = vpop.f32.mrf.mxu2  ;;  %v3527_v59 = vpop.f32.mrf.mxu0 }
 0x832   : > { %v3863_v57 = vadd.f32 %v3862_v48, %v3694_v40  ;;  %v3696_v30 = vpop.f32.mrf.mxu1  ;;  %v8629_v40 = vld [vmem:[#allocation97_spill] sm:$0xff] }
 0x833   : > { %v4031_v58 = vpop.f32.mrf.mxu3  ;;  %v3697_v49 = vadd.f32 %v3696_v30, %v3527_v59 }
 0x834   : > { %v4032_v53 = vadd.f32 %v4031_v58, %v3863_v57  ;;  %3566 = vmatmul.bf16.gmra.mxu0 %v8536_v42  ;;  %v8630_v57 = vld [vmem:[#allocation100_spill] sm:$0xff] }
 0x835   : > { %3735 = vmatmul.bf16.gmra.mxu1 %v8537_v46 }
 0x836   : > { %4254 = vst [vmem:[%s6766_s12 + $0x4b8] sm:$0xff] %v4032_v53  ;;  %3904 = vmatmul.bf16.gmra.mxu2 %v8538_v34 }
 0x838   : > { %4073 = vmatmul.bf16.gmra.mxu3 %v8620_v50 }
 0x839   : > { %v3865_v51 = vpop.f32.mrf.mxu2  ;;  %v3529_v55 = vpop.f32.mrf.mxu0 }
 0x83a   : > { %v3866_v54 = vadd.f32 %v3865_v51, %v3697_v49  ;;  %v3698_v16 = vpop.f32.mrf.mxu1 }
 0x83b   : > { %v4034_v12 = vpop.f32.mrf.mxu3  ;;  %v3699_v13 = vadd.f32 %v3698_v16, %v3529_v55 }
 0x83c   : > { %v4035_v43 = vadd.f32 %v4034_v12, %v3866_v54 }
 0x83e   : > { %4258 = vst [vmem:[%s6766_s12 + $0x4d8] sm:$0xff] %v4035_v43 }
 0x841   : > { %v3867_v18 = vpop.f32.mrf.mxu2  ;;  %v3532_v25 = vpop.f32.mrf.mxu0 }
 0x842   : > { %v3868_v19 = vadd.f32 %v3867_v18, %v3699_v13  ;;  %v3701_v14 = vpop.f32.mrf.mxu1 }
 0x843   : > { %v4036_v42 = vpop.f32.mrf.mxu3  ;;  %v3702_v34 = vadd.f32 %v3701_v14, %v3532_v25 }
 0x844   : > { %v4037_v46 = vadd.f32 %v4036_v42, %v3868_v19  ;;  %3571 = vmatmul.bf16.gmra.mxu0 %v8621_v15 }
 0x845   : > { %3740 = vmatmul.bf16.gmra.mxu1 %v8622_v60 }
 0x846   : > { %4262 = vst [vmem:[%s6766_s12 + $0x4f8] sm:$0xff] %v4037_v46  ;;  %3909 = vmatmul.bf16.gmra.mxu2 %v8623_v4 }
 0x848   : > { %4078 = vmatmul.bf16.gmra.mxu3 %v8624_v32 }
 0x849   : > { %v3870_v61 = vpop.f32.mrf.mxu2  ;;  %v3534_v47 = vpop.f32.mrf.mxu0 }
 0x84a   : > { %v3871_v5 = vadd.f32 %v3870_v61, %v3702_v34  ;;  %v3703_v7 = vpop.f32.mrf.mxu1 }
 0x84b   : > { %v4039_v6 = vpop.f32.mrf.mxu3  ;;  %v3704_v63 = vadd.f32 %v3703_v7, %v3534_v47 }
 0x84c   : > { %v4040_v44 = vadd.f32 %v4039_v6, %v3871_v5 }
 0x84e   : > { %4266 = vst [vmem:[%s6766_s12 + $0x518] sm:$0xff] %v4040_v44 }
 0x851   : > { %v3872_v33 = vpop.f32.mrf.mxu2  ;;  %v3537_v35 = vpop.f32.mrf.mxu0 }
 0x852   : > { %v3873_v8 = vadd.f32 %v3872_v33, %v3704_v63  ;;  %v3706_v31 = vpop.f32.mrf.mxu1 }
 0x853   : > { %v4041_v10 = vpop.f32.mrf.mxu3  ;;  %v3707_v27 = vadd.f32 %v3706_v31, %v3537_v35 }
 0x854   : > { %v4042_v0 = vadd.f32 %v4041_v10, %v3873_v8  ;;  %3576 = vmatmul.bf16.gmra.mxu0 %v8625_v36 }
 0x855   : > { %3745 = vmatmul.bf16.gmra.mxu1 %v8626_v24 }
 0x856   : > { %4270 = vst [vmem:[%s6766_s12 + $0x538] sm:$0xff] %v4042_v0  ;;  %3914 = vmatmul.bf16.gmra.mxu2 %v8627_v20 }
 0x858   : > { %4083 = vmatmul.bf16.gmra.mxu3 %v8628_v37 }
 0x859   : > { %v3875_v38 = vpop.f32.mrf.mxu2  ;;  %v3539_v23 = vpop.f32.mrf.mxu0 }
 0x85a   : > { %v3876_v21 = vadd.f32 %v3875_v38, %v3707_v27  ;;  %v3708_v39 = vpop.f32.mrf.mxu1 }
 0x85b   : > { %v4044_v22 = vpop.f32.mrf.mxu3  ;;  %v3709_v2 = vadd.f32 %v3708_v39, %v3539_v23 }
 0x85c   : > { %v4045_v1 = vadd.f32 %v4044_v22, %v3876_v21 }
 0x85e   : > { %4274 = vst [vmem:[%s6766_s12 + $0x558] sm:$0xff] %v4045_v1 }
 0x861   : > { %v3877_v3 = vpop.f32.mrf.mxu2  ;;  %v3542_v41 = vpop.f32.mrf.mxu0 }
 0x862   : > { %v3878_v62 = vadd.f32 %v3877_v3, %v3709_v2  ;;  %v3711_v52 = vpop.f32.mrf.mxu1 }
 0x863   : > { %v4046_v28 = vpop.f32.mrf.mxu3  ;;  %v3712_v48 = vadd.f32 %v3711_v52, %v3542_v41 }
 0x864   : > { %v4047_v56 = vadd.f32 %v4046_v28, %v3878_v62  ;;  %3581 = vmatmul.bf16.gmra.mxu0 %v8629_v40 }
 0x865   : > { %3750 = vmatmul.bf16.gmra.mxu1 %v8549_v26 }
 0x866   : > { %4278 = vst [vmem:[%s6766_s12 + $0x578] sm:$0xff] %v4047_v56  ;;  %3919 = vmatmul.bf16.gmra.mxu2 %v8550_v29 }
 0x868   : > { %4088 = vmatmul.bf16.gmra.mxu3 %v8630_v57 }
 0x869   : > { %v3880_v58 = vpop.f32.mrf.mxu2  ;;  %v3544_v53 = vpop.f32.mrf.mxu0 }
 0x86a   : > { %v3881_v59 = vadd.f32 %v3880_v58, %v3712_v48  ;;  %v3713_v49 = vpop.f32.mrf.mxu1 }
 0x86b   : > { %v4049_v30 = vpop.f32.mrf.mxu3  ;;  %v3714_v51 = vadd.f32 %v3713_v49, %v3544_v53 }
 0x86c   : > { %v4050_v50 = vadd.f32 %v4049_v30, %v3881_v59 }
 0x86e   : > { %4282 = vst [vmem:[%s6766_s12 + $0x598] sm:$0xff] %v4050_v50 }
 0x871   : > { %v3882_v54 = vpop.f32.mrf.mxu2  ;;  %v3547_v16 = vpop.f32.mrf.mxu0 }
 0x872   : > { %v3883_v12 = vadd.f32 %v3882_v54, %v3714_v51  ;;  %v3716_v43 = vpop.f32.mrf.mxu1 }
 0x873   : > { %v4051_v55 = vpop.f32.mrf.mxu3  ;;  %v3717_v29 = vadd.f32 %v3716_v43, %v3547_v16 }
 0x874   : > { %v4052_v26 = vadd.f32 %v4051_v55, %v3883_v12  ;;  %3586 = vmatmul.bf16.gmra.mxu0 %v7309_v45 }
 0x875   : > { %3755 = vmatmul.bf16.gmra.mxu1 %v7311_v11 }
 0x876   : > { %4286 = vst [vmem:[%s6766_s12 + $0x5b8] sm:$0xff] %v4052_v26  ;;  %3924 = vmatmul.bf16.gmra.mxu2 %v7313_v9 }
 0x878   : > { %4093 = vmatmul.bf16.gmra.mxu3 %v7315_v17 }
 0x879   : > { %v3885_v13 = vpop.f32.mrf.mxu2  ;;  %v3549_v42 = vpop.f32.mrf.mxu0 }
 0x87a   : > { %v3886_v18 = vadd.f32 %v3885_v13, %v3717_v29  ;;  %v3718_v25 = vpop.f32.mrf.mxu1 }
 0x87b   : > { %v4054_v19 = vpop.f32.mrf.mxu3  ;;  %v3719_v46 = vadd.f32 %v3718_v25, %v3549_v42 }
 0x87c   : > { %v4055_v14 = vadd.f32 %v4054_v19, %v3886_v18 }
 0x87e   : > { %4290 = vst [vmem:[%s6766_s12 + $0x5d8] sm:$0xff] %v4055_v14 }
 0x881   : > { %v3887_v15 = vpop.f32.mrf.mxu2  ;;  %v3552_v60 = vpop.f32.mrf.mxu0 }
 0x882   : > { %v3888_v45 = vadd.f32 %v3887_v15, %v3719_v46  ;;  %v3721_v4 = vpop.f32.mrf.mxu1 }
 0x883   : > { %v4056_v34 = vpop.f32.mrf.mxu3  ;;  %v3722_v9 = vadd.f32 %v3721_v4, %v3552_v60 }
 0x884   : > { %v4057_v11 = vadd.f32 %v4056_v34, %v3888_v45 }
 0x886   : > { %4294 = vst [vmem:[%s6766_s12 + $0x5f8] sm:$0xff] %v4057_v11 }
 0x889   : > { %v3890_v32 = vpop.f32.mrf.mxu2  ;;  %v3554_v5 = vpop.f32.mrf.mxu0 }
 0x88a   : > { %v3891_v17 = vadd.f32 %v3890_v32, %v3722_v9  ;;  %v3723_v6 = vpop.f32.mrf.mxu1 }
 0x88b   : > { %v4059_v61 = vpop.f32.mrf.mxu3  ;;  %v3724_v7 = vadd.f32 %v3723_v6, %v3554_v5 }
 0x88c   : > { %v4060_v47 = vadd.f32 %v4059_v61, %v3891_v17 }
 0x88e   : > { %4298 = vst [vmem:[%s6766_s12 + $0x618] sm:$0xff] %v4060_v47 }
 0x891   : > { %v3892_v44 = vpop.f32.mrf.mxu2  ;;  %v3557_v8 = vpop.f32.mrf.mxu0 }
 0x892   : > { %v3893_v63 = vadd.f32 %v3892_v44, %v3724_v7  ;;  %v3726_v10 = vpop.f32.mrf.mxu1 }
 0x893   : > { %v4061_v33 = vpop.f32.mrf.mxu3  ;;  %v3727_v31 = vadd.f32 %v3726_v10, %v3557_v8 }
 0x894   : > { %v4062_v35 = vadd.f32 %v4061_v33, %v3893_v63 }
 0x896   : > { %4302 = vst [vmem:[%s6766_s12 + $0x638] sm:$0xff] %v4062_v35 }
 0x899   : > { %v3895_v0 = vpop.f32.mrf.mxu2  ;;  %v3559_v24 = vpop.f32.mrf.mxu0 }
 0x89a   : > { %v3896_v36 = vadd.f32 %v3895_v0, %v3727_v31  ;;  %v3728_v20 = vpop.f32.mrf.mxu1 }
 0x89b   : > { %v4064_v27 = vpop.f32.mrf.mxu3  ;;  %v3729_v38 = vadd.f32 %v3728_v20, %v3559_v24 }
 0x89c   : > { %v4065_v37 = vadd.f32 %v4064_v27, %v3896_v36 }
 0x89e   : > { %4306 = vst [vmem:[%s6766_s12 + $0x658] sm:$0xff] %v4065_v37 }
 0x8a1   : > { %v3897_v21 = vpop.f32.mrf.mxu2  ;;  %v3562_v39 = vpop.f32.mrf.mxu0 }
 0x8a2   : > { %v3898_v22 = vadd.f32 %v3897_v21, %v3729_v38  ;;  %v3731_v1 = vpop.f32.mrf.mxu1 }
 0x8a3   : > { %v4066_v23 = vpop.f32.mrf.mxu3  ;;  %v3732_v3 = vadd.f32 %v3731_v1, %v3562_v39 }
 0x8a4   : > { %v4067_v2 = vadd.f32 %v4066_v23, %v3898_v22 }
 0x8a6   : > { %4310 = vst [vmem:[%s6766_s12 + $0x678] sm:$0xff] %v4067_v2 }
 0x8a9   : > { %v3900_v62 = vpop.f32.mrf.mxu2  ;;  %v3564_v52 = vpop.f32.mrf.mxu0 }
 0x8aa   : > { %v3901_v28 = vadd.f32 %v3900_v62, %v3732_v3  ;;  %v3733_v56 = vpop.f32.mrf.mxu1 }
 0x8ab   : > { %v4069_v41 = vpop.f32.mrf.mxu3  ;;  %v3734_v48 = vadd.f32 %v3733_v56, %v3564_v52 }
 0x8ac   : > { %v4070_v40 = vadd.f32 %v4069_v41, %v3901_v28 }
 0x8ae   : > { %4314 = vst [vmem:[%s6766_s12 + $0x698] sm:$0xff] %v4070_v40 }
 0x8b1   : > { %v3902_v57 = vpop.f32.mrf.mxu2  ;;  %v3567_v30 = vpop.f32.mrf.mxu0 }
 0x8b2   : > { %v3903_v58 = vadd.f32 %v3902_v57, %v3734_v48  ;;  %v3736_v53 = vpop.f32.mrf.mxu1 }
 0x8b3   : > { %v4071_v59 = vpop.f32.mrf.mxu3  ;;  %v3737_v50 = vadd.f32 %v3736_v53, %v3567_v30 }
 0x8b4   : > { %v4072_v49 = vadd.f32 %v4071_v59, %v3903_v58 }
 0x8b6   : > { %4318 = vst [vmem:[%s6766_s12 + $0x6b8] sm:$0xff] %v4072_v49 }
 0x8b9   : > { %v3905_v51 = vpop.f32.mrf.mxu2  ;;  %v3569_v55 = vpop.f32.mrf.mxu0 }
 0x8ba   : > { %v3906_v54 = vadd.f32 %v3905_v51, %v3737_v50  ;;  %v3738_v16 = vpop.f32.mrf.mxu1 }
 0x8bb   : > { %v4074_v12 = vpop.f32.mrf.mxu3  ;;  %v3739_v26 = vadd.f32 %v3738_v16, %v3569_v55 }
 0x8bc   : > { %v4075_v43 = vadd.f32 %v4074_v12, %v3906_v54 }
 0x8be   : > { %4322 = vst [vmem:[%s6766_s12 + $0x6d8] sm:$0xff] %v4075_v43 }
 0x8c1   : > { %v3907_v29 = vpop.f32.mrf.mxu2  ;;  %v3572_v19 = vpop.f32.mrf.mxu0 }
 0x8c2   : > { %v3908_v13 = vadd.f32 %v3907_v29, %v3739_v26  ;;  %v3741_v42 = vpop.f32.mrf.mxu1 }
 0x8c3   : > { %v4076_v18 = vpop.f32.mrf.mxu3  ;;  %v3742_v14 = vadd.f32 %v3741_v42, %v3572_v19 }
 0x8c4   : > { %v4077_v25 = vadd.f32 %v4076_v18, %v3908_v13 }
 0x8c6   : > { %4326 = vst [vmem:[%s6766_s12 + $0x6f8] sm:$0xff] %v4077_v25 }
 0x8c9   : > { %v3910_v46 = vpop.f32.mrf.mxu2  ;;  %v3574_v34 = vpop.f32.mrf.mxu0 }
 0x8ca   : > { %v3911_v15 = vadd.f32 %v3910_v46, %v3742_v14  ;;  %v3743_v60 = vpop.f32.mrf.mxu1 }
 0x8cb   : > { %v4079_v45 = vpop.f32.mrf.mxu3  ;;  %v3744_v11 = vadd.f32 %v3743_v60, %v3574_v34 }
 0x8cc   : > { %v4080_v4 = vadd.f32 %v4079_v45, %v3911_v15 }
 0x8ce   : > { %4330 = vst [vmem:[%s6766_s12 + $0x718] sm:$0xff] %v4080_v4 }
 0x8d1   : > { %v3912_v9 = vpop.f32.mrf.mxu2  ;;  %v3577_v61 = vpop.f32.mrf.mxu0 }
 0x8d2   : > { %v3913_v32 = vadd.f32 %v3912_v9, %v3744_v11  ;;  %v3746_v5 = vpop.f32.mrf.mxu1 }
 0x8d3   : > { %v4081_v17 = vpop.f32.mrf.mxu3  ;;  %v3747_v47 = vadd.f32 %v3746_v5, %v3577_v61 }
 0x8d4   : > { %v4082_v6 = vadd.f32 %v4081_v17, %v3913_v32 }
 0x8d6   : > { %4334 = vst [vmem:[%s6766_s12 + $0x738] sm:$0xff] %v4082_v6 }
 0x8d9   : > { %v3915_v7 = vpop.f32.mrf.mxu2  ;;  %v3579_v33 = vpop.f32.mrf.mxu0 }
 0x8da   : > { %v3916_v44 = vadd.f32 %v3915_v7, %v3747_v47  ;;  %v3748_v8 = vpop.f32.mrf.mxu1 }
 0x8db   : > { %v4084_v63 = vpop.f32.mrf.mxu3  ;;  %v3749_v35 = vadd.f32 %v3748_v8, %v3579_v33 }
 0x8dc   : > { %v4085_v10 = vadd.f32 %v4084_v63, %v3916_v44 }
 0x8de   : > { %4338 = vst [vmem:[%s6766_s12 + $0x758] sm:$0xff] %v4085_v10 }
 0x8e1   : > { %v3917_v31 = vpop.f32.mrf.mxu2  ;;  %v3582_v27 = vpop.f32.mrf.mxu0 }
 0x8e2   : > { %v3918_v0 = vadd.f32 %v3917_v31, %v3749_v35  ;;  %v3751_v24 = vpop.f32.mrf.mxu1 }
 0x8e3   : > { %v4086_v36 = vpop.f32.mrf.mxu3  ;;  %v3752_v37 = vadd.f32 %v3751_v24, %v3582_v27 }
 0x8e4   : > { %v4087_v20 = vadd.f32 %v4086_v36, %v3918_v0 }
 0x8e6   : > { %4342 = vst [vmem:[%s6766_s12 + $0x778] sm:$0xff] %v4087_v20 }
 0x8e9   : > { %v3920_v38 = vpop.f32.mrf.mxu2  ;;  %v3584_v23 = vpop.f32.mrf.mxu0 }
 0x8ea   : > { %v3921_v21 = vadd.f32 %v3920_v38, %v3752_v37  ;;  %v3753_v39 = vpop.f32.mrf.mxu1 }
 0x8eb   : > { %v4089_v22 = vpop.f32.mrf.mxu3  ;;  %v3754_v2 = vadd.f32 %v3753_v39, %v3584_v23 }
 0x8ec   : > { %v4090_v1 = vadd.f32 %v4089_v22, %v3921_v21 }
 0x8ee   : > { %4346 = vst [vmem:[%s6766_s12 + $0x798] sm:$0xff] %v4090_v1 }
 0x8f1   : > { %v3922_v3 = vpop.f32.mrf.mxu2  ;;  %v3587_v41 = vpop.f32.mrf.mxu0 }
 0x8f2   : > { %v3923_v62 = vadd.f32 %v3922_v3, %v3754_v2  ;;  %v3756_v52 = vpop.f32.mrf.mxu1 }
 0x8f3   : > { %v4091_v28 = vpop.f32.mrf.mxu3  ;;  %v3757_v40 = vadd.f32 %v3756_v52, %v3587_v41 }
 0x8f4   : > { %v4092_v56 = vadd.f32 %v4091_v28, %v3923_v62 }
 0x8f6   : > { %4350 = vst [vmem:[%s6766_s12 + $0x7b8] sm:$0xff] %v4092_v56 }
 0x8f9   : > { %v3925_v48 = vpop.f32.mrf.mxu2  ;;  %v3589_v30 = vpop.f32.mrf.mxu0 }
 0x8fa   : > { %v3926_v57 = vadd.f32 %v3925_v48, %v3757_v40  ;;  %v3758_v53 = vpop.f32.mrf.mxu1 }
 0x8fb   : > { %v4094_v58 = vpop.f32.mrf.mxu3  ;;  %v3759_v49 = vadd.f32 %v3758_v53, %v3589_v30 }
 0x8fc   : > { %v4095_v59 = vadd.f32 %v4094_v58, %v3926_v57 }
 0x8fe   : > { %4354 = vst [vmem:[%s6766_s12 + $0x7d8] sm:$0xff] %v4095_v59 }
 0x901   : > { %v3927_v50 = vpop.f32.mrf.mxu2 }
 0x902   : > { %v3928_v51 = vadd.f32 %v3927_v50, %v3759_v49 }
 0x903   : > { %v4096_v54 = vpop.f32.mrf.mxu3 }
 0x904   : > { %v4097_v12 = vadd.f32 %v4096_v54, %v3928_v51 }
 0x906   : > { %4358 = vst [vmem:[%s6766_s12 + $0x7f8] sm:$0xff] %v4097_v12 }
 0x907   : > { %6162 = shalt.err (!%p6159_p10)
}
 0x908   : > { %s6291_s28 = smov 512   ;;  %s6292_s12 = smov 1536  }
 0x909   : > { %s6293_s5 = smov 32  }
 0x90a   : > { %5941 = dma.vmem_to_hbm [thread:$0]  (%p6452_p1), %s5148_s2, 32768, %s5150_s18, %s5132_s24, %s6291_s28, %s6292_s12, %s6293_s5  }
 0x90b PF: > { %p5955_p12 = scmp.ge.s32.totalorder %s6285_s22, 2  ;;  %s5164_s29 = sand.u32 1, %s6233_s9  }
 0x90c   : > { %s5165_s21 = scalar_lea.sflag [#allocation4], %s5164_s29 }
 0x90d   : > { %p5951_p3 = pnand %p5955_p12, %p6467_p5 }
 0x90f   : > { %p5952_p13 = pneg %p5951_p3 }
 0x911   : > { %6228 = dma.done.wait (%p5952_p13), %s5165_s21, 32768  }
 0x912   : > { %6230 = vsyncadd (%p5952_p13), %s5165_s21, 4294934528  ;;  %s21_s22 = sadd.s32 1, %s6285_s22   ;;  %s8635_s19 = sld [smem:[#allocation15_spill]] }
 0x913   : > { %p8059_p0 = scmp.ge.s32.totalorder %s21_s22, 8   ;;  %s8636_s27 = sld [smem:[#allocation12_spill]] }
 0x914   : > { %s8637_s2 = sld [smem:[#allocation13_spill]]  ;;  %s8639_s9 = smov %s6237_s10 }
 0x915   : > { %s8638_s21 = sld [smem:[#allocation14_spill]]  ;;  %s8640_s10 = smov %s6241_s11 }
 0x916   : > { %s8641_s11 = smov %s6464_s6  ;;  %s8642_s12 = smov %s6249_s13 }
 0x917   : > { %s8643_s13 = smov %s6253_s14  ;;  %s8645_s15 = smov %s6261_s16 }
 0x918   : > { %s8644_s14 = smov %s8635_s19  ;;  %s8646_s16 = smov %s6265_s17 }
 0x919   : > { %s8647_s17 = smov %s6461_s0  ;;  %s8648_s18 = smov %s6277_s20 }
 0x91a   : > { %s8649_s19 = smov %s8636_s27  ;;  %s8650_s20 = smov %s8637_s2 }
 0x91b   :  { %20 = sbr.rel (!%p8059_p0) target bundleno = 15 (0xf), region = 94 }
 0x920   :  { %5171 = vsyncpa [#allocation3], 1 }
 0x921   :  { %5173 = vsyncpa [#allocation3 + $0x1], 1 }
 0x922   :  { %5174 = vsyncpa [#allocation6], 1 }
 0x923   :  { %5176 = vsyncpa [#allocation6 + $0x1], 1 }
 0x924   :  { %5177 = vsyncpa [#allocation4], 1 }
 0x925   :  { %5179 = vsyncpa [#allocation4 + $0x1], 1 }

</bundles_post_ra>
